<compile_context>
chip_gen: v7x
topology: tpu7x:2x2x1
jax: 0.10.0
libtpu: 0.0.40
codegen_flags: <defaults>
</compile_context>

<pallas_src>
import functools

import jax
import jax.numpy as jnp
from jax.experimental import pallas as pl
from jax.experimental.pallas import tpu as pltpu


def _round_up(x, m):
    return (x + m - 1) // m * m


# ------------------------------ Pallas kernel ------------------------------ #

def _matmul_bias_act_kernel(x_ref, w_ref, b_ref, o_ref, *, activation):
    """One (tm,tn) tile of act(X @ W + b); f32 accumulation in the resident o_ref."""
    k = pl.program_id(2)

    @pl.when(k == 0)
    def _():
        o_ref[...] = jnp.zeros_like(o_ref)

    o_ref[...] += jnp.dot(x_ref[...], w_ref[...],
                          preferred_element_type=jnp.float32)

    @pl.when(k == pl.num_programs(2) - 1)
    def _():
        y = o_ref[...] + b_ref[...]            # (tm,tn) + (1,tn) broadcast
        if activation == "relu":
            y = jnp.maximum(y, 0.0)
        elif activation == "sigmoid":
            y = jax.nn.sigmoid(y)
        o_ref[...] = y


# ---------------------------- tiling heuristics ----------------------------- #

def _pick_kp(K):
    Kp = _round_up(K, 128)
    return Kp if Kp <= 1024 else _round_up(K, 512)


def _pick_tk(Kp):
    return Kp if Kp <= 1024 else 512


def _pick_np(N):
    Np = _round_up(N, 128)
    if Np <= 256:
        return Np
    for tn in range(1024, 127, -128):          # exact tiling, few tiles, no waste
        if Np % tn == 0 and 2 <= Np // tn <= 6:
            return Np
    n_j = max(2, -(-Np // 1024))               # else pad N slightly for 2-4 tiles
    return _round_up(-(-Np // n_j), 128) * n_j


def _pick_tn(Np):
    if Np <= 256:
        return Np
    for tn in range(min(Np, 1024), 127, -128):
        if Np % tn == 0 and Np // tn >= 2:
            return tn
    return 128


def _pick_m_tiling(M):
    Mp = _round_up(M, 8)
    if Mp <= 512:
        return Mp, Mp                          # single full-extent i tile
    tm = min(1024, _round_up(-(-Mp // 2), 8))  # ~2 tiles -> both TCs busy on v7x
    return _round_up(Mp, tm), tm


# ------------------------------ GEMM wrapper -------------------------------- #

def gemm_bias_act(x, w_p, b_p, n_out, activation):
    """act(x @ W + b). x:(M,K); w_p:(Kp,Np) bf16 pre-padded; b_p:(1,Np) f32.
    Returns (M, n_out) f32."""
    M, K = x.shape
    Kp, Np = w_p.shape
    Mp, tm = _pick_m_tiling(M)
    tn = _pick_tn(Np)
    tk = _pick_tk(Kp)

    xp = x.astype(jnp.bfloat16)
    if (Mp, Kp) != (M, K):
        xp = jnp.zeros((Mp, Kp), jnp.bfloat16).at[:M, :K].set(xp)

    grid = (Mp // tm, Np // tn, Kp // tk)
    kernel = functools.partial(_matmul_bias_act_kernel, activation=activation)
    out = pl.pallas_call(
        kernel,
        out_shape=jax.ShapeDtypeStruct((Mp, Np), jnp.float32),
        grid_spec=pltpu.PrefetchScalarGridSpec(
            num_scalar_prefetch=0,
            grid=grid,
            in_specs=[
                pl.BlockSpec((tm, tk), lambda i, j, k: (i, k)),
                pl.BlockSpec((tk, tn), lambda i, j, k: (k, j)),
                pl.BlockSpec((1, tn), lambda i, j, k: (0, j)),
            ],
            out_specs=pl.BlockSpec((tm, tn), lambda i, j, k: (i, j)),
        ),
        compiler_params=pltpu.CompilerParams(
            dimension_semantics=("parallel", "parallel", "arbitrary"),
            vmem_limit_bytes=32 * 1024 * 1024),
    )(xp, w_p, b_p)
    return out[:M, :n_out]


# ------------------- ConvTranspose2d via scatter-GEMM + col2im -------------- #

def _col2im_add(y, B, H, W, Cout, K, stride):
    """Scatter-add per-tap GEMM results into the transposed-conv output (JAX glue)."""
    Hout = (H - 1) * stride + K
    Wout = (W - 1) * stride + K
    y = y.reshape(B, H, W, Cout, K, K)
    out = jnp.zeros((B, Cout, Hout, Wout), jnp.float32)
    for ky in range(K):
        for kx in range(K):
            patch = jnp.transpose(y[:, :, :, :, ky, kx], (0, 3, 1, 2))  # (B,Cout,H,W)
            out = out.at[:, :,
                         ky:ky + stride * (H - 1) + 1:stride,
                         kx:kx + stride * (W - 1) + 1:stride].add(patch)
    return out


def deconv_scatter(x, gemm_params, bias, Cout, K, stride, activation):
    """PyTorch-semantics ConvTranspose2d (padding=0, output_padding=0) + act.
    Hot path = one Pallas GEMM (B*H*W, Cin) @ (Cin, Cout*K*K)."""
    B, Cin, H, W = x.shape
    xm = jnp.transpose(x, (0, 2, 3, 1)).reshape(B * H * W, Cin)
    y = gemm_bias_act(xm, gemm_params["w"], gemm_params["b"],
                      Cout * K * K, "none")
    out = _col2im_add(y, B, H, W, Cout, K, stride)
    out = out + bias.reshape(1, -1, 1, 1)
    if activation == "relu":
        out = jnp.maximum(out, 0.0)
    elif activation == "sigmoid":
        out = jax.nn.sigmoid(out)
    return out


# --------------------------- parameter preparation -------------------------- #

def _prep_gemm_weight(w, b):
    """Fold a GEMM weight (K,N) [+ bias (N,)] into padded bf16 / f32 operands."""
    K, N = w.shape
    Kp, Np = _pick_kp(K), _pick_np(N)
    w_p = jnp.zeros((Kp, Np), jnp.bfloat16).at[:K, :N].set(w.astype(jnp.bfloat16))
    b_p = jnp.zeros((1, Np), jnp.float32)
    if b is not None:
        b_p = b_p.at[0, :N].set(b.astype(jnp.float32))
    return {"w": w_p, "b": b_p}


def prepare_decoder_params(params):
    """One-time reshape / pad / bf16-cast of all weights into GEMM-ready form."""
    prep = {"fc1": _prep_gemm_weight(params["fc1_w"], params["fc1_b"])}

    # deconv1 acts on a 1x1 input -> plain GEMM over (co,ky,kx); bias per co tap.
    cin, cout, k, _ = params["d1_w"].shape                       # (1024,128,5,5)
    prep["d1"] = _prep_gemm_weight(params["d1_w"].reshape(cin, cout * k * k),
                                   jnp.repeat(params["d1_b"], k * k))

    # deconv2..4: scatter-form weight (Cin, Cout*K*K); bias applied after col2im.
    for name in ("d2", "d3", "d4"):
        w = params[name + "_w"]
        cin, cout, k, _ = w.shape
        prep[name] = _prep_gemm_weight(w.reshape(cin, cout * k * k), None)
        prep[name + "_bias"] = params[name + "_b"].astype(jnp.float32)
    return prep


# ------------------------------- Decoder model ------------------------------ #

def init_decoder_params(key, img_channels, latent_size):
    ks = jax.random.split(key, 10)

    def uni(k, shape, fan_in):
        bound = 1.0 / (fan_in ** 0.5)
        return jax.random.uniform(k, shape, jnp.float32, -bound, bound)

    p = {}
    p["fc1_w"] = uni(ks[0], (latent_size, 1024), latent_size)
    p["fc1_b"] = uni(ks[1], (1024,), latent_size)
    # ConvTranspose2d weight layout: (Cin, Cout, K, K) — same as PyTorch
    p["d1_w"] = uni(ks[2], (1024, 128, 5, 5), 128 * 25)
    p["d1_b"] = uni(ks[3], (128,), 128 * 25)
    p["d2_w"] = uni(ks[4], (128, 64, 5, 5), 64 * 25)
    p["d2_b"] = uni(ks[5], (64,), 64 * 25)
    p["d3_w"] = uni(ks[6], (64, 32, 6, 6), 32 * 36)
    p["d3_b"] = uni(ks[7], (32,), 32 * 36)
    p["d4_w"] = uni(ks[8], (32, img_channels, 6, 6), img_channels * 36)
    p["d4_b"] = uni(ks[9], (img_channels,), img_channels * 36)
    return p


def decoder_forward(prep, x, *, img_channels):
    # x: (B, latent_size)
    B = x.shape[0]
    h = gemm_bias_act(x, prep["fc1"]["w"], prep["fc1"]["b"], 1024, "relu")      # (B,1024)
    d1 = gemm_bias_act(h, prep["d1"]["w"], prep["d1"]["b"], 128 * 25, "relu")   # (B,3200)
    feat = d1.reshape(B, 128, 5, 5)                                             # deconv1 out
    feat = deconv_scatter(feat, prep["d2"], prep["d2_bias"], 64, 5, 2, "relu")  # (B,64,13,13)
    feat = deconv_scatter(feat, prep["d3"], prep["d3_bias"], 32, 6, 2, "relu")  # (B,32,30,30)
    recon = deconv_scatter(feat, prep["d4"], prep["d4_bias"],
                           img_channels, 6, 2, "sigmoid")                       # (B,C,64,64)
    return recon


# --------------------------- pure-JAX reference ------------------------------ #

def _ref_conv_transpose(x, w, b, stride):
    K = w.shape[2]
    w_conv = jnp.transpose(w[:, :, ::-1, ::-1], (1, 0, 2, 3))   # (Cout,Cin,K,K)
    out = jax.lax.conv_general_dilated(
        x, w_conv, window_strides=(1, 1),
        padding=[(K - 1, K - 1), (K - 1, K - 1)],
        lhs_dilation=(stride, stride),
        dimension_numbers=("NCHW", "OIHW", "NCHW"))
    return out + b.reshape(1, -1, 1, 1)


def decoder_forward_ref(params, x):
    h = jnp.maximum(x @ params["fc1_w"] + params["fc1_b"], 0.0)
    B = x.shape[0]
    feat = h.reshape(B, 1024, 1, 1)
    feat = jnp.maximum(_ref_conv_transpose(feat, params["d1_w"], params["d1_b"], 2), 0.0)
    feat = jnp.maximum(_ref_conv_transpose(feat, params["d2_w"], params["d2_b"], 2), 0.0)
    feat = jnp.maximum(_ref_conv_transpose(feat, params["d3_w"], params["d3_b"], 2), 0.0)
    return jax.nn.sigmoid(_ref_conv_transpose(feat, params["d4_w"], params["d4_b"], 2))


if __name__ == "__main__":
    key = jax.random.PRNGKey(0)
    pkey, xkey = jax.random.split(key)
    img_channels, latent_size, batch = 3, 32, 2

    params = init_decoder_params(pkey, img_channels, latent_size)
    x = jax.random.normal(xkey, (batch, latent_size), jnp.float32)

    prep = prepare_decoder_params(params)          # one-time fold / pad / bf16 cast

    fwd = jax.jit(decoder_forward, static_argnames=("img_channels",))
    recon = jax.block_until_ready(fwd(prep, x, img_channels=img_channels))
    assert recon.shape == (batch, img_channels, 64, 64), recon.shape

    ref = jax.block_until_ready(decoder_forward_ref(params, x))
    max_err = float(jnp.max(jnp.abs(recon - ref)))
    # bf16 operands with f32 accumulation: typical max |err| ~1e-3 for this net.
    assert max_err < 2e-2, f"max abs diff too large: {max_err}"

    print("KERNEL_OK")
</pallas_src>

<mosaic_0001>
module attributes {stable_mosaic.version = 11 : i64} {
  func.func @_matmul_bias_act_kernel(%arg0: i32, %arg1: i32, %arg2: i32, %arg3: memref<8x1024xbf16, #tpu.memory_space<vmem>>, %arg4: memref<1024x640xbf16, #tpu.memory_space<vmem>>, %arg5: memref<1x640xf32, #tpu.memory_space<vmem>>, %arg6: memref<8x640xf32, #tpu.memory_space<vmem>>) attributes {dimension_semantics = [#tpu.dimension_semantics<parallel>, #tpu.dimension_semantics<parallel>, #tpu.dimension_semantics<arbitrary>], iteration_bounds = array<i64: 1, 5, 1>, scalar_prefetch = 0 : i64, scratch_operands = 0 : i64, tpu.core_type = #tpu.core_type<tc>, window_params = [{transform_indices = @transform_0, window_bounds = array<i64: 8, 1024>}, {transform_indices = @transform_1, window_bounds = array<i64: 1024, 640>}, {transform_indices = @transform_2, window_bounds = array<i64: 1, 640>}, {transform_indices = @transform_3, window_bounds = array<i64: 8, 640>}]} {
    %c0_i32 = arith.constant 0 : i32
    %0 = arith.cmpi eq, %arg2, %c0_i32 : i32
    %1 = arith.extui %0 : i1 to i32
    %c0_i32_0 = arith.constant 0 : i32
    %2 = arith.cmpi ne, %1, %c0_i32_0 : i32
    scf.if %2 {
      %cst_10 = arith.constant 0.000000e+00 : f32
      %12 = vector.broadcast %cst_10 : f32 to vector<8x640xf32>
      %c0_11 = arith.constant 0 : index
      %c0_12 = arith.constant 0 : index
      %13 = vector.load %arg6[%c0_11, %c0_12] : memref<8x640xf32, #tpu.memory_space<vmem>>, vector<8x640xf32>
      tpu.vector_store %arg6[%c0_11, %c0_12], %12 {strides = array<i32>} : memref<8x640xf32, #tpu.memory_space<vmem>>, vector<8x640xf32>,
    } else {
    }
    %c0 = arith.constant 0 : index
    %c0_1 = arith.constant 0 : index
    %3 = vector.load %arg6[%c0, %c0_1] : memref<8x640xf32, #tpu.memory_space<vmem>>, vector<8x640xf32>
    %c0_2 = arith.constant 0 : index
    %c0_3 = arith.constant 0 : index
    %4 = vector.load %arg3[%c0_2, %c0_3] : memref<8x1024xbf16, #tpu.memory_space<vmem>>, vector<8x1024xbf16>
    %c0_4 = arith.constant 0 : index
    %c0_5 = arith.constant 0 : index
    %5 = vector.load %arg4[%c0_4, %c0_5] : memref<1024x640xbf16, #tpu.memory_space<vmem>>, vector<1024x640xbf16>
    %cst = arith.constant dense<0.000000e+00> : vector<8x640xf32>
    %6 = tpu.matmul %4, %5, %cst {dimension_numbers = #tpu.dot_dimension_numbers<[1], [0], [0], [1], [0, 0, 1, 1], [], []>} : vector<8x1024xbf16>, vector<1024x640xbf16>, vector<8x640xf32> -> vector<8x640xf32>
    %7 = arith.addf %3, %6 : vector<8x640xf32>
    %c0_6 = arith.constant 0 : index
    %c0_7 = arith.constant 0 : index
    %8 = vector.load %arg6[%c0_6, %c0_7] : memref<8x640xf32, #tpu.memory_space<vmem>>, vector<8x640xf32>
    tpu.vector_store %arg6[%c0_6, %c0_7], %7 {strides = array<i32>} : memref<8x640xf32, #tpu.memory_space<vmem>>, vector<8x640xf32>,
    %c0_i32_8 = arith.constant 0 : i32
    %9 = arith.cmpi eq, %arg2, %c0_i32_8 : i32
    %10 = arith.extui %9 : i1 to i32
    %c0_i32_9 = arith.constant 0 : i32
    %11 = arith.cmpi ne, %10, %c0_i32_9 : i32
    scf.if %11 {
      %c0_10 = arith.constant 0 : index
      %c0_11 = arith.constant 0 : index
      %12 = vector.load %arg6[%c0_10, %c0_11] : memref<8x640xf32, #tpu.memory_space<vmem>>, vector<8x640xf32>
      %c0_12 = arith.constant 0 : index
      %c0_13 = arith.constant 0 : index
      %13 = vector.load %arg5[%c0_12, %c0_13] : memref<1x640xf32, #tpu.memory_space<vmem>>, vector<1x640xf32>
      %14 = vector.broadcast %13 : vector<1x640xf32> to vector<8x640xf32>
      %15 = arith.addf %12, %14 : vector<8x640xf32>
      %cst_14 = arith.constant 0.000000e+00 : f32
      %16 = vector.broadcast %cst_14 : f32 to vector<8x640xf32>
      %17 = arith.maximumf %15, %16 : vector<8x640xf32>
      %c0_15 = arith.constant 0 : index
      %c0_16 = arith.constant 0 : index
      %18 = vector.load %arg6[%c0_15, %c0_16] : memref<8x640xf32, #tpu.memory_space<vmem>>, vector<8x640xf32>
      tpu.vector_store %arg6[%c0_15, %c0_16], %17 {strides = array<i32>} : memref<8x640xf32, #tpu.memory_space<vmem>>, vector<8x640xf32>,
    } else {
    }
    return
  }
  func.func @transform_0(%arg0: i32, %arg1: i32, %arg2: i32) -> (i32, i32) {
    %c0_i32 = arith.constant 0 : i32
    return %arg0, %arg2 : i32, i32
  }
  func.func @transform_1(%arg0: i32, %arg1: i32, %arg2: i32) -> (i32, i32) {
    %c0_i32 = arith.constant 0 : i32
    return %arg2, %arg1 : i32, i32
  }
  func.func @transform_2(%arg0: i32, %arg1: i32, %arg2: i32) -> (i32, i32) {
    %c0_i32 = arith.constant 0 : i32
    %c0_i32_0 = arith.constant 0 : i32
    return %c0_i32, %arg1 : i32, i32
  }
  func.func @transform_3(%arg0: i32, %arg1: i32, %arg2: i32) -> (i32, i32) {
    %c0_i32 = arith.constant 0 : i32
    return %arg0, %arg1 : i32, i32
  }
}

module attributes {stable_mosaic.version = 11 : i64} {
  func.func @_matmul_bias_act_kernel(%arg0: i32, %arg1: i32, %arg2: i32, %arg3: memref<8x128xbf16, #tpu.memory_space<vmem>>, %arg4: memref<128x512xbf16, #tpu.memory_space<vmem>>, %arg5: memref<1x512xf32, #tpu.memory_space<vmem>>, %arg6: memref<8x512xf32, #tpu.memory_space<vmem>>) attributes {dimension_semantics = [#tpu.dimension_semantics<parallel>, #tpu.dimension_semantics<parallel>, #tpu.dimension_semantics<arbitrary>], iteration_bounds = array<i64: 1, 2, 1>, scalar_prefetch = 0 : i64, scratch_operands = 0 : i64, tpu.core_type = #tpu.core_type<tc>, window_params = [{transform_indices = @transform_0, window_bounds = array<i64: 8, 128>}, {transform_indices = @transform_1, window_bounds = array<i64: 128, 512>}, {transform_indices = @transform_2, window_bounds = array<i64: 1, 512>}, {transform_indices = @transform_3, window_bounds = array<i64: 8, 512>}]} {
    %c0_i32 = arith.constant 0 : i32
    %0 = arith.cmpi eq, %arg2, %c0_i32 : i32
    %1 = arith.extui %0 : i1 to i32
    %c0_i32_0 = arith.constant 0 : i32
    %2 = arith.cmpi ne, %1, %c0_i32_0 : i32
    scf.if %2 {
      %cst_10 = arith.constant 0.000000e+00 : f32
      %12 = vector.broadcast %cst_10 : f32 to vector<8x512xf32>
      %c0_11 = arith.constant 0 : index
      %c0_12 = arith.constant 0 : index
      %13 = vector.load %arg6[%c0_11, %c0_12] : memref<8x512xf32, #tpu.memory_space<vmem>>, vector<8x512xf32>
      tpu.vector_store %arg6[%c0_11, %c0_12], %12 {strides = array<i32>} : memref<8x512xf32, #tpu.memory_space<vmem>>, vector<8x512xf32>,
    } else {
    }
    %c0 = arith.constant 0 : index
    %c0_1 = arith.constant 0 : index
    %3 = vector.load %arg6[%c0, %c0_1] : memref<8x512xf32, #tpu.memory_space<vmem>>, vector<8x512xf32>
    %c0_2 = arith.constant 0 : index
    %c0_3 = arith.constant 0 : index
    %4 = vector.load %arg3[%c0_2, %c0_3] : memref<8x128xbf16, #tpu.memory_space<vmem>>, vector<8x128xbf16>
    %c0_4 = arith.constant 0 : index
    %c0_5 = arith.constant 0 : index
    %5 = vector.load %arg4[%c0_4, %c0_5] : memref<128x512xbf16, #tpu.memory_space<vmem>>, vector<128x512xbf16>
    %cst = arith.constant dense<0.000000e+00> : vector<8x512xf32>
    %6 = tpu.matmul %4, %5, %cst {dimension_numbers = #tpu.dot_dimension_numbers<[1], [0], [0], [1], [0, 0, 1, 1], [], []>} : vector<8x128xbf16>, vector<128x512xbf16>, vector<8x512xf32> -> vector<8x512xf32>
    %7 = arith.addf %3, %6 : vector<8x512xf32>
    %c0_6 = arith.constant 0 : index
    %c0_7 = arith.constant 0 : index
    %8 = vector.load %arg6[%c0_6, %c0_7] : memref<8x512xf32, #tpu.memory_space<vmem>>, vector<8x512xf32>
    tpu.vector_store %arg6[%c0_6, %c0_7], %7 {strides = array<i32>} : memref<8x512xf32, #tpu.memory_space<vmem>>, vector<8x512xf32>,
    %c0_i32_8 = arith.constant 0 : i32
    %9 = arith.cmpi eq, %arg2, %c0_i32_8 : i32
    %10 = arith.extui %9 : i1 to i32
    %c0_i32_9 = arith.constant 0 : i32
    %11 = arith.cmpi ne, %10, %c0_i32_9 : i32
    scf.if %11 {
      %c0_10 = arith.constant 0 : index
      %c0_11 = arith.constant 0 : index
      %12 = vector.load %arg6[%c0_10, %c0_11] : memref<8x512xf32, #tpu.memory_space<vmem>>, vector<8x512xf32>
      %c0_12 = arith.constant 0 : index
      %c0_13 = arith.constant 0 : index
      %13 = vector.load %arg5[%c0_12, %c0_13] : memref<1x512xf32, #tpu.memory_space<vmem>>, vector<1x512xf32>
      %14 = vector.broadcast %13 : vector<1x512xf32> to vector<8x512xf32>
      %15 = arith.addf %12, %14 : vector<8x512xf32>
      %cst_14 = arith.constant 0.000000e+00 : f32
      %16 = vector.broadcast %cst_14 : f32 to vector<8x512xf32>
      %17 = arith.maximumf %15, %16 : vector<8x512xf32>
      %c0_15 = arith.constant 0 : index
      %c0_16 = arith.constant 0 : index
      %18 = vector.load %arg6[%c0_15, %c0_16] : memref<8x512xf32, #tpu.memory_space<vmem>>, vector<8x512xf32>
      tpu.vector_store %arg6[%c0_15, %c0_16], %17 {strides = array<i32>} : memref<8x512xf32, #tpu.memory_space<vmem>>, vector<8x512xf32>,
    } else {
    }
    return
  }
  func.func @transform_0(%arg0: i32, %arg1: i32, %arg2: i32) -> (i32, i32) {
    %c0_i32 = arith.constant 0 : i32
    return %arg0, %arg2 : i32, i32
  }
  func.func @transform_1(%arg0: i32, %arg1: i32, %arg2: i32) -> (i32, i32) {
    %c0_i32 = arith.constant 0 : i32
    return %arg2, %arg1 : i32, i32
  }
  func.func @transform_2(%arg0: i32, %arg1: i32, %arg2: i32) -> (i32, i32) {
    %c0_i32 = arith.constant 0 : i32
    %c0_i32_0 = arith.constant 0 : i32
    return %c0_i32, %arg1 : i32, i32
  }
  func.func @transform_3(%arg0: i32, %arg1: i32, %arg2: i32) -> (i32, i32) {
    %c0_i32 = arith.constant 0 : i32
    return %arg0, %arg1 : i32, i32
  }
}

module attributes {stable_mosaic.version = 11 : i64} {
  func.func @_matmul_bias_act_kernel(%arg0: i32, %arg1: i32, %arg2: i32, %arg3: memref<56x128xbf16, #tpu.memory_space<vmem>>, %arg4: memref<128x896xbf16, #tpu.memory_space<vmem>>, %arg5: memref<1x896xf32, #tpu.memory_space<vmem>>, %arg6: memref<56x896xf32, #tpu.memory_space<vmem>>) attributes {dimension_semantics = [#tpu.dimension_semantics<parallel>, #tpu.dimension_semantics<parallel>, #tpu.dimension_semantics<arbitrary>], iteration_bounds = array<i64: 1, 2, 1>, scalar_prefetch = 0 : i64, scratch_operands = 0 : i64, tpu.core_type = #tpu.core_type<tc>, window_params = [{transform_indices = @transform_0, window_bounds = array<i64: 56, 128>}, {transform_indices = @transform_1, window_bounds = array<i64: 128, 896>}, {transform_indices = @transform_2, window_bounds = array<i64: 1, 896>}, {transform_indices = @transform_3, window_bounds = array<i64: 56, 896>}]} {
    %c0_i32 = arith.constant 0 : i32
    %0 = arith.cmpi eq, %arg2, %c0_i32 : i32
    %1 = arith.extui %0 : i1 to i32
    %c0_i32_0 = arith.constant 0 : i32
    %2 = arith.cmpi ne, %1, %c0_i32_0 : i32
    scf.if %2 {
      %cst_10 = arith.constant 0.000000e+00 : f32
      %12 = vector.broadcast %cst_10 : f32 to vector<56x896xf32>
      %c0_11 = arith.constant 0 : index
      %c0_12 = arith.constant 0 : index
      %13 = vector.load %arg6[%c0_11, %c0_12] : memref<56x896xf32, #tpu.memory_space<vmem>>, vector<56x896xf32>
      tpu.vector_store %arg6[%c0_11, %c0_12], %12 {strides = array<i32>} : memref<56x896xf32, #tpu.memory_space<vmem>>, vector<56x896xf32>,
    } else {
    }
    %c0 = arith.constant 0 : index
    %c0_1 = arith.constant 0 : index
    %3 = vector.load %arg6[%c0, %c0_1] : memref<56x896xf32, #tpu.memory_space<vmem>>, vector<56x896xf32>
    %c0_2 = arith.constant 0 : index
    %c0_3 = arith.constant 0 : index
    %4 = vector.load %arg3[%c0_2, %c0_3] : memref<56x128xbf16, #tpu.memory_space<vmem>>, vector<56x128xbf16>
    %c0_4 = arith.constant 0 : index
    %c0_5 = arith.constant 0 : index
    %5 = vector.load %arg4[%c0_4, %c0_5] : memref<128x896xbf16, #tpu.memory_space<vmem>>, vector<128x896xbf16>
    %cst = arith.constant dense<0.000000e+00> : vector<56x896xf32>
    %6 = tpu.matmul %4, %5, %cst {dimension_numbers = #tpu.dot_dimension_numbers<[1], [0], [0], [1], [0, 0, 1, 1], [], []>} : vector<56x128xbf16>, vector<128x896xbf16>, vector<56x896xf32> -> vector<56x896xf32>
    %7 = arith.addf %3, %6 : vector<56x896xf32>
    %c0_6 = arith.constant 0 : index
    %c0_7 = arith.constant 0 : index
    %8 = vector.load %arg6[%c0_6, %c0_7] : memref<56x896xf32, #tpu.memory_space<vmem>>, vector<56x896xf32>
    tpu.vector_store %arg6[%c0_6, %c0_7], %7 {strides = array<i32>} : memref<56x896xf32, #tpu.memory_space<vmem>>, vector<56x896xf32>,
    %c0_i32_8 = arith.constant 0 : i32
    %9 = arith.cmpi eq, %arg2, %c0_i32_8 : i32
    %10 = arith.extui %9 : i1 to i32
    %c0_i32_9 = arith.constant 0 : i32
    %11 = arith.cmpi ne, %10, %c0_i32_9 : i32
    scf.if %11 {
      %c0_10 = arith.constant 0 : index
      %c0_11 = arith.constant 0 : index
      %12 = vector.load %arg6[%c0_10, %c0_11] : memref<56x896xf32, #tpu.memory_space<vmem>>, vector<56x896xf32>
      %c0_12 = arith.constant 0 : index
      %c0_13 = arith.constant 0 : index
      %13 = vector.load %arg5[%c0_12, %c0_13] : memref<1x896xf32, #tpu.memory_space<vmem>>, vector<1x896xf32>
      %14 = vector.broadcast %13 : vector<1x896xf32> to vector<56x896xf32>
      %15 = arith.addf %12, %14 : vector<56x896xf32>
      %c0_14 = arith.constant 0 : index
      %c0_15 = arith.constant 0 : index
      %16 = vector.load %arg6[%c0_14, %c0_15] : memref<56x896xf32, #tpu.memory_space<vmem>>, vector<56x896xf32>
      tpu.vector_store %arg6[%c0_14, %c0_15], %15 {strides = array<i32>} : memref<56x896xf32, #tpu.memory_space<vmem>>, vector<56x896xf32>,
    } else {
    }
    return
  }
  func.func @transform_0(%arg0: i32, %arg1: i32, %arg2: i32) -> (i32, i32) {
    %c0_i32 = arith.constant 0 : i32
    return %arg0, %arg2 : i32, i32
  }
  func.func @transform_1(%arg0: i32, %arg1: i32, %arg2: i32) -> (i32, i32) {
    %c0_i32 = arith.constant 0 : i32
    return %arg2, %arg1 : i32, i32
  }
  func.func @transform_2(%arg0: i32, %arg1: i32, %arg2: i32) -> (i32, i32) {
    %c0_i32 = arith.constant 0 : i32
    %c0_i32_0 = arith.constant 0 : i32
    return %c0_i32, %arg1 : i32, i32
  }
  func.func @transform_3(%arg0: i32, %arg1: i32, %arg2: i32) -> (i32, i32) {
    %c0_i32 = arith.constant 0 : i32
    return %arg0, %arg1 : i32, i32
  }
}

module attributes {stable_mosaic.version = 11 : i64} {
  func.func @_matmul_bias_act_kernel(%arg0: i32, %arg1: i32, %arg2: i32, %arg3: memref<344x128xbf16, #tpu.memory_space<vmem>>, %arg4: memref<128x384xbf16, #tpu.memory_space<vmem>>, %arg5: memref<1x384xf32, #tpu.memory_space<vmem>>, %arg6: memref<344x384xf32, #tpu.memory_space<vmem>>) attributes {dimension_semantics = [#tpu.dimension_semantics<parallel>, #tpu.dimension_semantics<parallel>, #tpu.dimension_semantics<arbitrary>], iteration_bounds = array<i64: 1, 3, 1>, scalar_prefetch = 0 : i64, scratch_operands = 0 : i64, tpu.core_type = #tpu.core_type<tc>, window_params = [{transform_indices = @transform_0, window_bounds = array<i64: 344, 128>}, {transform_indices = @transform_1, window_bounds = array<i64: 128, 384>}, {transform_indices = @transform_2, window_bounds = array<i64: 1, 384>}, {transform_indices = @transform_3, window_bounds = array<i64: 344, 384>}]} {
    %c0_i32 = arith.constant 0 : i32
    %0 = arith.cmpi eq, %arg2, %c0_i32 : i32
    %1 = arith.extui %0 : i1 to i32
    %c0_i32_0 = arith.constant 0 : i32
    %2 = arith.cmpi ne, %1, %c0_i32_0 : i32
    scf.if %2 {
      %cst_10 = arith.constant 0.000000e+00 : f32
      %12 = vector.broadcast %cst_10 : f32 to vector<344x384xf32>
      %c0_11 = arith.constant 0 : index
      %c0_12 = arith.constant 0 : index
      %13 = vector.load %arg6[%c0_11, %c0_12] : memref<344x384xf32, #tpu.memory_space<vmem>>, vector<344x384xf32>
      tpu.vector_store %arg6[%c0_11, %c0_12], %12 {strides = array<i32>} : memref<344x384xf32, #tpu.memory_space<vmem>>, vector<344x384xf32>,
    } else {
    }
    %c0 = arith.constant 0 : index
    %c0_1 = arith.constant 0 : index
    %3 = vector.load %arg6[%c0, %c0_1] : memref<344x384xf32, #tpu.memory_space<vmem>>, vector<344x384xf32>
    %c0_2 = arith.constant 0 : index
    %c0_3 = arith.constant 0 : index
    %4 = vector.load %arg3[%c0_2, %c0_3] : memref<344x128xbf16, #tpu.memory_space<vmem>>, vector<344x128xbf16>
    %c0_4 = arith.constant 0 : index
    %c0_5 = arith.constant 0 : index
    %5 = vector.load %arg4[%c0_4, %c0_5] : memref<128x384xbf16, #tpu.memory_space<vmem>>, vector<128x384xbf16>
    %cst = arith.constant dense<0.000000e+00> : vector<344x384xf32>
    %6 = tpu.matmul %4, %5, %cst {dimension_numbers = #tpu.dot_dimension_numbers<[1], [0], [0], [1], [0, 0, 1, 1], [], []>} : vector<344x128xbf16>, vector<128x384xbf16>, vector<344x384xf32> -> vector<344x384xf32>
    %7 = arith.addf %3, %6 : vector<344x384xf32>
    %c0_6 = arith.constant 0 : index
    %c0_7 = arith.constant 0 : index
    %8 = vector.load %arg6[%c0_6, %c0_7] : memref<344x384xf32, #tpu.memory_space<vmem>>, vector<344x384xf32>
    tpu.vector_store %arg6[%c0_6, %c0_7], %7 {strides = array<i32>} : memref<344x384xf32, #tpu.memory_space<vmem>>, vector<344x384xf32>,
    %c0_i32_8 = arith.constant 0 : i32
    %9 = arith.cmpi eq, %arg2, %c0_i32_8 : i32
    %10 = arith.extui %9 : i1 to i32
    %c0_i32_9 = arith.constant 0 : i32
    %11 = arith.cmpi ne, %10, %c0_i32_9 : i32
    scf.if %11 {
      %c0_10 = arith.constant 0 : index
      %c0_11 = arith.constant 0 : index
      %12 = vector.load %arg6[%c0_10, %c0_11] : memref<344x384xf32, #tpu.memory_space<vmem>>, vector<344x384xf32>
      %c0_12 = arith.constant 0 : index
      %c0_13 = arith.constant 0 : index
      %13 = vector.load %arg5[%c0_12, %c0_13] : memref<1x384xf32, #tpu.memory_space<vmem>>, vector<1x384xf32>
      %14 = vector.broadcast %13 : vector<1x384xf32> to vector<344x384xf32>
      %15 = arith.addf %12, %14 : vector<344x384xf32>
      %c0_14 = arith.constant 0 : index
      %c0_15 = arith.constant 0 : index
      %16 = vector.load %arg6[%c0_14, %c0_15] : memref<344x384xf32, #tpu.memory_space<vmem>>, vector<344x384xf32>
      tpu.vector_store %arg6[%c0_14, %c0_15], %15 {strides = array<i32>} : memref<344x384xf32, #tpu.memory_space<vmem>>, vector<344x384xf32>,
    } else {
    }
    return
  }
  func.func @transform_0(%arg0: i32, %arg1: i32, %arg2: i32) -> (i32, i32) {
    %c0_i32 = arith.constant 0 : i32
    return %arg0, %arg2 : i32, i32
  }
  func.func @transform_1(%arg0: i32, %arg1: i32, %arg2: i32) -> (i32, i32) {
    %c0_i32 = arith.constant 0 : i32
    return %arg2, %arg1 : i32, i32
  }
  func.func @transform_2(%arg0: i32, %arg1: i32, %arg2: i32) -> (i32, i32) {
    %c0_i32 = arith.constant 0 : i32
    %c0_i32_0 = arith.constant 0 : i32
    return %c0_i32, %arg1 : i32, i32
  }
  func.func @transform_3(%arg0: i32, %arg1: i32, %arg2: i32) -> (i32, i32) {
    %c0_i32 = arith.constant 0 : i32
    return %arg0, %arg1 : i32, i32
  }
}

module attributes {stable_mosaic.version = 11 : i64} {
  func.func @_matmul_bias_act_kernel(%arg0: i32, %arg1: i32, %arg2: i32, %arg3: memref<904x128xbf16, #tpu.memory_space<vmem>>, %arg4: memref<128x128xbf16, #tpu.memory_space<vmem>>, %arg5: memref<1x128xf32, #tpu.memory_space<vmem>>, %arg6: memref<904x128xf32, #tpu.memory_space<vmem>>) attributes {dimension_semantics = [#tpu.dimension_semantics<parallel>, #tpu.dimension_semantics<parallel>, #tpu.dimension_semantics<arbitrary>], iteration_bounds = array<i64: 2, 1, 1>, scalar_prefetch = 0 : i64, scratch_operands = 0 : i64, tpu.core_type = #tpu.core_type<tc>, window_params = [{transform_indices = @transform_0, window_bounds = array<i64: 904, 128>}, {transform_indices = @transform_1, window_bounds = array<i64: 128, 128>}, {transform_indices = @transform_2, window_bounds = array<i64: 1, 128>}, {transform_indices = @transform_3, window_bounds = array<i64: 904, 128>}]} {
    %c0_i32 = arith.constant 0 : i32
    %0 = arith.cmpi eq, %arg2, %c0_i32 : i32
    %1 = arith.extui %0 : i1 to i32
    %c0_i32_0 = arith.constant 0 : i32
    %2 = arith.cmpi ne, %1, %c0_i32_0 : i32
    scf.if %2 {
      %cst_10 = arith.constant 0.000000e+00 : f32
      %12 = vector.broadcast %cst_10 : f32 to vector<904x128xf32>
      %c0_11 = arith.constant 0 : index
      %c0_12 = arith.constant 0 : index
      %13 = vector.load %arg6[%c0_11, %c0_12] : memref<904x128xf32, #tpu.memory_space<vmem>>, vector<904x128xf32>
      tpu.vector_store %arg6[%c0_11, %c0_12], %12 {strides = array<i32>} : memref<904x128xf32, #tpu.memory_space<vmem>>, vector<904x128xf32>,
    } else {
    }
    %c0 = arith.constant 0 : index
    %c0_1 = arith.constant 0 : index
    %3 = vector.load %arg6[%c0, %c0_1] : memref<904x128xf32, #tpu.memory_space<vmem>>, vector<904x128xf32>
    %c0_2 = arith.constant 0 : index
    %c0_3 = arith.constant 0 : index
    %4 = vector.load %arg3[%c0_2, %c0_3] : memref<904x128xbf16, #tpu.memory_space<vmem>>, vector<904x128xbf16>
    %c0_4 = arith.constant 0 : index
    %c0_5 = arith.constant 0 : index
    %5 = vector.load %arg4[%c0_4, %c0_5] : memref<128x128xbf16, #tpu.memory_space<vmem>>, vector<128x128xbf16>
    %cst = arith.constant dense<0.000000e+00> : vector<904x128xf32>
    %6 = tpu.matmul %4, %5, %cst {dimension_numbers = #tpu.dot_dimension_numbers<[1], [0], [0], [1], [0, 0, 1, 1], [], []>} : vector<904x128xbf16>, vector<128x128xbf16>, vector<904x128xf32> -> vector<904x128xf32>
    %7 = arith.addf %3, %6 : vector<904x128xf32>
    %c0_6 = arith.constant 0 : index
    %c0_7 = arith.constant 0 : index
    %8 = vector.load %arg6[%c0_6, %c0_7] : memref<904x128xf32, #tpu.memory_space<vmem>>, vector<904x128xf32>
    tpu.vector_store %arg6[%c0_6, %c0_7], %7 {strides = array<i32>} : memref<904x128xf32, #tpu.memory_space<vmem>>, vector<904x128xf32>,
    %c0_i32_8 = arith.constant 0 : i32
    %9 = arith.cmpi eq, %arg2, %c0_i32_8 : i32
    %10 = arith.extui %9 : i1 to i32
    %c0_i32_9 = arith.constant 0 : i32
    %11 = arith.cmpi ne, %10, %c0_i32_9 : i32
    scf.if %11 {
      %c0_10 = arith.constant 0 : index
      %c0_11 = arith.constant 0 : index
      %12 = vector.load %arg6[%c0_10, %c0_11] : memref<904x128xf32, #tpu.memory_space<vmem>>, vector<904x128xf32>
      %c0_12 = arith.constant 0 : index
      %c0_13 = arith.constant 0 : index
      %13 = vector.load %arg5[%c0_12, %c0_13] : memref<1x128xf32, #tpu.memory_space<vmem>>, vector<1x128xf32>
      %14 = vector.broadcast %13 : vector<1x128xf32> to vector<904x128xf32>
      %15 = arith.addf %12, %14 : vector<904x128xf32>
      %c0_14 = arith.constant 0 : index
      %c0_15 = arith.constant 0 : index
      %16 = vector.load %arg6[%c0_14, %c0_15] : memref<904x128xf32, #tpu.memory_space<vmem>>, vector<904x128xf32>
      tpu.vector_store %arg6[%c0_14, %c0_15], %15 {strides = array<i32>} : memref<904x128xf32, #tpu.memory_space<vmem>>, vector<904x128xf32>,
    } else {
    }
    return
  }
  func.func @transform_0(%arg0: i32, %arg1: i32, %arg2: i32) -> (i32, i32) {
    %c0_i32 = arith.constant 0 : i32
    return %arg0, %arg2 : i32, i32
  }
  func.func @transform_1(%arg0: i32, %arg1: i32, %arg2: i32) -> (i32, i32) {
    %c0_i32 = arith.constant 0 : i32
    return %arg2, %arg1 : i32, i32
  }
  func.func @transform_2(%arg0: i32, %arg1: i32, %arg2: i32) -> (i32, i32) {
    %c0_i32 = arith.constant 0 : i32
    %c0_i32_0 = arith.constant 0 : i32
    return %c0_i32, %arg1 : i32, i32
  }
  func.func @transform_3(%arg0: i32, %arg1: i32, %arg2: i32) -> (i32, i32) {
    %c0_i32 = arith.constant 0 : i32
    return %arg0, %arg1 : i32, i32
  }
}

</mosaic_0001>

<bundles_post_ra>
// kernel: decoder_forward.5
= control target key start
LH: loop header
LB: loop body
LE: loop exit
PB: predicated region body
PF: predicated region fallthrough
CT: control target
= control target key end

     0   :  { %8 = vsyncpa [#allocation3], 0  ;;  %s1304_s0 = inlined_call_operand.vmem [shape: bf16[8,128], index: 0, kind: input, shape index: {}]   ;;  %s1305_s1 = inlined_call_operand.hbm [shape: bf16[128,1024], index: 1, kind: input, shape index: {}]   ;;  %s1306_s2 = inlined_call_operand.hbm [shape: f32[1,1024], index: 2, kind: input, shape index: {}]   ;;  %s1307_s3 = inlined_call_operand.vmem [shape: f32[8,1024], index: 3, kind: output, shape index: {}]  }
   0x1   :  { %10 = vsyncpa [#allocation3 + $0x1], 0 }
   0x2   :  { %11 = vsyncpa [#allocation5], 0 }
   0x3   :  { %13 = vsyncpa [#allocation5 + $0x1], 0  ;;  %s1079_s12 = smov 0   ;;  %s1081_s13 = smov 0  }
   0x4   :  { %s1083_s14 = smov 0   ;;  %s1085_s15 = smov 0  }
   0x5   :  { %s1087_s16 = smov 0   ;;  %s1089_s17 = smov 0  }
   0x6 LB: > { %s771_s18 = sadd.s32 4294967295, %s1050_s17   ;;  %s34_s19 = sadd.s32 1, %s1046_s16  ;;  %s1050_s17 = sphi %s1089_s17, %s19_s17   ;;  %s1046_s16 = sphi %s1087_s16, %s1320_s16   ;;  %s1042_s15 = sphi %s1085_s15, %s1319_s15   ;;  %s1038_s14 = sphi %s1083_s14, %s1318_s14   ;;  %s1034_s13 = sphi %s1081_s13, %s1317_s13   ;;  %s1030_s12 = sphi %s1079_s12, %s1316_s12  }
   0x7   : > { %p36_p0 = scmp.ge.s32.totalorder %s34_s19, 2  ;;  %s75_s20 = sadd.s32 1, %s1038_s14 }
   0x8   : > { %p82_p1 = scmp.ne.s32.totalorder %s1038_s14, %s1034_s13  ;;  %p83_p2 = scmp.eq.s32.totalorder %s1050_s17, 0 }
   0x9   : > { %s1322_s19 = smov (%p36_p0, %s34_s19), 0  ;;  %p88_p4 = scmp.ne.s32.totalorder %s1034_s13, %s1030_s12 }
   0xa   : > { %p1115_p3 = por %p83_p2, %p82_p1  ;;  %s71_s22 = ssub.s32 %s1046_s16, %s1322_s19 }
   0xb   : > { %p89_p5 = scmp.eq.s32.totalorder %s771_s18, 0  ;;  %p73_p6 = scmp.eq.s32.totalorder %s71_s22, 0 }
   0xc   : > { %p834_p8 = scmp.lt.s32.totalorder %s1050_s17, 2  ;;  %s1131_s25 = sand.u32 1, %s1038_s14  }
   0xd   : > { %p1122_p7 = por %p89_p5, %p88_p4  ;;  %s821_s26 = sshll.u32 %s1046_s16, 8 }
   0xe   : > { %s1128_s24 = scalar_select %p73_p6, %s1038_s14, %s75_s20  }
   0xf   : > { %s1310_s23 = scalar_select %p1122_p7, 1, 0 }
  0x10   : > { %s776_s27 = sshll.u32 %s1131_s25, 8  ;;  %s1138_s30 = scalar_lea.hbm %s1305_s1, %s821_s26 }
  0x11   : > { %s180_s4 = scalar_lea.vmem [#allocation2], %s776_s27  ;;  %p1142_p9 = pnand %p834_p8, %p1115_p3 }
  0x12   : > { %s190_s5 = sshll.u32 %s180_s4, 4  ;;  %s177_s7 = scalar_lea.sflag [#allocation3], %s1131_s25  ;;  %s1146_s5 = int_to_ptr.vmem [resolvable:$true] %s190_s5 }
  0x13   : > { %s936_s8 = scalar_lea.hbm %s1138_s30, 4096  ;;  %p938_p12 = pneg %p1142_p9 }
  0x14   : > { %p937_p11 = scmp.ne.s32.totalorder %s1138_s30, %s936_s8  ;;  %s941_s11 = scalar_lea.hbm %s1305_s1, 8192 }
  0x15   : > { %p942_p1 = scmp.lt.u32.totalorder %s1138_s30, %s1305_s1  ;;  %p943_p2 = scmp.lt.u32.totalorder %s941_s11, %s936_s8 }
  0x16   : > { %p939_p13 = pnand %p938_p12, %p937_p11  ;;  %p945_p4 = scmp.lt.u32.totalorder %s936_s8, %s1138_s30 }
  0x17   : > { %p944_p3 = por %p943_p2, %p942_p1 }
  0x18   : > { %p940_p0 = pneg %p939_p13 }
  0x19   : > { %p946_p5 = por %p945_p4, %p944_p3 }
  0x1b   : > { %p947_p6 = pnand %p946_p5, %p940_p0 }
  0x1d   : > { %950 = shalt.err (!%p947_p6)
}
  0x1e   : > { %s951_s20 = scalar_lea.vmem %s1146_s5, 4096  ;;  %s1052_s21 = smov [#allocation2]  }
  0x1f   : > { %p952_p8 = scmp.ne.s32.totalorder %s1146_s5, %s951_s20  ;;  %s956_s22 = sshll.u32 %s1052_s21, 4  ;;  %s957_s22 = int_to_ptr.vmem [resolvable:$false] %s956_s22 }
  0x20   : > { %s958_s26 = scalar_lea.vmem %s957_s22, 8192  ;;  %p959_p10 = scmp.lt.s32.totalorder %s1146_s5, %s957_s22 }
  0x21   : > { %p954_p11 = pnand %p952_p8, %p938_p12  ;;  %p960_p1 = scmp.lt.s32.totalorder %s958_s26, %s951_s20 }
  0x23   : > { %p955_p13 = pneg %p954_p11  ;;  %p961_p2 = por %p960_p1, %p959_p10 }
  0x25   : > { %p962_p3 = pnand %p961_p2, %p955_p13 }
  0x27   : > { %965 = shalt.err (!%p962_p3)
}
  0x28   : > { %s1053_s27 = smov 512   ;;  %s1054_s28 = smov 256  }
  0x29   : > { %s1055_s29 = smov 16   ;;  %p217_p0 = scmp.lt.s32.totalorder %s1050_s17, 3 }
  0x2a   : > { %830 = dma.hbm_to_vmem [thread:$0]  (!%p1142_p9), %s1138_s30, 4096, %s1146_s5, %s177_s7, %s1053_s27, %s1054_s28, %s1055_s29  }
  0x2b   : > { %s779_s4 = sshll.u32 %s1131_s25, 2  ;;  %s822_s8 = sshll.u32 %s1046_s16, 6 }
  0x2c   : > { %p1312_p10 = scmp.ge.s32.totalorder %s1050_s17, 1  ;;  %s1189_s12 = scalar_lea.hbm %s1306_s2, %s822_s8 }
  0x2d   : > { %s204_s18 = scalar_lea.vmem [#allocation4], %s779_s4  ;;  %s201_s30 = scalar_lea.sflag [#allocation5], %s1131_s25 }
  0x2e   : > { %p1182_p4 = pnand %p1312_p10, %p217_p0  ;;  %s212_s20 = sshll.u32 %s204_s18, 4  ;;  %s213_s20 = int_to_ptr.vmem [resolvable:$true] %s212_s20 }
  0x2f   : > { %s966_s5 = scalar_lea.hbm %s1189_s12, 64  ;;  %s971_s22 = scalar_lea.hbm %s1306_s2, 128 }
  0x30   : > { %s1313_s9 = scalar_select %p1182_p4, 1, 0 }
  0x31   : > { %p967_p5 = scmp.ne.s32.totalorder %s1189_s12, %s966_s5  ;;  %p972_p11 = scmp.lt.u32.totalorder %s1189_s12, %s1306_s2 }
  0x32   : > { %p973_p13 = scmp.lt.u32.totalorder %s971_s22, %s966_s5  ;;  %p975_p2 = scmp.lt.u32.totalorder %s966_s5, %s1189_s12 }
  0x33   : > { %p969_p6 = pnand %p967_p5, %p938_p12 }
  0x34   : > { %p974_p1 = por %p973_p13, %p972_p11 }
  0x35   : > { %p970_p8 = pneg %p969_p6 }
  0x36   : > { %p976_p3 = por %p975_p2, %p974_p1 }
  0x38   : > { %p977_p0 = pnand %p976_p3, %p970_p8 }
  0x3a   : > { %980 = shalt.err (!%p977_p0)
}
  0x3b   : > { %s981_s25 = scalar_lea.vmem %s213_s20, 64  ;;  %s1056_s28 = smov [#allocation4]  }
  0x3c   : > { %p982_p10 = scmp.ne.s32.totalorder %s213_s20, %s981_s25  ;;  %s986_s29 = sshll.u32 %s1056_s28, 4  ;;  %s987_s29 = int_to_ptr.vmem [resolvable:$false] %s986_s29 }
  0x3d   : > { %s988_s4 = scalar_lea.vmem %s987_s29, 128  ;;  %p989_p7 = scmp.lt.s32.totalorder %s213_s20, %s987_s29 }
  0x3e   : > { %p984_p5 = pnand %p982_p10, %p938_p12  ;;  %p990_p4 = scmp.lt.s32.totalorder %s988_s4, %s981_s25 }
  0x40   : > { %p985_p6 = pneg %p984_p5  ;;  %p991_p11 = por %p990_p4, %p989_p7 }
  0x42   : > { %p992_p13 = pnand %p991_p11, %p985_p6 }
  0x44   : > { %995 = shalt.err (!%p992_p13)
}
  0x45   : > { %833 = dma.hbm_to_vmem [thread:$0]  (!%p1142_p9), %s1189_s12, 64, %s213_s20, %s201_s30  }
  0x46   : > { %p1314_p8 = scmp.ne.s32.totalorder %s1313_s9, 0 }
  0x47   : > { %s223_s8 = sand.u32 (!%p1314_p8), 1, %s1034_s13   ;;  %p1315_p12 = scmp.ne.s32.totalorder (!%p1314_p8), %s1310_s23, 0 }
  0x48   : > { %221 = sbr.rel (%p1314_p8) target bundleno = 345 (0x159), region = 32  ;;  %s783_s10 = sshll.u32 (!%p1314_p8), %s223_s8, 8 }
  0x49   : > { %s224_s11 = scalar_lea.sflag (!%p1314_p8), [#allocation3], %s223_s8  ;;  %s1214_s18 = scalar_lea.vmem (!%p1314_p8), [#allocation2], %s783_s10 }
  0x4f   : > { %1021 = dma.done.wait (%p1315_p12), %s224_s11, 4096  }
  0x50   : > { %1023 = vsyncadd (%p1315_p12), %s224_s11, 4294963200  ;;  %s784_s5 = sshll.u32 %s223_s8, 2  ;;  %s233_s6 = scalar_lea.sflag [#allocation5], %s223_s8 }
  0x51   : > { %s1220_s7 = scalar_lea.vmem [#allocation4], %s784_s5 }
  0x52   : > { %1025 = dma.done.wait (%p1315_p12), %s233_s6, 64  }
  0x53   : > { %1027 = vsyncadd (%p1315_p12), %s233_s6, 4294967232  ;;  %s785_s9 = sshll.u32 %s1042_s15, 2  ;;  %v1057_v0 = vmov 0   ;;  %v888_v1 = vld [vmem:[%s1214_s18 + $0x4] ss:$16 sps:$4 sm:$0xff]   ;;  %v1058_v2 = vmov 0.0   ;;  %v600_v38 = vlaneseq }
  0x54   : > { %533 = vmatprep.mubr.bf16.mxu0 %v1057_v0  ;;  %574 = vmatprep.mubr.bf16.mxu1 %v1057_v0  ;;  %p288_p7 = scmp.lt.s32.totalorder %s785_s9, 7  ;;  %v890_v3 = vld [vmem:[%s1214_s18 + $0xc] ss:$16 sps:$4 sm:$0xff]   ;;  %v892_v4 = vld [vmem:[%s1214_s18] ss:$16 sps:$4 sm:$0xff]  }
  0x55   : > { %501 = vmatprep.subr.bf16.mxu0 %v888_v1  ;;  %v893_v5 = vld [vmem:[%s1214_s18 + $0x8] ss:$16 sps:$4 sm:$0xff]   ;;  %542 = vmatprep.subr.bf16.mxu1 %v890_v3  ;;  %v894_v6 = vld [vmem:[%s1214_s18 + $0x24] ss:$16 sps:$4 sm:$0xff]   ;;  %v896_v7 = vld [vmem:[%s1214_s18 + $0x2c] ss:$16 sps:$4 sm:$0xff]  }
  0x56   : > { %s1324_s9 = smov (!%p288_p7, %s785_s9), 7  ;;  %502 = vmatpush1.bf16.msra.mxu0 %v892_v4  ;;  %543 = vmatpush1.bf16.msra.mxu1 %v893_v5  ;;  %v898_v8 = vld [vmem:[%s1214_s18 + $0x20] ss:$16 sps:$4 sm:$0xff]   ;;  %v899_v9 = vld [vmem:[%s1214_s18 + $0x28] ss:$16 sps:$4 sm:$0xff]   ;;  %v601_v48 = vshrl.u32 %v600_v38, 7 }
  0x57   : > { %s786_s12 = sshll.u32 %s1324_s9, 3  ;;  %503 = vmatprep.subr.bf16.mxu0 %v894_v6  ;;  %544 = vmatprep.subr.bf16.mxu1 %v896_v7  ;;  %v900_v10 = vld [vmem:[%s1214_s18 + $0x44] ss:$16 sps:$4 sm:$0xff]   ;;  %v902_v11 = vld [vmem:[%s1214_s18 + $0x4c] ss:$16 sps:$4 sm:$0xff]  }
  0x58   : > { %s1230_s21 = scalar_lea.vmem %s1307_s3, %s786_s12  ;;  %v904_v12 = vld [vmem:[%s1214_s18 + $0x40] ss:$16 sps:$4 sm:$0xff]   ;;  %v905_v13 = vld [vmem:[%s1214_s18 + $0x48] ss:$16 sps:$4 sm:$0xff]   ;;  %v906_v14 = vld [vmem:[%s1214_s18 + $0x64] ss:$16 sps:$4 sm:$0xff]  }
  0x59   : > { %300 = vst [vmem:[%s1230_s21] sm:$0xff] %v1058_v2  ;;  %301 = vst [vmem:[%s1230_s21 + $0x8] sm:$0xff] %v1058_v2  ;;  %v908_v15 = vld [vmem:[%s1214_s18 + $0x6c] ss:$16 sps:$4 sm:$0xff]   ;;  %v910_v16 = vld [vmem:[%s1214_s18 + $0x60] ss:$16 sps:$4 sm:$0xff]   ;;  %v602_v51 = vsub.s32 0, %v601_v48 }
  0x5a   : > { %302 = vst [vmem:[%s1230_s21 + $0x10] sm:$0xff] %v1058_v2  ;;  %303 = vst [vmem:[%s1230_s21 + $0x18] sm:$0xff] %v1058_v2  ;;  %504 = vmatpush1.bf16.msra.mxu0 %v898_v8  ;;  %545 = vmatpush1.bf16.msra.mxu1 %v899_v9  ;;  %v911_v17 = vld [vmem:[%s1214_s18 + $0x68] ss:$16 sps:$4 sm:$0xff]   ;;  %v912_v18 = vld [vmem:[%s1214_s18 + $0x84] ss:$16 sps:$4 sm:$0xff]  }
  0x5b   : > { %505 = vmatprep.subr.bf16.mxu0 %v900_v10  ;;  %546 = vmatprep.subr.bf16.mxu1 %v902_v11  ;;  %v914_v19 = vld [vmem:[%s1214_s18 + $0x8c] ss:$16 sps:$4 sm:$0xff]   ;;  %v916_v20 = vld [vmem:[%s1214_s18 + $0x80] ss:$16 sps:$4 sm:$0xff]   ;;  %v917_v21 = vld [vmem:[%s1214_s18 + $0x88] ss:$16 sps:$4 sm:$0xff]  }
  0x5c   : > { %v918_v22 = vld [vmem:[%s1214_s18 + $0xa4] ss:$16 sps:$4 sm:$0xff]   ;;  %v920_v23 = vld [vmem:[%s1214_s18 + $0xac] ss:$16 sps:$4 sm:$0xff]   ;;  %v922_v24 = vld [vmem:[%s1214_s18 + $0xa0] ss:$16 sps:$4 sm:$0xff]  }
  0x5d   : > { %v923_v25 = vld [vmem:[%s1214_s18 + $0xa8] ss:$16 sps:$4 sm:$0xff]   ;;  %v924_v26 = vld [vmem:[%s1214_s18 + $0xc4] ss:$16 sps:$4 sm:$0xff]   ;;  %v926_v27 = vld [vmem:[%s1214_s18 + $0xcc] ss:$16 sps:$4 sm:$0xff]  }
  0x5e   : > { %506 = vmatpush1.bf16.msra.mxu0 %v904_v12  ;;  %547 = vmatpush1.bf16.msra.mxu1 %v905_v13  ;;  %v928_v28 = vld [vmem:[%s1214_s18 + $0xc0] ss:$16 sps:$4 sm:$0xff]   ;;  %v929_v29 = vld [vmem:[%s1214_s18 + $0xc8] ss:$16 sps:$4 sm:$0xff]   ;;  %v930_v30 = vld [vmem:[%s1214_s18 + $0xe4] ss:$16 sps:$4 sm:$0xff]  }
  0x5f   : > { %507 = vmatprep.subr.bf16.mxu0 %v906_v14  ;;  %548 = vmatprep.subr.bf16.mxu1 %v908_v15  ;;  %v932_v31 = vld [vmem:[%s1214_s18 + $0xec] ss:$16 sps:$4 sm:$0xff]   ;;  %v934_v32 = vld [vmem:[%s1214_s18 + $0xe0] ss:$16 sps:$4 sm:$0xff]   ;;  %v935_v33 = vld [vmem:[%s1214_s18 + $0xe8] ss:$16 sps:$4 sm:$0xff]  }
  0x60   : > { %v308_v34 = vld [vmem:[%s1304_s0] sm:$0xf]  ;;  %v305_v37 = vld [vmem:[%s1230_s21 + $0x8] sm:$0xff]  ;;  %v606_v52 = vsub.s32 1, %v601_v48  ;;  %v610_v53 = vsub.s32 2, %v601_v48  ;;  %v614_v54 = vsub.s32 3, %v601_v48 }
  0x61   : > { %v304_v35 = vld [vmem:[%s1230_s21] sm:$0xff]  ;;  %v306_v36 = vld [vmem:[%s1230_s21 + $0x10] sm:$0xff] }
  0x62   : > { %508 = vmatpush1.bf16.msra.mxu0 %v910_v16  ;;  %549 = vmatpush1.bf16.msra.mxu1 %v911_v17  ;;  %v598_v55 = vld [vmem:[%s1220_s7] sm:$0xf] }
  0x63   : > { %509 = vmatprep.subr.bf16.mxu0 %v912_v18  ;;  %550 = vmatprep.subr.bf16.mxu1 %v914_v19  ;;  %v603_v56 = vrot.slane %v598_v55, %v602_v51  ;;  %v607_v57 = vrot.slane %v598_v55, %v606_v52  ;;  %v611_v58 = vrot.slane %v598_v55, %v610_v53 }
  0x64   : > { %v615_v59 = vrot.slane %v598_v55, %v614_v54 }
  0x66   : > { %510 = vmatpush1.bf16.msra.mxu0 %v916_v20  ;;  %551 = vmatpush1.bf16.msra.mxu1 %v917_v21 }
  0x67   : > { %511 = vmatprep.subr.bf16.mxu0 %v918_v22  ;;  %552 = vmatprep.subr.bf16.mxu1 %v920_v23 }
  0x6a   : > { %512 = vmatpush1.bf16.msra.mxu0 %v922_v24  ;;  %553 = vmatpush1.bf16.msra.mxu1 %v923_v25 }
  0x6b   : > { %513 = vmatprep.subr.bf16.mxu0 %v924_v26  ;;  %554 = vmatprep.subr.bf16.mxu1 %v926_v27 }
  0x6e   : > { %514 = vmatpush1.bf16.msra.mxu0 %v928_v28  ;;  %555 = vmatpush1.bf16.msra.mxu1 %v929_v29 }
  0x6f   : > { %515 = vmatprep.subr.bf16.mxu0 %v930_v30  ;;  %556 = vmatprep.subr.bf16.mxu1 %v932_v31 }
  0x72   : > { %516 = vmatpush1.bf16.msra.mxu0 %v934_v32  ;;  %557 = vmatpush1.bf16.msra.mxu1 %v935_v33 }
  0x75   : > { %534 = vmatmul.mubr.bf16.vlgmr.msra.gmra.mrb[0].mxu0 %v308_v34  ;;  %575 = vmatmul.mubr.bf16.vlgmr.msra.gmra.mrb[0].mxu1 %v308_v34 }
 0x148   : > { %v535_v39 = vpop.f32.mrb[0].mxu0  ;;  %v576_v40 = vpop.f32.mrb[0].mxu1 }
 0x149   : > { %v583_v41 = vadd.f32 %v535_v39, %v304_v35  ;;  %v585_v42 = vadd.f32 %v576_v40, %v306_v36  ;;  %v537_v43 = vpop.f32.mrb[1].mxu0  ;;  %v578_v44 = vpop.f32.mrb[1].mxu1 }
 0x14a   : > { %v584_v45 = vadd.f32 %v537_v43, %v305_v37  ;;  %v539_v46 = vpop.f32.mrb[2].mxu0  ;;  %v580_v47 = vpop.f32.mrb[2].mxu1  ;;  %590 = vst [vmem:[%s1230_s21 + $0x18] sm:$0xff] %v578_v44  ;;  %v623_v2 = vadd.f32 %v615_v59, %v578_v44 }
 0x14b   : > { %587 = vst [vmem:[%s1230_s21] sm:$0xff] %v583_v41  ;;  %v540_v49 = vpop.f32.mrb[3].mxu0  ;;  %v581_v50 = vpop.f32.mrb[3].mxu1  ;;  %589 = vst [vmem:[%s1230_s21 + $0x10] sm:$0xff] %v585_v42 }
 0x14c   : > { %588 = vst [vmem:[%s1230_s21 + $0x8] sm:$0xff] %v584_v45  ;;  %v627_v6 = vmax.f32 %v623_v2, 0.0 }
 0x14e   : > { %631 = vst [vmem:[%s1230_s21 + $0x18] sm:$0xff] %v627_v6 }
 0x152   : > { %v594_v60 = vld [vmem:[%s1230_s21] sm:$0xff]  ;;  %v596_v62 = vld [vmem:[%s1230_s21 + $0x10] sm:$0xff] }
 0x153   : > { %v595_v61 = vld [vmem:[%s1230_s21 + $0x8] sm:$0xff]  ;;  %v620_v63 = vadd.f32 %v603_v56, %v594_v60  ;;  %v622_v1 = vadd.f32 %v611_v58, %v596_v62 }
 0x154   : > { %v621_v0 = vadd.f32 %v607_v57, %v595_v61 }
 0x155   : > { %v624_v3 = vmax.f32 %v620_v63, 0.0  ;;  %v626_v5 = vmax.f32 %v622_v1, 0.0 }
 0x156   : > { %v625_v4 = vmax.f32 %v621_v0, 0.0 }
 0x157   : > { %628 = vst [vmem:[%s1230_s21] sm:$0xff] %v624_v3  ;;  %630 = vst [vmem:[%s1230_s21 + $0x10] sm:$0xff] %v626_v5 }
 0x158   : > { %629 = vst [vmem:[%s1230_s21 + $0x8] sm:$0xff] %v625_v4 }
 0x159 PF: > { %s19_s17 = sadd.s32 1, %s1050_s17   ;;  %s1316_s12 = smov %s1034_s13 }
 0x15a   : > { %p16_p9 = scmp.ge.s32.totalorder %s19_s17, 4   ;;  %s1317_s13 = smov %s1038_s14 }
 0x15b   : > { %s1318_s14 = smov %s1128_s24  ;;  %s1319_s15 = smov %s1046_s16 }
 0x15c   : > { %s1320_s16 = smov %s1322_s19  ;;  %18 = sbr.rel (!%p16_p9) target bundleno = 6 (0x6), region = 96 }
 0x163   :  { %662 = vsyncpa [#allocation3], 1 }
 0x164   :  { %664 = vsyncpa [#allocation3 + $0x1], 1 }
 0x165   :  { %665 = vsyncpa [#allocation5], 1 }
 0x166   :  { %667 = vsyncpa [#allocation5 + $0x1], 1 }

// kernel: decoder_forward.6
= control target key start
LH: loop header
LB: loop body
LE: loop exit
PB: predicated region body
PF: predicated region fallthrough
CT: control target
= control target key end

     0   :  { %8 = vsyncpa [#allocation3], 0  ;;  %s4757_s0 = inlined_call_operand.vmem [shape: bf16[8,1024], index: 0, kind: input, shape index: {}]   ;;  %s4758_s1 = inlined_call_operand.hbm [shape: bf16[1024,3200], index: 1, kind: input, shape index: {}]   ;;  %s4759_s2 = inlined_call_operand.hbm [shape: f32[1,3200], index: 2, kind: input, shape index: {}]   ;;  %s4760_s3 = inlined_call_operand.vmem [shape: f32[8,3200], index: 3, kind: output, shape index: {}]  }
   0x1   :  { %10 = vsyncpa [#allocation3 + $0x1], 0 }
   0x2   :  { %11 = vsyncpa [#allocation5], 0 }
   0x3   :  { %13 = vsyncpa [#allocation5 + $0x1], 0  ;;  %s4182_s12 = smov 0   ;;  %s4184_s13 = smov 0  }
   0x4   :  { %s4186_s14 = smov 0   ;;  %s4188_s15 = smov 0  }
   0x5   :  { %s4190_s16 = smov 0   ;;  %s4192_s17 = smov 0  }
   0x6 LB: > { %s3088_s18 = sadd.s32 4294967295, %s4155_s17   ;;  %s34_s19 = sadd.s32 1, %s4151_s16  ;;  %s4155_s17 = sphi %s4192_s17, %s19_s17   ;;  %s4151_s16 = sphi %s4190_s16, %s4772_s16   ;;  %s4147_s15 = sphi %s4188_s15, %s4771_s15   ;;  %s4143_s14 = sphi %s4186_s14, %s4770_s14   ;;  %s4139_s13 = sphi %s4184_s13, %s4769_s13   ;;  %s4135_s12 = sphi %s4182_s12, %s4768_s12  }
   0x7   : > { %p36_p0 = scmp.ge.s32.totalorder %s34_s19, 5  ;;  %s75_s20 = sadd.s32 1, %s4143_s14 }
   0x8   : > { %p82_p1 = scmp.ne.s32.totalorder %s4143_s14, %s4139_s13  ;;  %p83_p2 = scmp.eq.s32.totalorder %s4155_s17, 0 }
   0x9   : > { %s4774_s19 = smov (%p36_p0, %s34_s19), 0  ;;  %p88_p4 = scmp.ne.s32.totalorder %s4139_s13, %s4135_s12 }
   0xa   : > { %p84_p3 = por %p83_p2, %p82_p1  ;;  %s71_s21 = ssub.s32 %s4151_s16, %s4774_s19 }
   0xb   : > { %p89_p5 = scmp.eq.s32.totalorder %s3088_s18, 0  ;;  %p73_p6 = scmp.eq.s32.totalorder %s71_s21, 0 }
   0xc   : > { %p3532_p8 = scmp.lt.s32.totalorder %s4155_s17, 5  ;;  %s4230_s24 = sand.u32 1, %s4143_s14  }
   0xd   : > { %p4221_p7 = por %p89_p5, %p88_p4  ;;  %s3427_s25 = smul.u32 320, %s4151_s16 }
   0xe   : > { %s4227_s23 = scalar_select %p73_p6, %s4143_s14, %s75_s20  }
   0xf   : > { %s4762_s22 = scalar_select %p4221_p7, 1, 0 }
  0x10   : > { %s3517_s26 = smul.u32 2560, %s4230_s24  ;;  %s4237_s29 = scalar_lea.hbm %s4758_s1, %s3427_s25 }
  0x11   : > { %p4239_p9 = pnand %p3532_p8, %p84_p3  ;;  %s180_s6 = scalar_lea.sflag [#allocation3], %s4230_s24 }
  0x12   : > { %s183_s4 = scalar_lea.vmem [#allocation2], %s3517_s26  ;;  %s4041_s7 = scalar_lea.hbm %s4237_s29, 40960 }
  0x13   : > { %s193_s5 = sshll.u32 %s183_s4, 4  ;;  %p4042_p11 = scmp.ne.s32.totalorder %s4237_s29, %s4041_s7  ;;  %s4243_s5 = int_to_ptr.vmem [resolvable:$true] %s193_s5 }
  0x14   : > { %p4043_p12 = pneg %p4239_p9  ;;  %s4046_s10 = scalar_lea.hbm %s4758_s1, 204800 }
  0x15   : > { %p4047_p1 = scmp.lt.u32.totalorder %s4237_s29, %s4758_s1  ;;  %p4048_p2 = scmp.lt.u32.totalorder %s4046_s10, %s4041_s7 }
  0x16   : > { %p4044_p13 = pnand %p4043_p12, %p4042_p11  ;;  %p4050_p4 = scmp.lt.u32.totalorder %s4041_s7, %s4237_s29 }
  0x17   : > { %p4049_p3 = por %p4048_p2, %p4047_p1 }
  0x18   : > { %p4045_p0 = pneg %p4044_p13 }
  0x19   : > { %p4051_p5 = por %p4050_p4, %p4049_p3 }
  0x1b   : > { %p4052_p6 = pnand %p4051_p5, %p4045_p0 }
  0x1d   : > { %4055 = shalt.err (!%p4052_p6)
}
  0x1e   : > { %s4056_s18 = scalar_lea.vmem %s4243_s5, 40960  ;;  %s4157_s20 = smov [#allocation2]  }
  0x1f   : > { %p4057_p8 = scmp.ne.s32.totalorder %s4243_s5, %s4056_s18  ;;  %s4061_s21 = sshll.u32 %s4157_s20, 4  ;;  %s4062_s21 = int_to_ptr.vmem [resolvable:$false] %s4061_s21 }
  0x20   : > { %s4063_s25 = scalar_lea.vmem %s4062_s21, 81920  ;;  %p4064_p10 = scmp.lt.s32.totalorder %s4243_s5, %s4062_s21 }
  0x21   : > { %p4059_p11 = pnand %p4057_p8, %p4043_p12  ;;  %p4065_p1 = scmp.lt.s32.totalorder %s4063_s25, %s4056_s18 }
  0x23   : > { %p4060_p13 = pneg %p4059_p11  ;;  %p4066_p2 = por %p4065_p1, %p4064_p10 }
  0x25   : > { %p4067_p3 = pnand %p4066_p2, %p4060_p13 }
  0x27   : > { %4070 = shalt.err (!%p4067_p3)
}
  0x28   : > { %s4158_s26 = smov 1600   ;;  %s4159_s27 = smov 320  }
  0x29   : > { %s4160_s28 = smov 20   ;;  %p220_p0 = scmp.lt.s32.totalorder %s4155_s17, 6 }
  0x2a   : > { %3528 = dma.hbm_to_vmem [thread:$0]  (!%p4239_p9), %s4237_s29, 40960, %s4243_s5, %s180_s6, %s4158_s26, %s4159_s27, %s4160_s28  }
  0x2b   : > { %s3518_s4 = smul.u32 5, %s4230_s24  ;;  %p4764_p10 = scmp.ge.s32.totalorder %s4155_s17, 1 }
  0x2c   : > { %s3428_s8 = smul.u32 80, %s4151_s16  ;;  %s204_s29 = scalar_lea.sflag [#allocation5], %s4230_s24 }
  0x2d   : > { %p4278_p4 = pnand %p4764_p10, %p220_p0  ;;  %s207_s12 = scalar_lea.vmem [#allocation4], %s3518_s4 }
  0x2e   : > { %s4286_s11 = scalar_lea.hbm %s4759_s2, %s3428_s8  ;;  %s215_s18 = sshll.u32 %s207_s12, 4  ;;  %s216_s18 = int_to_ptr.vmem [resolvable:$true] %s215_s18 }
  0x2f   : > { %s4765_s7 = scalar_select %p4278_p4, 1, 0 }
  0x30   : > { %s4071_s5 = scalar_lea.hbm %s4286_s11, 80  ;;  %s4076_s21 = scalar_lea.hbm %s4759_s2, 400 }
  0x31   : > { %p4072_p5 = scmp.ne.s32.totalorder %s4286_s11, %s4071_s5  ;;  %p4077_p11 = scmp.lt.u32.totalorder %s4286_s11, %s4759_s2 }
  0x32   : > { %p4078_p13 = scmp.lt.u32.totalorder %s4076_s21, %s4071_s5  ;;  %p4080_p2 = scmp.lt.u32.totalorder %s4071_s5, %s4286_s11 }
  0x33   : > { %p4074_p6 = pnand %p4072_p5, %p4043_p12 }
  0x34   : > { %p4079_p1 = por %p4078_p13, %p4077_p11 }
  0x35   : > { %p4075_p8 = pneg %p4074_p6 }
  0x36   : > { %p4081_p3 = por %p4080_p2, %p4079_p1 }
  0x38   : > { %p4082_p0 = pnand %p4081_p3, %p4075_p8 }
  0x3a   : > { %4085 = shalt.err (!%p4082_p0)
}
  0x3b   : > { %s4086_s24 = scalar_lea.vmem %s216_s18, 80  ;;  %s4161_s27 = smov [#allocation4]  }
  0x3c   : > { %p4087_p10 = scmp.ne.s32.totalorder %s216_s18, %s4086_s24  ;;  %s4091_s28 = sshll.u32 %s4161_s27, 4  ;;  %s4092_s28 = int_to_ptr.vmem [resolvable:$false] %s4091_s28 }
  0x3d   : > { %s4093_s4 = scalar_lea.vmem %s4092_s28, 160  ;;  %p4094_p7 = scmp.lt.s32.totalorder %s216_s18, %s4092_s28 }
  0x3e   : > { %p4089_p5 = pnand %p4087_p10, %p4043_p12  ;;  %p4095_p4 = scmp.lt.s32.totalorder %s4093_s4, %s4086_s24 }
  0x40   : > { %p4090_p6 = pneg %p4089_p5  ;;  %p4096_p11 = por %p4095_p4, %p4094_p7 }
  0x42   : > { %p4097_p13 = pnand %p4096_p11, %p4090_p6 }
  0x44   : > { %4100 = shalt.err (!%p4097_p13)
}
  0x45   : > { %3531 = dma.hbm_to_vmem [thread:$0]  (!%p4239_p9), %s4286_s11, 80, %s216_s18, %s204_s29  }
  0x46   : > { %p4766_p8 = scmp.ne.s32.totalorder %s4765_s7, 0 }
  0x47   : > { %s226_s8 = sand.u32 (!%p4766_p8), 1, %s4139_s13   ;;  %p4767_p12 = scmp.ne.s32.totalorder (!%p4766_p8), %s4762_s22, 0 }
  0x48   : > { %224 = sbr.rel (%p4766_p8) target bundleno = 629 (0x275), region = 32  ;;  %s227_s10 = scalar_lea.sflag (!%p4766_p8), [#allocation3], %s226_s8 }
  0x49   : > { %s3519_s9 = smul.u32 (!%p4766_p8), 2560, %s226_s8 }
  0x4b   : > { %s4311_s12 = scalar_lea.vmem (!%p4766_p8), [#allocation2], %s3519_s9 }
  0x4f   : > { %4126 = dma.done.wait (%p4767_p12), %s227_s10, 40960  }
  0x50   : > { %4128 = vsyncadd (%p4767_p12), %s227_s10, 4294926336  ;;  %s3520_s5 = smul.u32 5, %s226_s8  ;;  %s236_s30 = scalar_lea.sflag [#allocation5], %s226_s8 }
  0x52   : > { %s4317_s6 = scalar_lea.vmem [#allocation4], %s3520_s5 }
  0x53   : > { %4130 = dma.done.wait (%p4767_p12), %s236_s30, 80  }
  0x54   : > { %4132 = vsyncadd (%p4767_p12), %s236_s30, 4294967216  ;;  %v3585_v0 = vld [vmem:[%s4311_s12 + $0x4] ss:$20 sps:$4 sm:$0xff]   ;;  %v3589_v2 = vld [vmem:[%s4311_s12] ss:$20 sps:$4 sm:$0xff]   ;;  %s293_s26 = smul.u32 5, %s4147_s15 }
  0x55   : > { %v3587_v1 = vld [vmem:[%s4311_s12 + $0x284] ss:$20 sps:$4 sm:$0xff]   ;;  %2398 = vmatprep.subr.bf16.mxu0 %v3585_v0  ;;  %v3590_v3 = vld [vmem:[%s4311_s12 + $0x280] ss:$20 sps:$4 sm:$0xff]   ;;  %v3595_v6 = vld [vmem:[%s4311_s12 + $0x28] ss:$20 sps:$4 sm:$0xff]  }
  0x56   : > { %2439 = vmatprep.subr.bf16.mxu1 %v3587_v1  ;;  %v3591_v4 = vld [vmem:[%s4311_s12 + $0x2c] ss:$20 sps:$4 sm:$0xff]   ;;  %2399 = vmatpush1.bf16.msra.mxu0 %v3589_v2  ;;  %v3596_v7 = vld [vmem:[%s4311_s12 + $0x2a8] ss:$20 sps:$4 sm:$0xff]   ;;  %v3601_v10 = vld [vmem:[%s4311_s12 + $0x50] ss:$20 sps:$4 sm:$0xff]  }
  0x57   : > { %2440 = vmatpush1.bf16.msra.mxu1 %v3590_v3  ;;  %v3593_v5 = vld [vmem:[%s4311_s12 + $0x2ac] ss:$20 sps:$4 sm:$0xff]   ;;  %2400 = vmatprep.subr.bf16.mxu0 %v3591_v4  ;;  %v3597_v8 = vld [vmem:[%s4311_s12 + $0x54] ss:$20 sps:$4 sm:$0xff]   ;;  %v3602_v11 = vld [vmem:[%s4311_s12 + $0x2d0] ss:$20 sps:$4 sm:$0xff]  }
  0x58   : > { %2441 = vmatprep.subr.bf16.mxu1 %v3593_v5  ;;  %v3599_v9 = vld [vmem:[%s4311_s12 + $0x2d4] ss:$20 sps:$4 sm:$0xff]   ;;  %v3603_v12 = vld [vmem:[%s4311_s12 + $0x7c] ss:$20 sps:$4 sm:$0xff]   ;;  %v3607_v14 = vld [vmem:[%s4311_s12 + $0x78] ss:$20 sps:$4 sm:$0xff]  }
  0x59   : > { %v3605_v13 = vld [vmem:[%s4311_s12 + $0x2fc] ss:$20 sps:$4 sm:$0xff]   ;;  %v3608_v15 = vld [vmem:[%s4311_s12 + $0x2f8] ss:$20 sps:$4 sm:$0xff]   ;;  %v3613_v18 = vld [vmem:[%s4311_s12 + $0xa0] ss:$20 sps:$4 sm:$0xff]  }
  0x5a   : > { %2401 = vmatpush1.bf16.msra.mxu0 %v3595_v6  ;;  %v3609_v16 = vld [vmem:[%s4311_s12 + $0xa4] ss:$20 sps:$4 sm:$0xff]   ;;  %v3614_v19 = vld [vmem:[%s4311_s12 + $0x320] ss:$20 sps:$4 sm:$0xff]   ;;  %v3619_v22 = vld [vmem:[%s4311_s12 + $0xc8] ss:$20 sps:$4 sm:$0xff]  }
  0x5b   : > { %2442 = vmatpush1.bf16.msra.mxu1 %v3596_v7  ;;  %2402 = vmatprep.subr.bf16.mxu0 %v3597_v8  ;;  %v3611_v17 = vld [vmem:[%s4311_s12 + $0x324] ss:$20 sps:$4 sm:$0xff]   ;;  %v3615_v20 = vld [vmem:[%s4311_s12 + $0xcc] ss:$20 sps:$4 sm:$0xff]   ;;  %v3620_v23 = vld [vmem:[%s4311_s12 + $0x348] ss:$20 sps:$4 sm:$0xff]  }
  0x5c   : > { %2443 = vmatprep.subr.bf16.mxu1 %v3599_v9  ;;  %v3617_v21 = vld [vmem:[%s4311_s12 + $0x34c] ss:$20 sps:$4 sm:$0xff]   ;;  %v3621_v24 = vld [vmem:[%s4311_s12 + $0xf4] ss:$20 sps:$4 sm:$0xff]   ;;  %v3625_v26 = vld [vmem:[%s4311_s12 + $0xf0] ss:$20 sps:$4 sm:$0xff]  }
  0x5d   : > { %v3623_v25 = vld [vmem:[%s4311_s12 + $0x374] ss:$20 sps:$4 sm:$0xff]   ;;  %v3626_v27 = vld [vmem:[%s4311_s12 + $0x370] ss:$20 sps:$4 sm:$0xff]   ;;  %v3631_v30 = vld [vmem:[%s4311_s12 + $0x118] ss:$20 sps:$4 sm:$0xff]  }
  0x5e   : > { %2403 = vmatpush1.bf16.msra.mxu0 %v3601_v10  ;;  %v3627_v28 = vld [vmem:[%s4311_s12 + $0x11c] ss:$20 sps:$4 sm:$0xff]   ;;  %v3632_v31 = vld [vmem:[%s4311_s12 + $0x398] ss:$20 sps:$4 sm:$0xff]   ;;  %v3637_v34 = vld [vmem:[%s4311_s12 + $0x140] ss:$20 sps:$4 sm:$0xff]  }
  0x5f   : > { %2444 = vmatpush1.bf16.msra.mxu1 %v3602_v11  ;;  %2404 = vmatprep.subr.bf16.mxu0 %v3603_v12  ;;  %v3629_v29 = vld [vmem:[%s4311_s12 + $0x39c] ss:$20 sps:$4 sm:$0xff]   ;;  %v3633_v32 = vld [vmem:[%s4311_s12 + $0x144] ss:$20 sps:$4 sm:$0xff]   ;;  %v3638_v35 = vld [vmem:[%s4311_s12 + $0x3c0] ss:$20 sps:$4 sm:$0xff]  }
  0x60   : > { %2445 = vmatprep.subr.bf16.mxu1 %v3605_v13  ;;  %v3635_v33 = vld [vmem:[%s4311_s12 + $0x3c4] ss:$20 sps:$4 sm:$0xff]   ;;  %v3639_v36 = vld [vmem:[%s4311_s12 + $0x16c] ss:$20 sps:$4 sm:$0xff]   ;;  %v3643_v38 = vld [vmem:[%s4311_s12 + $0x168] ss:$20 sps:$4 sm:$0xff]  }
  0x61   : > { %v3641_v37 = vld [vmem:[%s4311_s12 + $0x3ec] ss:$20 sps:$4 sm:$0xff]   ;;  %v3644_v39 = vld [vmem:[%s4311_s12 + $0x3e8] ss:$20 sps:$4 sm:$0xff]   ;;  %v3649_v42 = vld [vmem:[%s4311_s12 + $0x190] ss:$20 sps:$4 sm:$0xff]  }
  0x62   : > { %2405 = vmatpush1.bf16.msra.mxu0 %v3607_v14  ;;  %v3645_v40 = vld [vmem:[%s4311_s12 + $0x194] ss:$20 sps:$4 sm:$0xff]   ;;  %v3650_v43 = vld [vmem:[%s4311_s12 + $0x410] ss:$20 sps:$4 sm:$0xff]   ;;  %v3655_v49 = vld [vmem:[%s4311_s12 + $0x1b8] ss:$20 sps:$4 sm:$0xff]  }
  0x63   : > { %2446 = vmatpush1.bf16.msra.mxu1 %v3608_v15  ;;  %2406 = vmatprep.subr.bf16.mxu0 %v3609_v16  ;;  %v3647_v41 = vld [vmem:[%s4311_s12 + $0x414] ss:$20 sps:$4 sm:$0xff]   ;;  %v3651_v44 = vld [vmem:[%s4311_s12 + $0x1bc] ss:$20 sps:$4 sm:$0xff]   ;;  %v318_v46 = vld [vmem:[%s4757_s0] sm:$0xff]  ;;  %p296_p7 = scmp.lt.s32.totalorder %s293_s26, 24 }
  0x64   : > { %2447 = vmatprep.subr.bf16.mxu1 %v3611_v17  ;;  %v3653_v45 = vld [vmem:[%s4311_s12 + $0x43c] ss:$20 sps:$4 sm:$0xff]   ;;  %v4372_v47 = vcombine.high %v318_v46, %v318_v46  ;;  %v319_v48 = vld [vmem:[%s4757_s0 + $0x8] sm:$0xff]  ;;  %v3657_v52 = vld [vmem:[%s4311_s12 + $0x1e4] ss:$20 sps:$4 sm:$0xff]   ;;  %v4401_v6 = vcombine.low %v318_v46, %v318_v46 }
  0x65   : > { %v3656_v50 = vld [vmem:[%s4311_s12 + $0x438] ss:$20 sps:$4 sm:$0xff]   ;;  %v4379_v51 = vcombine.high %v319_v48, %v319_v48  ;;  %v3661_v54 = vld [vmem:[%s4311_s12 + $0x1e0] ss:$20 sps:$4 sm:$0xff]   ;;  %v3667_v58 = vld [vmem:[%s4311_s12 + $0x208] ss:$20 sps:$4 sm:$0xff]   ;;  %v4403_v7 = vcombine.low %v319_v48, %v319_v48 }
  0x66   : > { %2407 = vmatpush1.bf16.msra.mxu0 %v3613_v18  ;;  %v3659_v53 = vld [vmem:[%s4311_s12 + $0x464] ss:$20 sps:$4 sm:$0xff]   ;;  %2430 = vmatprep.mubr.bf16.mxu0 %v4372_v47  ;;  %v3662_v55 = vld [vmem:[%s4311_s12 + $0x460] ss:$20 sps:$4 sm:$0xff]   ;;  %v3668_v59 = vld [vmem:[%s4311_s12 + $0x488] ss:$20 sps:$4 sm:$0xff]  }
  0x67   : > { %2448 = vmatpush1.bf16.msra.mxu1 %v3614_v19  ;;  %2408 = vmatprep.subr.bf16.mxu0 %v3615_v20  ;;  %v3663_v56 = vld [vmem:[%s4311_s12 + $0x20c] ss:$20 sps:$4 sm:$0xff]   ;;  %v3669_v60 = vld [vmem:[%s4311_s12 + $0x234] ss:$20 sps:$4 sm:$0xff]   ;;  %v3673_v62 = vld [vmem:[%s4311_s12 + $0x230] ss:$20 sps:$4 sm:$0xff]  }
  0x68   : > { %2449 = vmatprep.subr.bf16.mxu1 %v3617_v21  ;;  %2471 = vmatprep.mubr.bf16.mxu1 %v4379_v51  ;;  %v3665_v57 = vld [vmem:[%s4311_s12 + $0x48c] ss:$20 sps:$4 sm:$0xff]   ;;  %v3671_v61 = vld [vmem:[%s4311_s12 + $0x4b4] ss:$20 sps:$4 sm:$0xff]   ;;  %v3674_v63 = vld [vmem:[%s4311_s12 + $0x4b0] ss:$20 sps:$4 sm:$0xff]  }
  0x69   : > { %v3675_v0 = vld [vmem:[%s4311_s12 + $0x25c] ss:$20 sps:$4 sm:$0xff]   ;;  %v3679_v2 = vld [vmem:[%s4311_s12 + $0x258] ss:$20 sps:$4 sm:$0xff]   ;;  %v3685_v8 = vld [vmem:[%s4311_s12 + $0x500] ss:$20 sps:$4 sm:$0xff]  }
  0x6a   : > { %2409 = vmatpush1.bf16.msra.mxu0 %v3619_v22  ;;  %v3677_v1 = vld [vmem:[%s4311_s12 + $0x4dc] ss:$20 sps:$4 sm:$0xff]   ;;  %v3680_v3 = vld [vmem:[%s4311_s12 + $0x4d8] ss:$20 sps:$4 sm:$0xff]   ;;  %v3688_v9 = vld [vmem:[%s4311_s12 + $0x780] ss:$20 sps:$4 sm:$0xff]  }
  0x6b   : > { %2450 = vmatpush1.bf16.msra.mxu1 %v3620_v23  ;;  %2410 = vmatprep.subr.bf16.mxu0 %v3621_v24  ;;  %v3687_v4 = vld [vmem:[%s4311_s12 + $0x504] ss:$20 sps:$4 sm:$0xff]   ;;  %v3693_v10 = vld [vmem:[%s4311_s12 + $0x52c] ss:$20 sps:$4 sm:$0xff]   ;;  %v3691_v12 = vld [vmem:[%s4311_s12 + $0x528] ss:$20 sps:$4 sm:$0xff]  }
  0x6c   : > { %2451 = vmatprep.subr.bf16.mxu1 %v3623_v25  ;;  %v3690_v5 = vld [vmem:[%s4311_s12 + $0x784] ss:$20 sps:$4 sm:$0xff]   ;;  %v3696_v11 = vld [vmem:[%s4311_s12 + $0x7ac] ss:$20 sps:$4 sm:$0xff]   ;;  %v3694_v13 = vld [vmem:[%s4311_s12 + $0x7a8] ss:$20 sps:$4 sm:$0xff]  }
  0x6d   : > { %v3699_v14 = vld [vmem:[%s4311_s12 + $0x554] ss:$20 sps:$4 sm:$0xff]   ;;  %v3697_v16 = vld [vmem:[%s4311_s12 + $0x550] ss:$20 sps:$4 sm:$0xff]   ;;  %v3703_v20 = vld [vmem:[%s4311_s12 + $0x578] ss:$20 sps:$4 sm:$0xff]  }
  0x6e   : > { %2411 = vmatpush1.bf16.msra.mxu0 %v3625_v26  ;;  %v3702_v15 = vld [vmem:[%s4311_s12 + $0x7d4] ss:$20 sps:$4 sm:$0xff]   ;;  %v3700_v17 = vld [vmem:[%s4311_s12 + $0x7d0] ss:$20 sps:$4 sm:$0xff]   ;;  %v3706_v21 = vld [vmem:[%s4311_s12 + $0x7f8] ss:$20 sps:$4 sm:$0xff]  }
  0x6f   : > { %2452 = vmatpush1.bf16.msra.mxu1 %v3626_v27  ;;  %2412 = vmatprep.subr.bf16.mxu0 %v3627_v28  ;;  %v3705_v18 = vld [vmem:[%s4311_s12 + $0x57c] ss:$20 sps:$4 sm:$0xff]   ;;  %v3711_v22 = vld [vmem:[%s4311_s12 + $0x5a4] ss:$20 sps:$4 sm:$0xff]   ;;  %v3709_v24 = vld [vmem:[%s4311_s12 + $0x5a0] ss:$20 sps:$4 sm:$0xff]  }
  0x70   : > { %2453 = vmatprep.subr.bf16.mxu1 %v3629_v29  ;;  %v3708_v19 = vld [vmem:[%s4311_s12 + $0x7fc] ss:$20 sps:$4 sm:$0xff]   ;;  %v3714_v23 = vld [vmem:[%s4311_s12 + $0x824] ss:$20 sps:$4 sm:$0xff]   ;;  %v3712_v25 = vld [vmem:[%s4311_s12 + $0x820] ss:$20 sps:$4 sm:$0xff]  }
  0x71   : > { %v3717_v26 = vld [vmem:[%s4311_s12 + $0x5cc] ss:$20 sps:$4 sm:$0xff]   ;;  %v3715_v28 = vld [vmem:[%s4311_s12 + $0x5c8] ss:$20 sps:$4 sm:$0xff]   ;;  %s4776_s26 = smov (!%p296_p7, %s293_s26), 24 }
  0x72   : > { %2413 = vmatpush1.bf16.msra.mxu0 %v3631_v30  ;;  %v3720_v27 = vld [vmem:[%s4311_s12 + $0x84c] ss:$20 sps:$4 sm:$0xff]   ;;  %v3718_v29 = vld [vmem:[%s4311_s12 + $0x848] ss:$20 sps:$4 sm:$0xff]   ;;  %s3096_s15 = sshll.u32 %s4776_s26, 3 }
  0x73   : > { %2454 = vmatpush1.bf16.msra.mxu1 %v3632_v31  ;;  %2414 = vmatprep.subr.bf16.mxu0 %v3633_v32  ;;  %v3723_v30 = vld [vmem:[%s4311_s12 + $0x5f4] ss:$20 sps:$4 sm:$0xff]   ;;  %v3741_v46 = vld [vmem:[%s4311_s12 + $0x66c] ss:$20 sps:$4 sm:$0xff]   ;;  %s4726_s28 = scalar_lea.vmem %s4760_s3, %s3096_s15 }
  0x74   : > { %2455 = vmatprep.subr.bf16.mxu1 %v3635_v33  ;;  %v3726_v31 = vld [vmem:[%s4311_s12 + $0x874] ss:$20 sps:$4 sm:$0xff]   ;;  %v4439_v33 = vld [vmem:[%s4757_s0 + $0x18] sm:$0xff]  ;;  %v3744_v48 = vld [vmem:[%s4311_s12 + $0x8ec] ss:$20 sps:$4 sm:$0xff]  }
  0x75   : > { %v4434_v32 = vld [vmem:[%s4757_s0 + $0x10] sm:$0xff] }
  0x76   : > { %2415 = vmatpush1.bf16.msra.mxu0 %v3637_v34  ;;  %v3721_v34 = vld [vmem:[%s4311_s12 + $0x5f0] ss:$20 sps:$4 sm:$0xff]  }
  0x77   : > { %2456 = vmatpush1.bf16.msra.mxu1 %v3638_v35  ;;  %2416 = vmatprep.subr.bf16.mxu0 %v3639_v36  ;;  %v3724_v35 = vld [vmem:[%s4311_s12 + $0x870] ss:$20 sps:$4 sm:$0xff]   ;;  %v4445_v36 = vcombine.high %v4434_v32, %v4434_v32 }
  0x78   : > { %2457 = vmatprep.subr.bf16.mxu1 %v3641_v37  ;;  %v4449_v37 = vcombine.high %v4439_v33, %v4439_v33 }
  0x7a   : > { %2417 = vmatpush1.bf16.msra.mxu0 %v3643_v38  ;;  %v3729_v38 = vld [vmem:[%s4311_s12 + $0x61c] ss:$20 sps:$4 sm:$0xff]  }
  0x7b   : > { %2458 = vmatpush1.bf16.msra.mxu1 %v3644_v39  ;;  %2418 = vmatprep.subr.bf16.mxu0 %v3645_v40  ;;  %v3732_v39 = vld [vmem:[%s4311_s12 + $0x89c] ss:$20 sps:$4 sm:$0xff]   ;;  %v3727_v40 = vld [vmem:[%s4311_s12 + $0x618] ss:$20 sps:$4 sm:$0xff]  }
  0x7c   : > { %2459 = vmatprep.subr.bf16.mxu1 %v3647_v41  ;;  %v3730_v41 = vld [vmem:[%s4311_s12 + $0x898] ss:$20 sps:$4 sm:$0xff]  }
  0x7e   : > { %2419 = vmatpush1.bf16.msra.mxu0 %v3649_v42  ;;  %v3735_v42 = vld [vmem:[%s4311_s12 + $0x644] ss:$20 sps:$4 sm:$0xff]  }
  0x7f   : > { %2460 = vmatpush1.bf16.msra.mxu1 %v3650_v43  ;;  %2420 = vmatprep.subr.bf16.mxu0 %v3651_v44  ;;  %v3738_v43 = vld [vmem:[%s4311_s12 + $0x8c4] ss:$20 sps:$4 sm:$0xff]   ;;  %v3733_v44 = vld [vmem:[%s4311_s12 + $0x640] ss:$20 sps:$4 sm:$0xff]  }
  0x80   : > { %2461 = vmatprep.subr.bf16.mxu1 %v3653_v45  ;;  %v3736_v45 = vld [vmem:[%s4311_s12 + $0x8c0] ss:$20 sps:$4 sm:$0xff]  }
  0x82   : > { %2421 = vmatpush1.bf16.msra.mxu0 %v3655_v49  ;;  %v3739_v49 = vld [vmem:[%s4311_s12 + $0x668] ss:$20 sps:$4 sm:$0xff]  }
  0x83   : > { %2462 = vmatpush1.bf16.msra.mxu1 %v3656_v50  ;;  %2422 = vmatprep.subr.bf16.mxu0 %v3657_v52  ;;  %v3742_v50 = vld [vmem:[%s4311_s12 + $0x8e8] ss:$20 sps:$4 sm:$0xff]  }
  0x84   : > { %2463 = vmatprep.subr.bf16.mxu1 %v3659_v53  ;;  %v3747_v52 = vld [vmem:[%s4311_s12 + $0x694] ss:$20 sps:$4 sm:$0xff]  }
  0x85   : > { %v3750_v53 = vld [vmem:[%s4311_s12 + $0x914] ss:$20 sps:$4 sm:$0xff]  }
  0x86   : > { %2423 = vmatpush1.bf16.msra.mxu0 %v3661_v54  ;;  %v3745_v54 = vld [vmem:[%s4311_s12 + $0x690] ss:$20 sps:$4 sm:$0xff]  }
  0x87   : > { %2464 = vmatpush1.bf16.msra.mxu1 %v3662_v55  ;;  %2424 = vmatprep.subr.bf16.mxu0 %v3663_v56  ;;  %v3748_v55 = vld [vmem:[%s4311_s12 + $0x910] ss:$20 sps:$4 sm:$0xff]  }
  0x88   : > { %2465 = vmatprep.subr.bf16.mxu1 %v3665_v57  ;;  %v3753_v56 = vld [vmem:[%s4311_s12 + $0x6bc] ss:$20 sps:$4 sm:$0xff]  }
  0x89   : > { %v3756_v57 = vld [vmem:[%s4311_s12 + $0x93c] ss:$20 sps:$4 sm:$0xff]  }
  0x8a   : > { %2425 = vmatpush1.bf16.msra.mxu0 %v3667_v58  ;;  %v3751_v58 = vld [vmem:[%s4311_s12 + $0x6b8] ss:$20 sps:$4 sm:$0xff]  }
  0x8b   : > { %2466 = vmatpush1.bf16.msra.mxu1 %v3668_v59  ;;  %2426 = vmatprep.subr.bf16.mxu0 %v3669_v60  ;;  %v3754_v59 = vld [vmem:[%s4311_s12 + $0x938] ss:$20 sps:$4 sm:$0xff]  }
  0x8c   : > { %2467 = vmatprep.subr.bf16.mxu1 %v3671_v61  ;;  %v3759_v60 = vld [vmem:[%s4311_s12 + $0x6e4] ss:$20 sps:$4 sm:$0xff]  }
  0x8d   : > { %v3762_v61 = vld [vmem:[%s4311_s12 + $0x964] ss:$20 sps:$4 sm:$0xff]  }
  0x8e   : > { %2427 = vmatpush1.bf16.msra.mxu0 %v3673_v62  ;;  %v3757_v62 = vld [vmem:[%s4311_s12 + $0x6e0] ss:$20 sps:$4 sm:$0xff]  }
  0x8f   : > { %2468 = vmatpush1.bf16.msra.mxu1 %v3674_v63  ;;  %2428 = vmatprep.subr.bf16.mxu0 %v3675_v0  ;;  %v3760_v63 = vld [vmem:[%s4311_s12 + $0x960] ss:$20 sps:$4 sm:$0xff]  }
  0x90   : > { %2469 = vmatprep.subr.bf16.mxu1 %v3677_v1  ;;  %v3765_v0 = vld [vmem:[%s4311_s12 + $0x70c] ss:$20 sps:$4 sm:$0xff]  }
  0x91   : > { %v3768_v1 = vld [vmem:[%s4311_s12 + $0x98c] ss:$20 sps:$4 sm:$0xff]  }
  0x92   : > { %2429 = vmatpush1.bf16.msra.mxu0 %v3679_v2  ;;  %v3763_v2 = vld [vmem:[%s4311_s12 + $0x708] ss:$20 sps:$4 sm:$0xff]  }
  0x93   : > { %2470 = vmatpush1.bf16.msra.mxu1 %v3680_v3  ;;  %2480 = vmatprep.subr.bf16.mxu0 %v3687_v4  ;;  %v3766_v3 = vld [vmem:[%s4311_s12 + $0x988] ss:$20 sps:$4 sm:$0xff]  }
  0x94   : > { %2521 = vmatprep.subr.bf16.mxu1 %v3690_v5  ;;  %v3771_v4 = vld [vmem:[%s4311_s12 + $0x734] ss:$20 sps:$4 sm:$0xff]  }
  0x95   : > { %2431 = vmatmul.mubr.bf16.vlgmr.msra.gmra.mrb[0].mxu0 %v4401_v6  ;;  %v3774_v5 = vld [vmem:[%s4311_s12 + $0x9b4] ss:$20 sps:$4 sm:$0xff]  }
  0x96   : > { %2472 = vmatmul.mubr.bf16.vlgmr.msra.gmra.mrb[0].mxu1 %v4403_v7  ;;  %2481 = vmatpush1.bf16.msra.mxu0 %v3685_v8  ;;  %v3769_v8 = vld [vmem:[%s4311_s12 + $0x730] ss:$20 sps:$4 sm:$0xff]  }
  0x97   : > { %2522 = vmatpush1.bf16.msra.mxu1 %v3688_v9  ;;  %2482 = vmatprep.subr.bf16.mxu0 %v3693_v10  ;;  %v3772_v9 = vld [vmem:[%s4311_s12 + $0x9b0] ss:$20 sps:$4 sm:$0xff]  }
  0x98   : > { %2523 = vmatprep.subr.bf16.mxu1 %v3696_v11  ;;  %2512 = vmatprep.mubr.bf16.mxu0 %v4445_v36  ;;  %v3777_v10 = vld [vmem:[%s4311_s12 + $0x75c] ss:$20 sps:$4 sm:$0xff]  }
  0x99   : > { %2553 = vmatprep.mubr.bf16.mxu1 %v4449_v37  ;;  %v3780_v11 = vld [vmem:[%s4311_s12 + $0x9dc] ss:$20 sps:$4 sm:$0xff]  }
  0x9a   : > { %2483 = vmatpush1.bf16.msra.mxu0 %v3691_v12  ;;  %v3775_v12 = vld [vmem:[%s4311_s12 + $0x758] ss:$20 sps:$4 sm:$0xff]  }
  0x9b   : > { %2524 = vmatpush1.bf16.msra.mxu1 %v3694_v13  ;;  %2484 = vmatprep.subr.bf16.mxu0 %v3699_v14  ;;  %v3778_v13 = vld [vmem:[%s4311_s12 + $0x9d8] ss:$20 sps:$4 sm:$0xff]  }
  0x9c   : > { %2525 = vmatprep.subr.bf16.mxu1 %v3702_v15  ;;  %v3787_v14 = vld [vmem:[%s4311_s12 + $0xc] ss:$20 sps:$4 sm:$0xff]  }
  0x9d   : > { %v3790_v15 = vld [vmem:[%s4311_s12 + $0x28c] ss:$20 sps:$4 sm:$0xff]  }
  0x9e   : > { %2485 = vmatpush1.bf16.msra.mxu0 %v3697_v16  ;;  %v4493_v16 = vcombine.low %v4434_v32, %v4434_v32  ;;  %v3811_v32 = vld [vmem:[%s4311_s12 + $0xac] ss:$20 sps:$4 sm:$0xff]  }
  0x9f   : > { %2526 = vmatpush1.bf16.msra.mxu1 %v3700_v17  ;;  %2486 = vmatprep.subr.bf16.mxu0 %v3705_v18  ;;  %v4497_v17 = vcombine.low %v4439_v33, %v4439_v33  ;;  %v3785_v18 = vld [vmem:[%s4311_s12 + $0x8] ss:$20 sps:$4 sm:$0xff]   ;;  %v3814_v33 = vld [vmem:[%s4311_s12 + $0x32c] ss:$20 sps:$4 sm:$0xff]  }
  0xa0   : > { %2527 = vmatprep.subr.bf16.mxu1 %v3708_v19  ;;  %v3788_v19 = vld [vmem:[%s4311_s12 + $0x288] ss:$20 sps:$4 sm:$0xff]  }
  0xa2   : > { %2487 = vmatpush1.bf16.msra.mxu0 %v3703_v20  ;;  %v3793_v20 = vld [vmem:[%s4311_s12 + $0x34] ss:$20 sps:$4 sm:$0xff]  }
  0xa3   : > { %2528 = vmatpush1.bf16.msra.mxu1 %v3706_v21  ;;  %2488 = vmatprep.subr.bf16.mxu0 %v3711_v22  ;;  %v3796_v21 = vld [vmem:[%s4311_s12 + $0x2b4] ss:$20 sps:$4 sm:$0xff]   ;;  %v3791_v22 = vld [vmem:[%s4311_s12 + $0x30] ss:$20 sps:$4 sm:$0xff]  }
  0xa4   : > { %2529 = vmatprep.subr.bf16.mxu1 %v3714_v23  ;;  %v3794_v23 = vld [vmem:[%s4311_s12 + $0x2b0] ss:$20 sps:$4 sm:$0xff]  }
  0xa6   : > { %2489 = vmatpush1.bf16.msra.mxu0 %v3709_v24  ;;  %v3799_v24 = vld [vmem:[%s4311_s12 + $0x5c] ss:$20 sps:$4 sm:$0xff]  }
  0xa7   : > { %2530 = vmatpush1.bf16.msra.mxu1 %v3712_v25  ;;  %2490 = vmatprep.subr.bf16.mxu0 %v3717_v26  ;;  %v3802_v25 = vld [vmem:[%s4311_s12 + $0x2dc] ss:$20 sps:$4 sm:$0xff]   ;;  %v3797_v26 = vld [vmem:[%s4311_s12 + $0x58] ss:$20 sps:$4 sm:$0xff]  }
  0xa8   : > { %2531 = vmatprep.subr.bf16.mxu1 %v3720_v27  ;;  %v3800_v27 = vld [vmem:[%s4311_s12 + $0x2d8] ss:$20 sps:$4 sm:$0xff]  }
  0xaa   : > { %2491 = vmatpush1.bf16.msra.mxu0 %v3715_v28  ;;  %v3805_v28 = vld [vmem:[%s4311_s12 + $0x84] ss:$20 sps:$4 sm:$0xff]  }
  0xab   : > { %2532 = vmatpush1.bf16.msra.mxu1 %v3718_v29  ;;  %2492 = vmatprep.subr.bf16.mxu0 %v3723_v30  ;;  %v3808_v29 = vld [vmem:[%s4311_s12 + $0x304] ss:$20 sps:$4 sm:$0xff]   ;;  %v3803_v30 = vld [vmem:[%s4311_s12 + $0x80] ss:$20 sps:$4 sm:$0xff]  }
  0xac   : > { %2533 = vmatprep.subr.bf16.mxu1 %v3726_v31  ;;  %v3806_v31 = vld [vmem:[%s4311_s12 + $0x300] ss:$20 sps:$4 sm:$0xff]  }
  0xae   : > { %2493 = vmatpush1.bf16.msra.mxu0 %v3721_v34  ;;  %v3809_v34 = vld [vmem:[%s4311_s12 + $0xa8] ss:$20 sps:$4 sm:$0xff]  }
  0xaf   : > { %2534 = vmatpush1.bf16.msra.mxu1 %v3724_v35  ;;  %2494 = vmatprep.subr.bf16.mxu0 %v3729_v38  ;;  %v3812_v35 = vld [vmem:[%s4311_s12 + $0x328] ss:$20 sps:$4 sm:$0xff]  }
  0xb0   : > { %2535 = vmatprep.subr.bf16.mxu1 %v3732_v39  ;;  %v3817_v38 = vld [vmem:[%s4311_s12 + $0xd4] ss:$20 sps:$4 sm:$0xff]  }
  0xb1   : > { %v3820_v39 = vld [vmem:[%s4311_s12 + $0x354] ss:$20 sps:$4 sm:$0xff]  }
  0xb2   : > { %2495 = vmatpush1.bf16.msra.mxu0 %v3727_v40  ;;  %v3815_v40 = vld [vmem:[%s4311_s12 + $0xd0] ss:$20 sps:$4 sm:$0xff]  }
  0xb3   : > { %2536 = vmatpush1.bf16.msra.mxu1 %v3730_v41  ;;  %2496 = vmatprep.subr.bf16.mxu0 %v3735_v42  ;;  %v3818_v41 = vld [vmem:[%s4311_s12 + $0x350] ss:$20 sps:$4 sm:$0xff]  }
  0xb4   : > { %2537 = vmatprep.subr.bf16.mxu1 %v3738_v43  ;;  %v3823_v42 = vld [vmem:[%s4311_s12 + $0xfc] ss:$20 sps:$4 sm:$0xff]  }
  0xb5   : > { %v3826_v43 = vld [vmem:[%s4311_s12 + $0x37c] ss:$20 sps:$4 sm:$0xff]  }
  0xb6   : > { %2497 = vmatpush1.bf16.msra.mxu0 %v3733_v44  ;;  %v3821_v44 = vld [vmem:[%s4311_s12 + $0xf8] ss:$20 sps:$4 sm:$0xff]  }
  0xb7   : > { %2538 = vmatpush1.bf16.msra.mxu1 %v3736_v45  ;;  %2498 = vmatprep.subr.bf16.mxu0 %v3741_v46  ;;  %v3824_v45 = vld [vmem:[%s4311_s12 + $0x378] ss:$20 sps:$4 sm:$0xff]  }
  0xb8   : > { %2539 = vmatprep.subr.bf16.mxu1 %v3744_v48  ;;  %v3829_v46 = vld [vmem:[%s4311_s12 + $0x124] ss:$20 sps:$4 sm:$0xff]  }
  0xb9   : > { %v3832_v48 = vld [vmem:[%s4311_s12 + $0x3a4] ss:$20 sps:$4 sm:$0xff]  }
  0xba   : > { %2499 = vmatpush1.bf16.msra.mxu0 %v3739_v49  ;;  %v3827_v49 = vld [vmem:[%s4311_s12 + $0x120] ss:$20 sps:$4 sm:$0xff]  }
  0xbb   : > { %2540 = vmatpush1.bf16.msra.mxu1 %v3742_v50  ;;  %2500 = vmatprep.subr.bf16.mxu0 %v3747_v52  ;;  %v3830_v50 = vld [vmem:[%s4311_s12 + $0x3a0] ss:$20 sps:$4 sm:$0xff]  }
  0xbc   : > { %2541 = vmatprep.subr.bf16.mxu1 %v3750_v53  ;;  %v3835_v52 = vld [vmem:[%s4311_s12 + $0x14c] ss:$20 sps:$4 sm:$0xff]  }
  0xbd   : > { %v3838_v53 = vld [vmem:[%s4311_s12 + $0x3cc] ss:$20 sps:$4 sm:$0xff]  }
  0xbe   : > { %2501 = vmatpush1.bf16.msra.mxu0 %v3745_v54  ;;  %v3833_v54 = vld [vmem:[%s4311_s12 + $0x148] ss:$20 sps:$4 sm:$0xff]  }
  0xbf   : > { %2542 = vmatpush1.bf16.msra.mxu1 %v3748_v55  ;;  %2502 = vmatprep.subr.bf16.mxu0 %v3753_v56  ;;  %v3836_v55 = vld [vmem:[%s4311_s12 + $0x3c8] ss:$20 sps:$4 sm:$0xff]  }
  0xc0   : > { %2543 = vmatprep.subr.bf16.mxu1 %v3756_v57  ;;  %v3841_v56 = vld [vmem:[%s4311_s12 + $0x174] ss:$20 sps:$4 sm:$0xff]  }
  0xc1   : > { %v3844_v57 = vld [vmem:[%s4311_s12 + $0x3f4] ss:$20 sps:$4 sm:$0xff]  }
  0xc2   : > { %2503 = vmatpush1.bf16.msra.mxu0 %v3751_v58  ;;  %v3839_v58 = vld [vmem:[%s4311_s12 + $0x170] ss:$20 sps:$4 sm:$0xff]  }
  0xc3   : > { %2544 = vmatpush1.bf16.msra.mxu1 %v3754_v59  ;;  %2504 = vmatprep.subr.bf16.mxu0 %v3759_v60  ;;  %v3842_v59 = vld [vmem:[%s4311_s12 + $0x3f0] ss:$20 sps:$4 sm:$0xff]  }
  0xc4   : > { %2545 = vmatprep.subr.bf16.mxu1 %v3762_v61  ;;  %v3847_v60 = vld [vmem:[%s4311_s12 + $0x19c] ss:$20 sps:$4 sm:$0xff]  }
  0xc5   : > { %v3850_v61 = vld [vmem:[%s4311_s12 + $0x41c] ss:$20 sps:$4 sm:$0xff]  }
  0xc6   : > { %2505 = vmatpush1.bf16.msra.mxu0 %v3757_v62  ;;  %v3845_v62 = vld [vmem:[%s4311_s12 + $0x198] ss:$20 sps:$4 sm:$0xff]  }
  0xc7   : > { %2546 = vmatpush1.bf16.msra.mxu1 %v3760_v63  ;;  %2506 = vmatprep.subr.bf16.mxu0 %v3765_v0  ;;  %v3848_v63 = vld [vmem:[%s4311_s12 + $0x418] ss:$20 sps:$4 sm:$0xff]  }
  0xc8   : > { %2547 = vmatprep.subr.bf16.mxu1 %v3768_v1  ;;  %v3853_v0 = vld [vmem:[%s4311_s12 + $0x1c4] ss:$20 sps:$4 sm:$0xff]  }
  0xc9   : > { %v3856_v1 = vld [vmem:[%s4311_s12 + $0x444] ss:$20 sps:$4 sm:$0xff]  }
  0xca   : > { %2507 = vmatpush1.bf16.msra.mxu0 %v3763_v2  ;;  %v3851_v2 = vld [vmem:[%s4311_s12 + $0x1c0] ss:$20 sps:$4 sm:$0xff]  }
  0xcb   : > { %2548 = vmatpush1.bf16.msra.mxu1 %v3766_v3  ;;  %2508 = vmatprep.subr.bf16.mxu0 %v3771_v4  ;;  %v3854_v3 = vld [vmem:[%s4311_s12 + $0x440] ss:$20 sps:$4 sm:$0xff]  }
  0xcc   : > { %2549 = vmatprep.subr.bf16.mxu1 %v3774_v5  ;;  %v3859_v4 = vld [vmem:[%s4311_s12 + $0x1ec] ss:$20 sps:$4 sm:$0xff]  }
  0xcd   : > { %v3862_v5 = vld [vmem:[%s4311_s12 + $0x46c] ss:$20 sps:$4 sm:$0xff]  }
  0xce   : > { %2509 = vmatpush1.bf16.msra.mxu0 %v3769_v8  ;;  %v3857_v8 = vld [vmem:[%s4311_s12 + $0x1e8] ss:$20 sps:$4 sm:$0xff]  }
  0xcf   : > { %2550 = vmatpush1.bf16.msra.mxu1 %v3772_v9  ;;  %2510 = vmatprep.subr.bf16.mxu0 %v3777_v10  ;;  %v3860_v9 = vld [vmem:[%s4311_s12 + $0x468] ss:$20 sps:$4 sm:$0xff]  }
  0xd0   : > { %2551 = vmatprep.subr.bf16.mxu1 %v3780_v11  ;;  %v3865_v10 = vld [vmem:[%s4311_s12 + $0x214] ss:$20 sps:$4 sm:$0xff]  }
  0xd1   : > { %v3868_v11 = vld [vmem:[%s4311_s12 + $0x494] ss:$20 sps:$4 sm:$0xff]  }
  0xd2   : > { %2511 = vmatpush1.bf16.msra.mxu0 %v3775_v12  ;;  %v3863_v12 = vld [vmem:[%s4311_s12 + $0x210] ss:$20 sps:$4 sm:$0xff]  }
  0xd3   : > { %2552 = vmatpush1.bf16.msra.mxu1 %v3778_v13  ;;  %2562 = vmatprep.subr.bf16.mxu0 %v3787_v14  ;;  %v3866_v13 = vld [vmem:[%s4311_s12 + $0x490] ss:$20 sps:$4 sm:$0xff]  }
  0xd4   : > { %2603 = vmatprep.subr.bf16.mxu1 %v3790_v15  ;;  %v3871_v14 = vld [vmem:[%s4311_s12 + $0x23c] ss:$20 sps:$4 sm:$0xff]  }
  0xd5   : > { %2513 = vmatmul.mubr.bf16.vlgmr.msra.gmra.mrb[4].mxu0 %v4493_v16  ;;  %v3874_v15 = vld [vmem:[%s4311_s12 + $0x4bc] ss:$20 sps:$4 sm:$0xff]  }
  0xd6   : > { %2554 = vmatmul.mubr.bf16.vlgmr.msra.gmra.mrb[4].mxu1 %v4497_v17  ;;  %2563 = vmatpush1.bf16.msra.mxu0 %v3785_v18  ;;  %v3869_v18 = vld [vmem:[%s4311_s12 + $0x238] ss:$20 sps:$4 sm:$0xff]  }
  0xd7   : > { %2604 = vmatpush1.bf16.msra.mxu1 %v3788_v19  ;;  %2564 = vmatprep.subr.bf16.mxu0 %v3793_v20  ;;  %v3872_v19 = vld [vmem:[%s4311_s12 + $0x4b8] ss:$20 sps:$4 sm:$0xff]  }
  0xd8   : > { %2605 = vmatprep.subr.bf16.mxu1 %v3796_v21  ;;  %2594 = vmatprep.mubr.bf16.mxu0 %v4372_v47  ;;  %v3877_v20 = vld [vmem:[%s4311_s12 + $0x264] ss:$20 sps:$4 sm:$0xff]  }
  0xd9   : > { %2635 = vmatprep.mubr.bf16.mxu1 %v4379_v51  ;;  %v3880_v21 = vld [vmem:[%s4311_s12 + $0x4e4] ss:$20 sps:$4 sm:$0xff]  }
  0xda   : > { %2565 = vmatpush1.bf16.msra.mxu0 %v3791_v22  ;;  %v3875_v22 = vld [vmem:[%s4311_s12 + $0x260] ss:$20 sps:$4 sm:$0xff]  }
  0xdb   : > { %2606 = vmatpush1.bf16.msra.mxu1 %v3794_v23  ;;  %2566 = vmatprep.subr.bf16.mxu0 %v3799_v24  ;;  %v3878_v23 = vld [vmem:[%s4311_s12 + $0x4e0] ss:$20 sps:$4 sm:$0xff]  }
  0xdc   : > { %2607 = vmatprep.subr.bf16.mxu1 %v3802_v25  ;;  %v3883_v24 = vld [vmem:[%s4311_s12 + $0x50c] ss:$20 sps:$4 sm:$0xff]  }
  0xdd   : > { %v3886_v25 = vld [vmem:[%s4311_s12 + $0x78c] ss:$20 sps:$4 sm:$0xff]  }
  0xde   : > { %2567 = vmatpush1.bf16.msra.mxu0 %v3797_v26  ;;  %v3881_v26 = vld [vmem:[%s4311_s12 + $0x508] ss:$20 sps:$4 sm:$0xff]  }
  0xdf   : > { %2608 = vmatpush1.bf16.msra.mxu1 %v3800_v27  ;;  %2568 = vmatprep.subr.bf16.mxu0 %v3805_v28  ;;  %v3884_v27 = vld [vmem:[%s4311_s12 + $0x788] ss:$20 sps:$4 sm:$0xff]  }
  0xe0   : > { %2609 = vmatprep.subr.bf16.mxu1 %v3808_v29  ;;  %v3889_v28 = vld [vmem:[%s4311_s12 + $0x534] ss:$20 sps:$4 sm:$0xff]  }
  0xe1   : > { %v3892_v29 = vld [vmem:[%s4311_s12 + $0x7b4] ss:$20 sps:$4 sm:$0xff]  }
  0xe2   : > { %2569 = vmatpush1.bf16.msra.mxu0 %v3803_v30  ;;  %v3887_v30 = vld [vmem:[%s4311_s12 + $0x530] ss:$20 sps:$4 sm:$0xff]  }
  0xe3   : > { %2610 = vmatpush1.bf16.msra.mxu1 %v3806_v31  ;;  %2570 = vmatprep.subr.bf16.mxu0 %v3811_v32  ;;  %v3890_v31 = vld [vmem:[%s4311_s12 + $0x7b0] ss:$20 sps:$4 sm:$0xff]  }
  0xe4   : > { %2611 = vmatprep.subr.bf16.mxu1 %v3814_v33  ;;  %v3895_v32 = vld [vmem:[%s4311_s12 + $0x55c] ss:$20 sps:$4 sm:$0xff]  }
  0xe5   : > { %v3898_v33 = vld [vmem:[%s4311_s12 + $0x7dc] ss:$20 sps:$4 sm:$0xff]  }
  0xe6   : > { %2571 = vmatpush1.bf16.msra.mxu0 %v3809_v34  ;;  %v3893_v34 = vld [vmem:[%s4311_s12 + $0x558] ss:$20 sps:$4 sm:$0xff]  }
  0xe7   : > { %2612 = vmatpush1.bf16.msra.mxu1 %v3812_v35  ;;  %2572 = vmatprep.subr.bf16.mxu0 %v3817_v38  ;;  %v3896_v35 = vld [vmem:[%s4311_s12 + $0x7d8] ss:$20 sps:$4 sm:$0xff]  }
  0xe8   : > { %2613 = vmatprep.subr.bf16.mxu1 %v3820_v39  ;;  %v3901_v38 = vld [vmem:[%s4311_s12 + $0x584] ss:$20 sps:$4 sm:$0xff]  }
  0xe9   : > { %v3904_v39 = vld [vmem:[%s4311_s12 + $0x804] ss:$20 sps:$4 sm:$0xff]  }
  0xea   : > { %2573 = vmatpush1.bf16.msra.mxu0 %v3815_v40  ;;  %v3899_v40 = vld [vmem:[%s4311_s12 + $0x580] ss:$20 sps:$4 sm:$0xff]  }
  0xeb   : > { %2614 = vmatpush1.bf16.msra.mxu1 %v3818_v41  ;;  %2574 = vmatprep.subr.bf16.mxu0 %v3823_v42  ;;  %v3902_v41 = vld [vmem:[%s4311_s12 + $0x800] ss:$20 sps:$4 sm:$0xff]  }
  0xec   : > { %2615 = vmatprep.subr.bf16.mxu1 %v3826_v43  ;;  %v3907_v42 = vld [vmem:[%s4311_s12 + $0x5ac] ss:$20 sps:$4 sm:$0xff]  }
  0xed   : > { %v3910_v43 = vld [vmem:[%s4311_s12 + $0x82c] ss:$20 sps:$4 sm:$0xff]  }
  0xee   : > { %2575 = vmatpush1.bf16.msra.mxu0 %v3821_v44  ;;  %v3905_v44 = vld [vmem:[%s4311_s12 + $0x5a8] ss:$20 sps:$4 sm:$0xff]  }
  0xef   : > { %2616 = vmatpush1.bf16.msra.mxu1 %v3824_v45  ;;  %2576 = vmatprep.subr.bf16.mxu0 %v3829_v46  ;;  %v3908_v45 = vld [vmem:[%s4311_s12 + $0x828] ss:$20 sps:$4 sm:$0xff]  }
  0xf0   : > { %2617 = vmatprep.subr.bf16.mxu1 %v3832_v48  ;;  %v3913_v46 = vld [vmem:[%s4311_s12 + $0x5d4] ss:$20 sps:$4 sm:$0xff]  }
  0xf1   : > { %v3916_v48 = vld [vmem:[%s4311_s12 + $0x854] ss:$20 sps:$4 sm:$0xff]  }
  0xf2   : > { %2577 = vmatpush1.bf16.msra.mxu0 %v3827_v49  ;;  %v3911_v49 = vld [vmem:[%s4311_s12 + $0x5d0] ss:$20 sps:$4 sm:$0xff]  }
  0xf3   : > { %2618 = vmatpush1.bf16.msra.mxu1 %v3830_v50  ;;  %2578 = vmatprep.subr.bf16.mxu0 %v3835_v52  ;;  %v3914_v50 = vld [vmem:[%s4311_s12 + $0x850] ss:$20 sps:$4 sm:$0xff]  }
  0xf4   : > { %2619 = vmatprep.subr.bf16.mxu1 %v3838_v53  ;;  %v3919_v52 = vld [vmem:[%s4311_s12 + $0x5fc] ss:$20 sps:$4 sm:$0xff]  }
  0xf5   : > { %v3922_v53 = vld [vmem:[%s4311_s12 + $0x87c] ss:$20 sps:$4 sm:$0xff]  }
  0xf6   : > { %2579 = vmatpush1.bf16.msra.mxu0 %v3833_v54  ;;  %v3917_v54 = vld [vmem:[%s4311_s12 + $0x5f8] ss:$20 sps:$4 sm:$0xff]  }
  0xf7   : > { %2620 = vmatpush1.bf16.msra.mxu1 %v3836_v55  ;;  %2580 = vmatprep.subr.bf16.mxu0 %v3841_v56  ;;  %v3920_v55 = vld [vmem:[%s4311_s12 + $0x878] ss:$20 sps:$4 sm:$0xff]  }
  0xf8   : > { %2621 = vmatprep.subr.bf16.mxu1 %v3844_v57  ;;  %v3925_v56 = vld [vmem:[%s4311_s12 + $0x624] ss:$20 sps:$4 sm:$0xff]  }
  0xf9   : > { %v3928_v57 = vld [vmem:[%s4311_s12 + $0x8a4] ss:$20 sps:$4 sm:$0xff]  }
  0xfa   : > { %2581 = vmatpush1.bf16.msra.mxu0 %v3839_v58  ;;  %v3923_v58 = vld [vmem:[%s4311_s12 + $0x620] ss:$20 sps:$4 sm:$0xff]  }
  0xfb   : > { %2622 = vmatpush1.bf16.msra.mxu1 %v3842_v59  ;;  %2582 = vmatprep.subr.bf16.mxu0 %v3847_v60  ;;  %v3926_v59 = vld [vmem:[%s4311_s12 + $0x8a0] ss:$20 sps:$4 sm:$0xff]  }
  0xfc   : > { %2623 = vmatprep.subr.bf16.mxu1 %v3850_v61  ;;  %v3931_v60 = vld [vmem:[%s4311_s12 + $0x64c] ss:$20 sps:$4 sm:$0xff]  }
  0xfd   : > { %v3934_v61 = vld [vmem:[%s4311_s12 + $0x8cc] ss:$20 sps:$4 sm:$0xff]  }
  0xfe   : > { %2583 = vmatpush1.bf16.msra.mxu0 %v3845_v62  ;;  %v3929_v62 = vld [vmem:[%s4311_s12 + $0x648] ss:$20 sps:$4 sm:$0xff]  }
  0xff   : > { %2624 = vmatpush1.bf16.msra.mxu1 %v3848_v63  ;;  %2584 = vmatprep.subr.bf16.mxu0 %v3853_v0  ;;  %v3932_v63 = vld [vmem:[%s4311_s12 + $0x8c8] ss:$20 sps:$4 sm:$0xff]  }
 0x100   : > { %2625 = vmatprep.subr.bf16.mxu1 %v3856_v1  ;;  %v3937_v0 = vld [vmem:[%s4311_s12 + $0x674] ss:$20 sps:$4 sm:$0xff]  }
 0x101   : > { %v3940_v1 = vld [vmem:[%s4311_s12 + $0x8f4] ss:$20 sps:$4 sm:$0xff]  }
 0x102   : > { %2585 = vmatpush1.bf16.msra.mxu0 %v3851_v2  ;;  %v3935_v2 = vld [vmem:[%s4311_s12 + $0x670] ss:$20 sps:$4 sm:$0xff]  }
 0x103   : > { %2626 = vmatpush1.bf16.msra.mxu1 %v3854_v3  ;;  %2586 = vmatprep.subr.bf16.mxu0 %v3859_v4  ;;  %v3938_v3 = vld [vmem:[%s4311_s12 + $0x8f0] ss:$20 sps:$4 sm:$0xff]  }
 0x104   : > { %2627 = vmatprep.subr.bf16.mxu1 %v3862_v5  ;;  %v3943_v4 = vld [vmem:[%s4311_s12 + $0x69c] ss:$20 sps:$4 sm:$0xff]  }
 0x105   : > { %v3946_v5 = vld [vmem:[%s4311_s12 + $0x91c] ss:$20 sps:$4 sm:$0xff]  }
 0x106   : > { %2587 = vmatpush1.bf16.msra.mxu0 %v3857_v8  ;;  %v3941_v8 = vld [vmem:[%s4311_s12 + $0x698] ss:$20 sps:$4 sm:$0xff]  }
 0x107   : > { %2628 = vmatpush1.bf16.msra.mxu1 %v3860_v9  ;;  %2588 = vmatprep.subr.bf16.mxu0 %v3865_v10  ;;  %v3944_v9 = vld [vmem:[%s4311_s12 + $0x918] ss:$20 sps:$4 sm:$0xff]  }
 0x108   : > { %2629 = vmatprep.subr.bf16.mxu1 %v3868_v11  ;;  %v3949_v10 = vld [vmem:[%s4311_s12 + $0x6c4] ss:$20 sps:$4 sm:$0xff]  }
 0x109   : > { %v3952_v11 = vld [vmem:[%s4311_s12 + $0x944] ss:$20 sps:$4 sm:$0xff]  }
 0x10a   : > { %2589 = vmatpush1.bf16.msra.mxu0 %v3863_v12  ;;  %v3947_v12 = vld [vmem:[%s4311_s12 + $0x6c0] ss:$20 sps:$4 sm:$0xff]  }
 0x10b   : > { %2630 = vmatpush1.bf16.msra.mxu1 %v3866_v13  ;;  %2590 = vmatprep.subr.bf16.mxu0 %v3871_v14  ;;  %v3950_v13 = vld [vmem:[%s4311_s12 + $0x940] ss:$20 sps:$4 sm:$0xff]  }
 0x10c   : > { %2631 = vmatprep.subr.bf16.mxu1 %v3874_v15  ;;  %v3955_v14 = vld [vmem:[%s4311_s12 + $0x6ec] ss:$20 sps:$4 sm:$0xff]  }
 0x10d   : > { %v3958_v15 = vld [vmem:[%s4311_s12 + $0x96c] ss:$20 sps:$4 sm:$0xff]  }
 0x10e   : > { %2591 = vmatpush1.bf16.msra.mxu0 %v3869_v18  ;;  %v3953_v18 = vld [vmem:[%s4311_s12 + $0x6e8] ss:$20 sps:$4 sm:$0xff]  }
 0x10f   : > { %2632 = vmatpush1.bf16.msra.mxu1 %v3872_v19  ;;  %2592 = vmatprep.subr.bf16.mxu0 %v3877_v20  ;;  %v3956_v19 = vld [vmem:[%s4311_s12 + $0x968] ss:$20 sps:$4 sm:$0xff]  }
 0x110   : > { %2633 = vmatprep.subr.bf16.mxu1 %v3880_v21  ;;  %v3961_v20 = vld [vmem:[%s4311_s12 + $0x714] ss:$20 sps:$4 sm:$0xff]  }
 0x111   : > { %v3964_v21 = vld [vmem:[%s4311_s12 + $0x994] ss:$20 sps:$4 sm:$0xff]  }
 0x112   : > { %2593 = vmatpush1.bf16.msra.mxu0 %v3875_v22  ;;  %v3959_v22 = vld [vmem:[%s4311_s12 + $0x710] ss:$20 sps:$4 sm:$0xff]  }
 0x113   : > { %2634 = vmatpush1.bf16.msra.mxu1 %v3878_v23  ;;  %2644 = vmatprep.subr.bf16.mxu0 %v3883_v24  ;;  %v3962_v23 = vld [vmem:[%s4311_s12 + $0x990] ss:$20 sps:$4 sm:$0xff]  }
 0x114   : > { %2685 = vmatprep.subr.bf16.mxu1 %v3886_v25  ;;  %v3967_v24 = vld [vmem:[%s4311_s12 + $0x73c] ss:$20 sps:$4 sm:$0xff]  }
 0x115   : > { %2595 = vmatmul.mubr.bf16.vlgmr.msra.gmra.mrb[8].mxu0 %v4401_v6  ;;  %v3970_v25 = vld [vmem:[%s4311_s12 + $0x9bc] ss:$20 sps:$4 sm:$0xff]  }
 0x116   : > { %2636 = vmatmul.mubr.bf16.vlgmr.msra.gmra.mrb[8].mxu1 %v4403_v7  ;;  %2645 = vmatpush1.bf16.msra.mxu0 %v3881_v26  ;;  %v3965_v26 = vld [vmem:[%s4311_s12 + $0x738] ss:$20 sps:$4 sm:$0xff]  }
 0x117   : > { %2686 = vmatpush1.bf16.msra.mxu1 %v3884_v27  ;;  %2646 = vmatprep.subr.bf16.mxu0 %v3889_v28  ;;  %v3968_v27 = vld [vmem:[%s4311_s12 + $0x9b8] ss:$20 sps:$4 sm:$0xff]  }
 0x118   : > { %2687 = vmatprep.subr.bf16.mxu1 %v3892_v29  ;;  %2676 = vmatprep.mubr.bf16.mxu0 %v4445_v36  ;;  %v3973_v28 = vld [vmem:[%s4311_s12 + $0x764] ss:$20 sps:$4 sm:$0xff]  }
 0x119   : > { %2717 = vmatprep.mubr.bf16.mxu1 %v4449_v37  ;;  %v3976_v29 = vld [vmem:[%s4311_s12 + $0x9e4] ss:$20 sps:$4 sm:$0xff]  }
 0x11a   : > { %2647 = vmatpush1.bf16.msra.mxu0 %v3887_v30  ;;  %v3971_v30 = vld [vmem:[%s4311_s12 + $0x760] ss:$20 sps:$4 sm:$0xff]  }
 0x11b   : > { %2688 = vmatpush1.bf16.msra.mxu1 %v3890_v31  ;;  %2648 = vmatprep.subr.bf16.mxu0 %v3895_v32  ;;  %v3974_v31 = vld [vmem:[%s4311_s12 + $0x9e0] ss:$20 sps:$4 sm:$0xff]   ;;  %v3977_v32 = vld [vmem:[%s4311_s12 + $0x150] ss:$20 sps:$4 sm:$0xff]  }
 0x11c   : > { %2689 = vmatprep.subr.bf16.mxu1 %v3898_v33  ;;  %v3978_v33 = vld [vmem:[%s4311_s12 + $0x3d0] ss:$20 sps:$4 sm:$0xff]  }
 0x11e   : > { %2649 = vmatpush1.bf16.msra.mxu0 %v3893_v34  ;;  %v3979_v34 = vld [vmem:[%s4311_s12 + $0x10] ss:$20 sps:$4 sm:$0xff]  }
 0x11f   : > { %2690 = vmatpush1.bf16.msra.mxu1 %v3896_v35  ;;  %2650 = vmatprep.subr.bf16.mxu0 %v3901_v38  ;;  %v3980_v35 = vld [vmem:[%s4311_s12 + $0x290] ss:$20 sps:$4 sm:$0xff]   ;;  %v3981_v38 = vld [vmem:[%s4311_s12 + $0x178] ss:$20 sps:$4 sm:$0xff]  }
 0x120   : > { %2691 = vmatprep.subr.bf16.mxu1 %v3904_v39  ;;  %v3982_v39 = vld [vmem:[%s4311_s12 + $0x3f8] ss:$20 sps:$4 sm:$0xff]  }
 0x122   : > { %2651 = vmatpush1.bf16.msra.mxu0 %v3899_v40  ;;  %v3983_v40 = vld [vmem:[%s4311_s12 + $0x38] ss:$20 sps:$4 sm:$0xff]  }
 0x123   : > { %2692 = vmatpush1.bf16.msra.mxu1 %v3902_v41  ;;  %2652 = vmatprep.subr.bf16.mxu0 %v3907_v42  ;;  %v3984_v41 = vld [vmem:[%s4311_s12 + $0x2b8] ss:$20 sps:$4 sm:$0xff]   ;;  %v3985_v42 = vld [vmem:[%s4311_s12 + $0x1a0] ss:$20 sps:$4 sm:$0xff]  }
 0x124   : > { %2693 = vmatprep.subr.bf16.mxu1 %v3910_v43  ;;  %v3986_v43 = vld [vmem:[%s4311_s12 + $0x420] ss:$20 sps:$4 sm:$0xff]  }
 0x126   : > { %2653 = vmatpush1.bf16.msra.mxu0 %v3905_v44  ;;  %v3987_v44 = vld [vmem:[%s4311_s12 + $0x60] ss:$20 sps:$4 sm:$0xff]  }
 0x127   : > { %2694 = vmatpush1.bf16.msra.mxu1 %v3908_v45  ;;  %2654 = vmatprep.subr.bf16.mxu0 %v3913_v46  ;;  %v3988_v45 = vld [vmem:[%s4311_s12 + $0x2e0] ss:$20 sps:$4 sm:$0xff]   ;;  %v3989_v46 = vld [vmem:[%s4311_s12 + $0x1c8] ss:$20 sps:$4 sm:$0xff]  }
 0x128   : > { %2695 = vmatprep.subr.bf16.mxu1 %v3916_v48  ;;  %v3990_v48 = vld [vmem:[%s4311_s12 + $0x448] ss:$20 sps:$4 sm:$0xff]  }
 0x12a   : > { %2655 = vmatpush1.bf16.msra.mxu0 %v3911_v49  ;;  %v3991_v49 = vld [vmem:[%s4311_s12 + $0x88] ss:$20 sps:$4 sm:$0xff]  }
 0x12b   : > { %2696 = vmatpush1.bf16.msra.mxu1 %v3914_v50  ;;  %2656 = vmatprep.subr.bf16.mxu0 %v3919_v52  ;;  %v3994_v50 = vld [vmem:[%s4311_s12 + $0x470] ss:$20 sps:$4 sm:$0xff]  }
 0x12c   : > { %2697 = vmatprep.subr.bf16.mxu1 %v3922_v53  ;;  %v3995_v52 = vld [vmem:[%s4311_s12 + $0xb0] ss:$20 sps:$4 sm:$0xff]  }
 0x12d   : > { %v3996_v53 = vld [vmem:[%s4311_s12 + $0x330] ss:$20 sps:$4 sm:$0xff]  }
 0x12e   : > { %2657 = vmatpush1.bf16.msra.mxu0 %v3917_v54  ;;  %v3997_v54 = vld [vmem:[%s4311_s12 + $0x218] ss:$20 sps:$4 sm:$0xff]  }
 0x12f   : > { %2698 = vmatpush1.bf16.msra.mxu1 %v3920_v55  ;;  %2658 = vmatprep.subr.bf16.mxu0 %v3925_v56  ;;  %v3998_v55 = vld [vmem:[%s4311_s12 + $0x498] ss:$20 sps:$4 sm:$0xff]  }
 0x130   : > { %2699 = vmatprep.subr.bf16.mxu1 %v3928_v57  ;;  %v3999_v56 = vld [vmem:[%s4311_s12 + $0xd8] ss:$20 sps:$4 sm:$0xff]  }
 0x131   : > { %v4000_v57 = vld [vmem:[%s4311_s12 + $0x358] ss:$20 sps:$4 sm:$0xff]  }
 0x132   : > { %2659 = vmatpush1.bf16.msra.mxu0 %v3923_v58  ;;  %v4001_v58 = vld [vmem:[%s4311_s12 + $0x240] ss:$20 sps:$4 sm:$0xff]  }
 0x133   : > { %2700 = vmatpush1.bf16.msra.mxu1 %v3926_v59  ;;  %2660 = vmatprep.subr.bf16.mxu0 %v3931_v60  ;;  %v4002_v59 = vld [vmem:[%s4311_s12 + $0x4c0] ss:$20 sps:$4 sm:$0xff]  }
 0x134   : > { %2701 = vmatprep.subr.bf16.mxu1 %v3934_v61 }
 0x136   : > { %2661 = vmatpush1.bf16.msra.mxu0 %v3929_v62 }
 0x137   : > { %2702 = vmatpush1.bf16.msra.mxu1 %v3932_v63  ;;  %2662 = vmatprep.subr.bf16.mxu0 %v3937_v0 }
 0x138   : > { %2703 = vmatprep.subr.bf16.mxu1 %v3940_v1 }
 0x13a   : > { %2663 = vmatpush1.bf16.msra.mxu0 %v3935_v2 }
 0x13b   : > { %2704 = vmatpush1.bf16.msra.mxu1 %v3938_v3  ;;  %2664 = vmatprep.subr.bf16.mxu0 %v3943_v4  ;;  %v4003_v4 = vld [vmem:[%s4311_s12 + $0x100] ss:$20 sps:$4 sm:$0xff]  }
 0x13c   : > { %2705 = vmatprep.subr.bf16.mxu1 %v3946_v5  ;;  %v4004_v5 = vld [vmem:[%s4311_s12 + $0x380] ss:$20 sps:$4 sm:$0xff]  }
 0x13e   : > { %2665 = vmatpush1.bf16.msra.mxu0 %v3941_v8 }
 0x13f   : > { %2706 = vmatpush1.bf16.msra.mxu1 %v3944_v9  ;;  %2666 = vmatprep.subr.bf16.mxu0 %v3949_v10  ;;  %v4005_v10 = vld [vmem:[%s4311_s12 + $0x268] ss:$20 sps:$4 sm:$0xff]  }
 0x140   : > { %2707 = vmatprep.subr.bf16.mxu1 %v3952_v11  ;;  %v4006_v11 = vld [vmem:[%s4311_s12 + $0x4e8] ss:$20 sps:$4 sm:$0xff]  }
 0x142   : > { %2667 = vmatpush1.bf16.msra.mxu0 %v3947_v12  ;;  %v4007_v12 = vld [vmem:[%s4311_s12 + $0x128] ss:$20 sps:$4 sm:$0xff]  }
 0x143   : > { %2708 = vmatpush1.bf16.msra.mxu1 %v3950_v13  ;;  %2668 = vmatprep.subr.bf16.mxu0 %v3955_v14  ;;  %v4008_v13 = vld [vmem:[%s4311_s12 + $0x3a8] ss:$20 sps:$4 sm:$0xff]   ;;  %v4009_v14 = vld [vmem:[%s4311_s12 + $0x650] ss:$20 sps:$4 sm:$0xff]  }
 0x144   : > { %2709 = vmatprep.subr.bf16.mxu1 %v3958_v15  ;;  %v4010_v15 = vld [vmem:[%s4311_s12 + $0x8d0] ss:$20 sps:$4 sm:$0xff]  }
 0x146   : > { %2669 = vmatpush1.bf16.msra.mxu0 %v3953_v18  ;;  %v4011_v18 = vld [vmem:[%s4311_s12 + $0x510] ss:$20 sps:$4 sm:$0xff]  }
 0x147   : > { %2710 = vmatpush1.bf16.msra.mxu1 %v3956_v19  ;;  %2670 = vmatprep.subr.bf16.mxu0 %v3961_v20  ;;  %v4012_v19 = vld [vmem:[%s4311_s12 + $0x790] ss:$20 sps:$4 sm:$0xff]   ;;  %v4013_v20 = vld [vmem:[%s4311_s12 + $0x678] ss:$20 sps:$4 sm:$0xff]  }
 0x148   : > { %2711 = vmatprep.subr.bf16.mxu1 %v3964_v21  ;;  %v4014_v21 = vld [vmem:[%s4311_s12 + $0x8f8] ss:$20 sps:$4 sm:$0xff]  }
 0x14a   : > { %2671 = vmatpush1.bf16.msra.mxu0 %v3959_v22  ;;  %v4015_v22 = vld [vmem:[%s4311_s12 + $0x538] ss:$20 sps:$4 sm:$0xff]  }
 0x14b   : > { %2712 = vmatpush1.bf16.msra.mxu1 %v3962_v23  ;;  %2672 = vmatprep.subr.bf16.mxu0 %v3967_v24  ;;  %v4016_v23 = vld [vmem:[%s4311_s12 + $0x7b8] ss:$20 sps:$4 sm:$0xff]   ;;  %v4017_v24 = vld [vmem:[%s4311_s12 + $0x6a0] ss:$20 sps:$4 sm:$0xff]  }
 0x14c   : > { %2713 = vmatprep.subr.bf16.mxu1 %v3970_v25  ;;  %v4018_v25 = vld [vmem:[%s4311_s12 + $0x920] ss:$20 sps:$4 sm:$0xff]  }
 0x14e   : > { %2673 = vmatpush1.bf16.msra.mxu0 %v3965_v26  ;;  %v4021_v26 = vld [vmem:[%s4311_s12 + $0x6c8] ss:$20 sps:$4 sm:$0xff]  }
 0x14f   : > { %2714 = vmatpush1.bf16.msra.mxu1 %v3968_v27  ;;  %2674 = vmatprep.subr.bf16.mxu0 %v3973_v28  ;;  %v4022_v27 = vld [vmem:[%s4311_s12 + $0x948] ss:$20 sps:$4 sm:$0xff]  }
 0x150   : > { %2715 = vmatprep.subr.bf16.mxu1 %v3976_v29  ;;  %v4023_v28 = vld [vmem:[%s4311_s12 + $0x588] ss:$20 sps:$4 sm:$0xff]   ;;  %v4026_v29 = vld [vmem:[%s4311_s12 + $0x970] ss:$20 sps:$4 sm:$0xff]  }
 0x152   : > { %2675 = vmatpush1.bf16.msra.mxu0 %v3971_v30  ;;  %v4027_v30 = vld [vmem:[%s4311_s12 + $0x5b0] ss:$20 sps:$4 sm:$0xff]  }
 0x153   : > { %2716 = vmatpush1.bf16.msra.mxu1 %v3974_v31  ;;  %3429 = vmatprep.subr.bf16.mxu0 %v3977_v32  ;;  %v4028_v31 = vld [vmem:[%s4311_s12 + $0x830] ss:$20 sps:$4 sm:$0xff]   ;;  %v4029_v32 = vld [vmem:[%s4311_s12 + $0x718] ss:$20 sps:$4 sm:$0xff]  }
 0x154   : > { %3451 = vmatprep.subr.bf16.mxu1 %v3978_v33  ;;  %v4030_v33 = vld [vmem:[%s4311_s12 + $0x998] ss:$20 sps:$4 sm:$0xff]  }
 0x155   : > { %2677 = vmatmul.mubr.bf16.vlgmr.msra.gmra.mrb[12].mxu0 %v4493_v16 }
 0x156   : > { %2718 = vmatmul.mubr.bf16.vlgmr.msra.gmra.mrb[12].mxu1 %v4497_v17  ;;  %3430 = vmatpush3.bf16.msra.mxu0 %v3979_v34  ;;  %v4031_v34 = vld [vmem:[%s4311_s12 + $0x5d8] ss:$20 sps:$4 sm:$0xff]  }
 0x157   : > { %3452 = vmatpush3.bf16.msra.mxu1 %v3980_v35  ;;  %3431 = vmatprep.subr.bf16.mxu0 %v3981_v38  ;;  %v4032_v35 = vld [vmem:[%s4311_s12 + $0x858] ss:$20 sps:$4 sm:$0xff]   ;;  %v4033_v38 = vld [vmem:[%s4311_s12 + $0x740] ss:$20 sps:$4 sm:$0xff]  }
 0x158   : > { %3453 = vmatprep.subr.bf16.mxu1 %v3982_v39  ;;  %2758 = vmatprep.mubr.bf16.mxu0 %v4372_v47  ;;  %v3992_v47 = vld [vmem:[%s4311_s12 + $0x308] ss:$20 sps:$4 sm:$0xff]   ;;  %v4034_v39 = vld [vmem:[%s4311_s12 + $0x9c0] ss:$20 sps:$4 sm:$0xff]  }
 0x159   : > { %2798 = vmatprep.mubr.bf16.mxu1 %v4379_v51  ;;  %v3993_v51 = vld [vmem:[%s4311_s12 + $0x1f0] ss:$20 sps:$4 sm:$0xff]  }
 0x15a   : > { %3432 = vmatpush3.bf16.msra.mxu0 %v3983_v40  ;;  %v4035_v40 = vld [vmem:[%s4311_s12 + $0x600] ss:$20 sps:$4 sm:$0xff]  }
 0x15b   : > { %3454 = vmatpush3.bf16.msra.mxu1 %v3984_v41  ;;  %3433 = vmatprep.subr.bf16.mxu0 %v3985_v42  ;;  %v4036_v41 = vld [vmem:[%s4311_s12 + $0x880] ss:$20 sps:$4 sm:$0xff]   ;;  %v4037_v42 = vld [vmem:[%s4311_s12 + $0x768] ss:$20 sps:$4 sm:$0xff]  }
 0x15c   : > { %3455 = vmatprep.subr.bf16.mxu1 %v3986_v43  ;;  %v4038_v43 = vld [vmem:[%s4311_s12 + $0x9e8] ss:$20 sps:$4 sm:$0xff]  }
 0x15e   : > { %3434 = vmatpush3.bf16.msra.mxu0 %v3987_v44  ;;  %v4039_v44 = vld [vmem:[%s4311_s12 + $0x628] ss:$20 sps:$4 sm:$0xff]  }
 0x15f   : > { %3456 = vmatpush3.bf16.msra.mxu1 %v3988_v45  ;;  %3435 = vmatprep.subr.bf16.mxu0 %v3989_v46  ;;  %v4040_v45 = vld [vmem:[%s4311_s12 + $0x8a8] ss:$20 sps:$4 sm:$0xff]   ;;  %v2906_v46 = vlaneseq }
 0x160   : > { %3457 = vmatprep.subr.bf16.mxu1 %v3990_v48 }
 0x161   : > { %v4712_v48 = vshrl.u32 %v2906_v46, 7 }
 0x162   : > { %3436 = vmatpush3.bf16.msra.mxu0 %v3991_v49 }
 0x163   : > { %3458 = vmatpush3.bf16.msra.mxu1 %v3992_v47  ;;  %3437 = vmatprep.subr.bf16.mxu0 %v3993_v51  ;;  %v2908_v49 = vsub.s32 0, %v4712_v48 }
 0x164   : > { %3459 = vmatprep.subr.bf16.mxu1 %v3994_v50  ;;  %v4716_v50 = vld [vmem:[%s4317_s6] sm:$0x1f] }
 0x166   : > { %3438 = vmatpush3.bf16.msra.mxu0 %v3995_v52  ;;  %v2912_v52 = vsub.s32 1, %v4712_v48 }
 0x167   : > { %3460 = vmatpush3.bf16.msra.mxu1 %v3996_v53  ;;  %3439 = vmatprep.subr.bf16.mxu0 %v3997_v54 }
 0x168   : > { %3461 = vmatprep.subr.bf16.mxu1 %v3998_v55  ;;  %v2432_v60 = vpop.f32.mrb[0].mxu0 }
 0x169   : > { %v2473_v61 = vpop.f32.mrb[0].mxu1  ;;  %v2434_v63 = vpop.f32.mrb[1].mxu0 }
 0x16a   : > { %v4663_v62 = vadd.f32 %v2473_v61, %v2432_v60  ;;  %v2475_v0 = vpop.f32.mrb[1].mxu1  ;;  %v2436_v2 = vpop.f32.mrb[2].mxu0  ;;  %3440 = vmatpush3.bf16.msra.mxu0 %v3999_v56 }
 0x16b   : > { %v4665_v1 = vadd.f32 %v2475_v0, %v2434_v63  ;;  %v2477_v3 = vpop.f32.mrb[2].mxu1  ;;  %3462 = vmatpush3.bf16.msra.mxu1 %v4000_v57  ;;  %v2437_v8 = vpop.f32.mrb[3].mxu0  ;;  %3441 = vmatprep.subr.bf16.mxu0 %v4001_v58  ;;  %v2909_v58 = vrot.slane %v4716_v50, %v2908_v49  ;;  %v2913_v63 = vrot.slane %v4716_v50, %v2912_v52 }
 0x16c   : > { %v2478_v9 = vpop.f32.mrb[3].mxu1  ;;  %3463 = vmatprep.subr.bf16.mxu1 %v4002_v59 }
 0x16e   : > { %3442 = vmatpush3.bf16.msra.mxu0 %v4003_v4 }
 0x16f   : > { %3464 = vmatpush3.bf16.msra.mxu1 %v4004_v5  ;;  %3443 = vmatprep.subr.bf16.mxu0 %v4005_v10 }
 0x170   : > { %3465 = vmatprep.subr.bf16.mxu1 %v4006_v11 }
 0x172   : > { %3444 = vmatpush3.bf16.msra.mxu0 %v4007_v12 }
 0x173   : > { %3466 = vmatpush3.bf16.msra.mxu1 %v4008_v13  ;;  %3473 = vmatprep.subr.bf16.mxu0 %v4009_v14 }
 0x174   : > { %3495 = vmatprep.subr.bf16.mxu1 %v4010_v15  ;;  %v2916_v15 = vsub.s32 2, %v4712_v48 }
 0x175   : > { %2759 = vmatmul.mubr.bf16.vlgmr.msra.gmra.mrb[16].mxu0 %v4401_v6  ;;  %v4019_v6 = vld [vmem:[%s4311_s12 + $0x560] ss:$20 sps:$4 sm:$0xff]  }
 0x176   : > { %2799 = vmatmul.mubr.bf16.vlgmr.msra.gmra.mrb[16].mxu1 %v4403_v7  ;;  %3474 = vmatpush3.bf16.msra.mxu0 %v4011_v18  ;;  %v4020_v7 = vld [vmem:[%s4311_s12 + $0x7e0] ss:$20 sps:$4 sm:$0xff]  }
 0x177   : > { %3496 = vmatpush3.bf16.msra.mxu1 %v4012_v19  ;;  %3475 = vmatprep.subr.bf16.mxu0 %v4013_v20  ;;  %v2920_v20 = vsub.s32 3, %v4712_v48 }
 0x178   : > { %3497 = vmatprep.subr.bf16.mxu1 %v4014_v21  ;;  %2838 = vmatprep.mubr.bf16.mxu0 %v4445_v36  ;;  %v4024_v36 = vld [vmem:[%s4311_s12 + $0x808] ss:$20 sps:$4 sm:$0xff]  }
 0x179   : > { %2878 = vmatprep.mubr.bf16.mxu1 %v4449_v37  ;;  %v4025_v37 = vld [vmem:[%s4311_s12 + $0x6f0] ss:$20 sps:$4 sm:$0xff]  }
 0x17a   : > { %3476 = vmatpush3.bf16.msra.mxu0 %v4015_v22 }
 0x17b   : > { %3498 = vmatpush3.bf16.msra.mxu1 %v4016_v23  ;;  %3477 = vmatprep.subr.bf16.mxu0 %v4017_v24 }
 0x17c   : > { %3499 = vmatprep.subr.bf16.mxu1 %v4018_v25 }
 0x17e   : > { %3478 = vmatpush3.bf16.msra.mxu0 %v4019_v6 }
 0x17f   : > { %3500 = vmatpush3.bf16.msra.mxu1 %v4020_v7  ;;  %3479 = vmatprep.subr.bf16.mxu0 %v4021_v26  ;;  %v2917_v26 = vrot.slane %v4716_v50, %v2916_v15 }
 0x180   : > { %3501 = vmatprep.subr.bf16.mxu1 %v4022_v27 }
 0x182   : > { %3480 = vmatpush3.bf16.msra.mxu0 %v4023_v28 }
 0x183   : > { %3502 = vmatpush3.bf16.msra.mxu1 %v4024_v36  ;;  %3481 = vmatprep.subr.bf16.mxu0 %v4025_v37  ;;  %v2921_v37 = vrot.slane %v4716_v50, %v2920_v20 }
 0x184   : > { %3503 = vmatprep.subr.bf16.mxu1 %v4026_v29 }
 0x186   : > { %3482 = vmatpush3.bf16.msra.mxu0 %v4027_v30 }
 0x187   : > { %3504 = vmatpush3.bf16.msra.mxu1 %v4028_v31  ;;  %3483 = vmatprep.subr.bf16.mxu0 %v4029_v32 }
 0x188   : > { %3505 = vmatprep.subr.bf16.mxu1 %v4030_v33 }
 0x18a   : > { %3484 = vmatpush3.bf16.msra.mxu0 %v4031_v34 }
 0x18b   : > { %3506 = vmatpush3.bf16.msra.mxu1 %v4032_v35  ;;  %3485 = vmatprep.subr.bf16.mxu0 %v4033_v38 }
 0x18c   : > { %3507 = vmatprep.subr.bf16.mxu1 %v4034_v39 }
 0x18e   : > { %3486 = vmatpush3.bf16.msra.mxu0 %v4035_v40 }
 0x18f   : > { %3508 = vmatpush3.bf16.msra.mxu1 %v4036_v41  ;;  %3487 = vmatprep.subr.bf16.mxu0 %v4037_v42 }
 0x190   : > { %3509 = vmatprep.subr.bf16.mxu1 %v4038_v43 }
 0x192   : > { %3488 = vmatpush3.bf16.msra.mxu0 %v4039_v44 }
 0x193   : > { %3510 = vmatpush3.bf16.msra.mxu1 %v4040_v45 }
 0x195   : > { %2839 = vmatmul.mubr.bf16.vlgmr.msra.gmra.mrb[20].mxu0 %v4493_v16 }
 0x196   : > { %2879 = vmatmul.mubr.bf16.vlgmr.msra.gmra.mrb[20].mxu1 %v4497_v17 }
 0x1a8   : > { %v2514_v47 = vpop.f32.mrb[4].mxu0 }
 0x1a9   : > { %v2555_v51 = vpop.f32.mrb[4].mxu1  ;;  %v2515_v53 = vadd.f32 %v2514_v47, %v4663_v62  ;;  %v2516_v54 = vpop.f32.mrb[5].mxu0 }
 0x1aa   : > { %v2557_v16 = vpop.f32.mrb[5].mxu1  ;;  %v2517_v17 = vadd.f32 %v2516_v54, %v4665_v1  ;;  %v2518_v55 = vpop.f32.mrb[6].mxu0  ;;  %v2924_v54 = vsub.s32 4, %v4712_v48 }
 0x1ab   : > { %v2559_v56 = vpop.f32.mrb[6].mxu1  ;;  %v2556_v57 = vadd.f32 %v2555_v51, %v2515_v53  ;;  %v2519_v59 = vpop.f32.mrb[7].mxu0 }
 0x1ac   : > { %v2560_v60 = vpop.f32.mrb[7].mxu1  ;;  %v2558_v61 = vadd.f32 %v2557_v16, %v2517_v17  ;;  %v2925_v59 = vrot.slane %v4716_v50, %v2924_v54 }
 0x1ad   : > { %v2931_v0 = vadd.f32 %v2909_v58, %v2556_v57 }
 0x1ae   : > { %v2932_v62 = vadd.f32 %v2913_v63, %v2558_v61 }
 0x1af   : > { %v2936_v1 = vmax.f32 %v2931_v0, 0.0 }
 0x1b0   : > { %v2937_v2 = vmax.f32 %v2932_v62, 0.0 }
 0x1b1   : > { %2941 = vst [vmem:[%s4726_s28] sm:$0xff] %v2936_v1 }
 0x1b2   : > { %2942 = vst [vmem:[%s4726_s28 + $0x8] sm:$0xff] %v2937_v2 }
 0x1e8   : > { %v2596_v3 = vpop.f32.mrb[8].mxu0 }
 0x1e9   : > { %v2637_v4 = vpop.f32.mrb[8].mxu1  ;;  %v2598_v8 = vpop.f32.mrb[9].mxu0 }
 0x1ea   : > { %v2638_v5 = vadd.f32 %v2637_v4, %v2596_v3  ;;  %v2639_v9 = vpop.f32.mrb[9].mxu1  ;;  %v2600_v11 = vpop.f32.mrb[10].mxu0 }
 0x1eb   : > { %v2640_v10 = vadd.f32 %v2639_v9, %v2598_v8  ;;  %v2641_v12 = vpop.f32.mrb[10].mxu1  ;;  %v2601_v13 = vpop.f32.mrb[11].mxu0 }
 0x1ec   : > { %v2642_v14 = vpop.f32.mrb[11].mxu1 }
 0x228   : > { %v2678_v18 = vpop.f32.mrb[12].mxu0 }
 0x229   : > { %v2719_v19 = vpop.f32.mrb[12].mxu1  ;;  %v2679_v21 = vadd.f32 %v2678_v18, %v2638_v5  ;;  %v2680_v22 = vpop.f32.mrb[13].mxu0 }
 0x22a   : > { %v2721_v23 = vpop.f32.mrb[13].mxu1  ;;  %v2681_v24 = vadd.f32 %v2680_v22, %v2640_v10  ;;  %v2682_v25 = vpop.f32.mrb[14].mxu0 }
 0x22b   : > { %v2723_v6 = vpop.f32.mrb[14].mxu1  ;;  %v2720_v7 = vadd.f32 %v2719_v19, %v2679_v21  ;;  %v2683_v27 = vpop.f32.mrb[15].mxu0 }
 0x22c   : > { %v2724_v28 = vpop.f32.mrb[15].mxu1  ;;  %v2722_v36 = vadd.f32 %v2721_v23, %v2681_v24 }
 0x22d   : > { %v2933_v29 = vadd.f32 %v2917_v26, %v2720_v7 }
 0x22e   : > { %v2934_v30 = vadd.f32 %v2921_v37, %v2722_v36 }
 0x22f   : > { %v2938_v31 = vmax.f32 %v2933_v29, 0.0 }
 0x230   : > { %v2939_v32 = vmax.f32 %v2934_v30, 0.0 }
 0x231   : > { %2943 = vst [vmem:[%s4726_s28 + $0x10] sm:$0xff] %v2938_v31 }
 0x232   : > { %2944 = vst [vmem:[%s4726_s28 + $0x18] sm:$0xff] %v2939_v32 }
 0x248   : > { %v3445_v33 = vpop.f32.mrb[16].mxu0 }
 0x249   : > { %v3467_v34 = vpop.f32.mrb[16].mxu1  ;;  %v3446_v35 = vpop.f32.mrb[17].mxu0 }
 0x24a   : > { %v3468_v38 = vpop.f32.mrb[17].mxu1  ;;  %v3447_v39 = vadd.f32 %v3446_v35, %v3445_v33  ;;  %v3448_v41 = vpop.f32.mrb[18].mxu0 }
 0x24b   : > { %v3469_v40 = vadd.f32 %v3468_v38, %v3467_v34  ;;  %v3470_v42 = vpop.f32.mrb[18].mxu1  ;;  %v3449_v43 = vpop.f32.mrb[19].mxu0 }
 0x24c   : > { %v3471_v44 = vpop.f32.mrb[19].mxu1 }
 0x24d   : > { %v2801_v45 = vadd.f32 %v3469_v40, %v3447_v39 }
 0x268   : > { %v3489_v46 = vpop.f32.mrb[20].mxu0 }
 0x269   : > { %v3511_v49 = vpop.f32.mrb[20].mxu1  ;;  %v3490_v47 = vpop.f32.mrb[21].mxu0 }
 0x26a   : > { %v3512_v51 = vpop.f32.mrb[21].mxu1  ;;  %v3491_v52 = vadd.f32 %v3490_v47, %v3489_v46  ;;  %v3492_v16 = vpop.f32.mrb[22].mxu0 }
 0x26b   : > { %v3513_v53 = vadd.f32 %v3512_v51, %v3511_v49  ;;  %v3514_v17 = vpop.f32.mrb[22].mxu1  ;;  %v3493_v55 = vpop.f32.mrb[23].mxu0 }
 0x26c   : > { %v3515_v56 = vpop.f32.mrb[23].mxu1  ;;  %v2841_v57 = vadd.f32 %v3491_v52, %v2801_v45 }
 0x26e   : > { %v2881_v58 = vadd.f32 %v3513_v53, %v2841_v57 }
 0x270   : > { %v2935_v60 = vadd.f32 %v2925_v59, %v2881_v58 }
 0x272   : > { %v2940_v61 = vmax.f32 %v2935_v60, 0.0 }
 0x274   : > { %2945 = vst [vmem:[%s4726_s28 + $0x20] sm:$0xff] %v2940_v61 }
 0x275 PF: > { %s19_s17 = sadd.s32 1, %s4155_s17   ;;  %s4768_s12 = smov %s4139_s13 }
 0x276   : > { %p16_p9 = scmp.ge.s32.totalorder %s19_s17, 7   ;;  %s4769_s13 = smov %s4143_s14 }
 0x277   : > { %s4770_s14 = smov %s4227_s23  ;;  %s4771_s15 = smov %s4151_s16 }
 0x278   : > { %s4772_s16 = smov %s4774_s19  ;;  %18 = sbr.rel (!%p16_p9) target bundleno = 6 (0x6), region = 96 }
 0x27f   :  { %2976 = vsyncpa [#allocation3], 1 }
 0x280   :  { %2978 = vsyncpa [#allocation3 + $0x1], 1 }
 0x281   :  { %2979 = vsyncpa [#allocation5], 1 }
 0x282   :  { %2981 = vsyncpa [#allocation5 + $0x1], 1 }

// kernel: decoder_forward.7
= control target key start
LH: loop header
LB: loop body
LE: loop exit
PB: predicated region body
PF: predicated region fallthrough
CT: control target
= control target key end

     0   :  { %s2009_s12 = smov 0   ;;  %s2011_s13 = smov 0   ;;  %s2538_s0 = inlined_call_operand.vmem [shape: bf16[56,128], index: 0, kind: input, shape index: {}]   ;;  %s2539_s1 = inlined_call_operand.vmem [shape: bf16[128,1792], index: 1, kind: input, shape index: {}]   ;;  %s2540_s2 = inlined_call_operand.vmem [shape: f32[1,1792], index: 2, kind: input, shape index: {}]   ;;  %s2541_s3 = inlined_call_operand.vmem [shape: f32[56,1792], index: 3, kind: output, shape index: {}]  }
   0x1   :  { %s2013_s14 = smov 0   ;;  %s2015_s15 = smov 0  }
   0x2   :  { %s2017_s16 = smov 0  }
   0x3 LB: > { %s28_s17 = sadd.s32 1, %s1982_s15  ;;  %s1679_s18 = sadd.s32 4294967295, %s1986_s16   ;;  %s1986_s16 = sphi %s2017_s16, %s13_s16   ;;  %s1982_s15 = sphi %s2015_s15, %s2546_s15   ;;  %s1978_s14 = sphi %s2013_s14, %s2545_s14   ;;  %s1974_s13 = sphi %s2011_s13, %s2544_s13   ;;  %s1970_s12 = sphi %s2009_s12, %s2543_s12  }
   0x4   : > { %p30_p0 = scmp.ge.s32.totalorder %s28_s17, 2  ;;  %p76_p1 = scmp.ne.s32.totalorder %s1974_s13, %s1970_s12 }
   0x5   : > { %p77_p2 = scmp.eq.s32.totalorder %s1986_s16, 0  ;;  %p134_p4 = scmp.eq.s32.totalorder %s1679_s18, 1 }
   0x6   : > { %s2548_s17 = smov (%p30_p0, %s28_s17), 0  ;;  %s69_s20 = sadd.s32 1, %s1974_s13 }
   0x7   : > { %p78_p3 = por %p77_p2, %p76_p1  ;;  %s65_s19 = ssub.s32 %s1982_s15, %s2548_s17 }
   0x8   : > { %p67_p5 = scmp.eq.s32.totalorder %s65_s19, 0  ;;  %p2044_p6 = por %p134_p4, %p76_p1 }
   0x9   : > { %p1683_p7 = scmp.ge.s32.totalorder %s1986_s16, 2 }
   0xa   : > { %s2049_s22 = scalar_select %p67_p5, %s1974_s13, %s69_s20  }
   0xb   : > { %168 = sbr.rel (%p1683_p7) target bundleno = 57 (0x39), region = 20 }
  0x12   : > { %171 = sbr.rel (!%p78_p3) target bundleno = 57 (0x39), region = 24  ;;  %s173_s23 = sand.u32 (%p78_p3), 1, %s1974_s13  }
  0x13   : > { %s1781_s24 = smul.u32 (%p78_p3), 28, %s1982_s15 }
  0x14   : > { %s1819_s25 = smul.u32 (%p78_p3), 448, %s173_s23 }
  0x15   : > { %s2057_s28 = scalar_lea.vmem (%p78_p3), %s2539_s1, %s1781_s24 }
  0x16   : > { %v196_v0 = vld [vmem:[%s2057_s28] sm:$0xff] (%p78_p3)  ;;  %v198_v1 = vld [vmem:[%s2057_s28 + $0x8] sm:$0xff] (%p78_p3)  ;;  %v200_v2 = vld [vmem:[%s2057_s28 + $0x10] sm:$0xff] (%p78_p3)  ;;  %s2062_s29 = scalar_lea.vmem (%p78_p3), [#allocation2], %s1819_s25 }
  0x17   : > { %197 = vst [vmem:[%s2062_s29] sm:$0xff] (%p78_p3), %v196_v0  ;;  %199 = vst [vmem:[%s2062_s29 + $0x8] sm:$0xff] (%p78_p3), %v198_v1  ;;  %v202_v3 = vld [vmem:[%s2057_s28 + $0x38] sm:$0xff] (%p78_p3)  ;;  %v204_v4 = vld [vmem:[%s2057_s28 + $0x40] sm:$0xff] (%p78_p3) }
  0x18   : > { %201 = vst [vmem:[%s2062_s29 + $0x10] sm:$0xff] (%p78_p3), %v200_v2  ;;  %v206_v5 = vld [vmem:[%s2057_s28 + $0x48] sm:$0xff] (%p78_p3)  ;;  %203 = vst [vmem:[%s2062_s29 + $0x1c] sm:$0xff] (%p78_p3), %v202_v3  ;;  %v208_v6 = vld [vmem:[%s2057_s28 + $0x70] sm:$0xff] (%p78_p3) }
  0x19   : > { %205 = vst [vmem:[%s2062_s29 + $0x24] sm:$0xff] %v204_v4  ;;  %207 = vst [vmem:[%s2062_s29 + $0x2c] sm:$0xff] %v206_v5  ;;  %v210_v7 = vld [vmem:[%s2057_s28 + $0x78] sm:$0xff]  ;;  %v212_v8 = vld [vmem:[%s2057_s28 + $0x80] sm:$0xff] }
  0x1a   : > { %209 = vst [vmem:[%s2062_s29 + $0x38] sm:$0xff] %v208_v6  ;;  %211 = vst [vmem:[%s2062_s29 + $0x40] sm:$0xff] %v210_v7  ;;  %v214_v9 = vld [vmem:[%s2057_s28 + $0xa8] sm:$0xff]  ;;  %v216_v10 = vld [vmem:[%s2057_s28 + $0xb0] sm:$0xff] }
  0x1b   : > { %213 = vst [vmem:[%s2062_s29 + $0x48] sm:$0xff] %v212_v8  ;;  %v218_v11 = vld [vmem:[%s2057_s28 + $0xb8] sm:$0xff]  ;;  %215 = vst [vmem:[%s2062_s29 + $0x54] sm:$0xff] %v214_v9  ;;  %v220_v12 = vld [vmem:[%s2057_s28 + $0xe0] sm:$0xff] }
  0x1c   : > { %217 = vst [vmem:[%s2062_s29 + $0x5c] sm:$0xff] %v216_v10  ;;  %219 = vst [vmem:[%s2062_s29 + $0x64] sm:$0xff] %v218_v11  ;;  %v222_v13 = vld [vmem:[%s2057_s28 + $0xe8] sm:$0xff]  ;;  %v224_v14 = vld [vmem:[%s2057_s28 + $0xf0] sm:$0xff] }
  0x1d   : > { %221 = vst [vmem:[%s2062_s29 + $0x70] sm:$0xff] %v220_v12  ;;  %223 = vst [vmem:[%s2062_s29 + $0x78] sm:$0xff] %v222_v13  ;;  %v226_v15 = vld [vmem:[%s2057_s28 + $0x118] sm:$0xff]  ;;  %v228_v16 = vld [vmem:[%s2057_s28 + $0x120] sm:$0xff] }
  0x1e   : > { %225 = vst [vmem:[%s2062_s29 + $0x80] sm:$0xff] %v224_v14  ;;  %v230_v17 = vld [vmem:[%s2057_s28 + $0x128] sm:$0xff]  ;;  %227 = vst [vmem:[%s2062_s29 + $0x8c] sm:$0xff] %v226_v15  ;;  %v232_v18 = vld [vmem:[%s2057_s28 + $0x150] sm:$0xff] }
  0x1f   : > { %229 = vst [vmem:[%s2062_s29 + $0x94] sm:$0xff] %v228_v16  ;;  %231 = vst [vmem:[%s2062_s29 + $0x9c] sm:$0xff] %v230_v17  ;;  %v234_v19 = vld [vmem:[%s2057_s28 + $0x158] sm:$0xff]  ;;  %v236_v20 = vld [vmem:[%s2057_s28 + $0x160] sm:$0xff] }
  0x20   : > { %233 = vst [vmem:[%s2062_s29 + $0xa8] sm:$0xff] %v232_v18  ;;  %235 = vst [vmem:[%s2062_s29 + $0xb0] sm:$0xff] %v234_v19  ;;  %v238_v21 = vld [vmem:[%s2057_s28 + $0x188] sm:$0xff]  ;;  %v240_v22 = vld [vmem:[%s2057_s28 + $0x190] sm:$0xff] }
  0x21   : > { %237 = vst [vmem:[%s2062_s29 + $0xb8] sm:$0xff] %v236_v20  ;;  %v242_v23 = vld [vmem:[%s2057_s28 + $0x198] sm:$0xff]  ;;  %239 = vst [vmem:[%s2062_s29 + $0xc4] sm:$0xff] %v238_v21  ;;  %v244_v24 = vld [vmem:[%s2057_s28 + $0x1c0] sm:$0xff] }
  0x22   : > { %241 = vst [vmem:[%s2062_s29 + $0xcc] sm:$0xff] %v240_v22  ;;  %243 = vst [vmem:[%s2062_s29 + $0xd4] sm:$0xff] %v242_v23  ;;  %v246_v25 = vld [vmem:[%s2057_s28 + $0x1c8] sm:$0xff]  ;;  %v248_v26 = vld [vmem:[%s2057_s28 + $0x1d0] sm:$0xff] }
  0x23   : > { %245 = vst [vmem:[%s2062_s29 + $0xe0] sm:$0xff] %v244_v24  ;;  %247 = vst [vmem:[%s2062_s29 + $0xe8] sm:$0xff] %v246_v25  ;;  %v250_v27 = vld [vmem:[%s2057_s28 + $0x1f8] sm:$0xff]  ;;  %v252_v28 = vld [vmem:[%s2057_s28 + $0x200] sm:$0xff] }
  0x24   : > { %249 = vst [vmem:[%s2062_s29 + $0xf0] sm:$0xff] %v248_v26  ;;  %v254_v29 = vld [vmem:[%s2057_s28 + $0x208] sm:$0xff]  ;;  %251 = vst [vmem:[%s2062_s29 + $0xfc] sm:$0xff] %v250_v27  ;;  %v256_v30 = vld [vmem:[%s2057_s28 + $0x230] sm:$0xff] }
  0x25   : > { %253 = vst [vmem:[%s2062_s29 + $0x104] sm:$0xff] %v252_v28  ;;  %255 = vst [vmem:[%s2062_s29 + $0x10c] sm:$0xff] %v254_v29  ;;  %v258_v31 = vld [vmem:[%s2057_s28 + $0x238] sm:$0xff]  ;;  %v260_v32 = vld [vmem:[%s2057_s28 + $0x240] sm:$0xff] }
  0x26   : > { %257 = vst [vmem:[%s2062_s29 + $0x118] sm:$0xff] %v256_v30  ;;  %259 = vst [vmem:[%s2062_s29 + $0x120] sm:$0xff] %v258_v31  ;;  %v262_v33 = vld [vmem:[%s2057_s28 + $0x268] sm:$0xff]  ;;  %v264_v34 = vld [vmem:[%s2057_s28 + $0x270] sm:$0xff] }
  0x27   : > { %261 = vst [vmem:[%s2062_s29 + $0x128] sm:$0xff] %v260_v32  ;;  %v266_v35 = vld [vmem:[%s2057_s28 + $0x278] sm:$0xff]  ;;  %263 = vst [vmem:[%s2062_s29 + $0x134] sm:$0xff] %v262_v33  ;;  %v268_v36 = vld [vmem:[%s2057_s28 + $0x2a0] sm:$0xff] }
  0x28   : > { %265 = vst [vmem:[%s2062_s29 + $0x13c] sm:$0xff] %v264_v34  ;;  %267 = vst [vmem:[%s2062_s29 + $0x144] sm:$0xff] %v266_v35  ;;  %v270_v37 = vld [vmem:[%s2057_s28 + $0x2a8] sm:$0xff]  ;;  %v272_v38 = vld [vmem:[%s2057_s28 + $0x2b0] sm:$0xff] }
  0x29   : > { %269 = vst [vmem:[%s2062_s29 + $0x150] sm:$0xff] %v268_v36  ;;  %271 = vst [vmem:[%s2062_s29 + $0x158] sm:$0xff] %v270_v37  ;;  %v274_v39 = vld [vmem:[%s2057_s28 + $0x2d8] sm:$0xff]  ;;  %v276_v40 = vld [vmem:[%s2057_s28 + $0x2e0] sm:$0xff] }
  0x2a   : > { %273 = vst [vmem:[%s2062_s29 + $0x160] sm:$0xff] %v272_v38  ;;  %v278_v41 = vld [vmem:[%s2057_s28 + $0x2e8] sm:$0xff]  ;;  %275 = vst [vmem:[%s2062_s29 + $0x16c] sm:$0xff] %v274_v39  ;;  %v280_v42 = vld [vmem:[%s2057_s28 + $0x310] sm:$0xff] }
  0x2b   : > { %277 = vst [vmem:[%s2062_s29 + $0x174] sm:$0xff] %v276_v40  ;;  %279 = vst [vmem:[%s2062_s29 + $0x17c] sm:$0xff] %v278_v41  ;;  %v282_v43 = vld [vmem:[%s2057_s28 + $0x318] sm:$0xff]  ;;  %v284_v44 = vld [vmem:[%s2057_s28 + $0x320] sm:$0xff] }
  0x2c   : > { %281 = vst [vmem:[%s2062_s29 + $0x188] sm:$0xff] %v280_v42  ;;  %283 = vst [vmem:[%s2062_s29 + $0x190] sm:$0xff] %v282_v43  ;;  %v286_v45 = vld [vmem:[%s2057_s28 + $0x348] sm:$0xff]  ;;  %v288_v46 = vld [vmem:[%s2057_s28 + $0x350] sm:$0xff] }
  0x2d   : > { %285 = vst [vmem:[%s2062_s29 + $0x198] sm:$0xff] %v284_v44  ;;  %v290_v47 = vld [vmem:[%s2057_s28 + $0x358] sm:$0xff]  ;;  %287 = vst [vmem:[%s2062_s29 + $0x1a4] sm:$0xff] %v286_v45  ;;  %v1687_v49 = vld [vmem:[%s2057_s28 + $0x50] sm:$0xf] }
  0x2e   : > { %289 = vst [vmem:[%s2062_s29 + $0x1ac] sm:$0xff] %v288_v46  ;;  %291 = vst [vmem:[%s2062_s29 + $0x1b4] sm:$0xff] %v290_v47  ;;  %v1685_v48 = vld [vmem:[%s2057_s28 + $0x18] sm:$0xf]  ;;  %v1689_v50 = vld [vmem:[%s2057_s28 + $0x88] sm:$0xf] }
  0x2f   : > { %1686 = vst [vmem:[%s2062_s29 + $0x18] sm:$0xf] %v1685_v48  ;;  %1688 = vst [vmem:[%s2062_s29 + $0x34] sm:$0xf] %v1687_v49  ;;  %v1691_v51 = vld [vmem:[%s2057_s28 + $0xc0] sm:$0xf] }
  0x30   : > { %1690 = vst [vmem:[%s2062_s29 + $0x50] sm:$0xf] %v1689_v50  ;;  %v1693_v52 = vld [vmem:[%s2057_s28 + $0xf8] sm:$0xf]  ;;  %v1695_v53 = vld [vmem:[%s2057_s28 + $0x130] sm:$0xf] }
  0x31   : > { %1692 = vst [vmem:[%s2062_s29 + $0x6c] sm:$0xf] %v1691_v51  ;;  %1694 = vst [vmem:[%s2062_s29 + $0x88] sm:$0xf] %v1693_v52  ;;  %v1697_v54 = vld [vmem:[%s2057_s28 + $0x168] sm:$0xf] }
  0x32   : > { %1696 = vst [vmem:[%s2062_s29 + $0xa4] sm:$0xf] %v1695_v53  ;;  %v1699_v55 = vld [vmem:[%s2057_s28 + $0x1a0] sm:$0xf]  ;;  %v1701_v56 = vld [vmem:[%s2057_s28 + $0x1d8] sm:$0xf] }
  0x33   : > { %1698 = vst [vmem:[%s2062_s29 + $0xc0] sm:$0xf] %v1697_v54  ;;  %1700 = vst [vmem:[%s2062_s29 + $0xdc] sm:$0xf] %v1699_v55  ;;  %v1703_v57 = vld [vmem:[%s2057_s28 + $0x210] sm:$0xf] }
  0x34   : > { %1702 = vst [vmem:[%s2062_s29 + $0xf8] sm:$0xf] %v1701_v56  ;;  %v1705_v58 = vld [vmem:[%s2057_s28 + $0x248] sm:$0xf]  ;;  %v1707_v59 = vld [vmem:[%s2057_s28 + $0x280] sm:$0xf] }
  0x35   : > { %1704 = vst [vmem:[%s2062_s29 + $0x114] sm:$0xf] %v1703_v57  ;;  %1706 = vst [vmem:[%s2062_s29 + $0x130] sm:$0xf] %v1705_v58  ;;  %v1709_v60 = vld [vmem:[%s2057_s28 + $0x2b8] sm:$0xf] }
  0x36   : > { %1708 = vst [vmem:[%s2062_s29 + $0x14c] sm:$0xf] %v1707_v59  ;;  %v1711_v61 = vld [vmem:[%s2057_s28 + $0x2f0] sm:$0xf]  ;;  %v1713_v62 = vld [vmem:[%s2057_s28 + $0x328] sm:$0xf] }
  0x37   : > { %1710 = vst [vmem:[%s2062_s29 + $0x168] sm:$0xf] %v1709_v60  ;;  %1712 = vst [vmem:[%s2062_s29 + $0x184] sm:$0xf] %v1711_v61  ;;  %v1715_v63 = vld [vmem:[%s2057_s28 + $0x360] sm:$0xf] }
  0x38   : > { %1714 = vst [vmem:[%s2062_s29 + $0x1a0] sm:$0xf] %v1713_v62  ;;  %1716 = vst [vmem:[%s2062_s29 + $0x1bc] sm:$0xf] %v1715_v63 }
  0x39 PF: > { %p1717_p8 = scmp.ge.s32.totalorder %s1986_s16, 1  ;;  %p343_p9 = scmp.lt.s32.totalorder %s1986_s16, 3 }
  0x3b   : > { %p344_p10 = pnand %p1717_p8, %p343_p9 }
  0x3c   : > { %s350_s30 = sand.u32 (!%p344_p10), 1, %s1970_s12   ;;  %v1988_v0 = vmov (!%p344_p10), 0   ;;  %v2230_v30 = vld [vmem:[%s2538_s0] sm:$0xff] (!%p344_p10)   ;;  %v2247_v41 = vld [vmem:[%s2538_s0 + $0x8] sm:$0xff] (!%p344_p10)   ;;  %v1927_v48 = vld [vmem:[%s2538_s0 + $0x10] sm:$0xff] (!%p344_p10)   ;;  %s395_s20 = smul.u32 (!%p344_p10), 7, %s1978_s14  ;;  %v1315_v61 = vlaneseq (!%p344_p10) }
  0x3d   : > { %347 = sbr.rel (%p344_p10) target bundleno = 378 (0x17a), region = 54  ;;  %918 = vmatprep.mubr.bf16.mxu0 (!%p344_p10), %v1988_v0  ;;  %989 = vmatprep.mubr.bf16.mxu1 (!%p344_p10), %v1988_v0  ;;  %v1936_v55 = vld [vmem:[%s2538_s0 + $0x18] ss:$0 sps:$4 sm:$0xff] (!%p344_p10)  }
  0x3e   : > { %s1820_s4 = smul.u32 (!%p344_p10), 448, %s350_s30  ;;  %p396_p11 = scmp.lt.s32.totalorder (!%p344_p10), %s395_s20, 13  ;;  %v2289_v62 = vshrl.u32 (!%p344_p10), %v1315_v61, 7 }
  0x3f   : > { %s1821_s26 = smul.u32 (!%p344_p10), 392, %s350_s30 }
  0x40   : > { %s2196_s5 = scalar_lea.vmem (!%p344_p10), [#allocation2], %s1820_s4  ;;  %v1317_v63 = vsub.s32 (!%p344_p10), 0, %v2289_v62  ;;  %v1333_v61 = vsub.s32 (!%p344_p10), 4, %v2289_v62 }
  0x41   : > { %v1864_v1 = vld [vmem:[%s2196_s5 + $0x4] ss:$28 sps:$4 sm:$0xff] (!%p344_p10)   ;;  %v1867_v3 = vld [vmem:[%s2196_s5 + $0x3c] ss:$28 sps:$4 sm:$0xff] (!%p344_p10)   ;;  %v1870_v5 = vld [vmem:[%s2196_s5 + $0x74] ss:$28 sps:$4 sm:$0xff] (!%p344_p10)  }
  0x42   : > { %v1866_v2 = vld [vmem:[%s2196_s5] ss:$28 sps:$4 sm:$0xff] (!%p344_p10)   ;;  %886 = vmatprep.subr.bf16.mxu0 (!%p344_p10), %v1864_v1  ;;  %v1869_v4 = vld [vmem:[%s2196_s5 + $0x38] ss:$28 sps:$4 sm:$0xff] (!%p344_p10)   ;;  %v1875_v6 = vld [vmem:[%s2196_s5 + $0xc] ss:$28 sps:$4 sm:$0xff] (!%p344_p10)  }
  0x43   : > { %887 = vmatpush1.bf16.msra.mxu0 (!%p344_p10), %v1866_v2  ;;  %v1878_v7 = vld [vmem:[%s2196_s5 + $0x8] ss:$28 sps:$4 sm:$0xff] (!%p344_p10)   ;;  %v1872_v8 = vld [vmem:[%s2196_s5 + $0x70] ss:$28 sps:$4 sm:$0xff] (!%p344_p10)   ;;  %957 = vmatprep.subr.bf16.mxu1 (!%p344_p10), %v1875_v6  ;;  %v1884_v11 = vld [vmem:[%s2196_s5 + $0x40] ss:$28 sps:$4 sm:$0xff] (!%p344_p10)  }
  0x44   : > { %888 = vmatprep.subr.bf16.mxu0 %v1867_v3  ;;  %v1873_v9 = vld [vmem:[%s2196_s5 + $0xac] ss:$28 sps:$4 sm:$0xff]   ;;  %958 = vmatpush1.bf16.msra.mxu1 %v1878_v7  ;;  %v1881_v10 = vld [vmem:[%s2196_s5 + $0x44] ss:$28 sps:$4 sm:$0xff]   ;;  %v1887_v14 = vld [vmem:[%s2196_s5 + $0x7c] ss:$28 sps:$4 sm:$0xff]  }
  0x45   : > { %959 = vmatprep.subr.bf16.mxu1 %v1881_v10  ;;  %v1877_v12 = vld [vmem:[%s2196_s5 + $0xa8] ss:$28 sps:$4 sm:$0xff]   ;;  %v1890_v15 = vld [vmem:[%s2196_s5 + $0x78] ss:$28 sps:$4 sm:$0xff]   ;;  %v1883_v17 = vld [vmem:[%s2196_s5 + $0xe0] ss:$28 sps:$4 sm:$0xff]  }
  0x46   : > { %v1879_v13 = vld [vmem:[%s2196_s5 + $0xe4] ss:$28 sps:$4 sm:$0xff]   ;;  %v1893_v16 = vld [vmem:[%s2196_s5 + $0xb4] ss:$28 sps:$4 sm:$0xff]   ;;  %v1885_v18 = vld [vmem:[%s2196_s5 + $0x11c] ss:$28 sps:$4 sm:$0xff]  }
  0x47   : > { %889 = vmatpush1.bf16.msra.mxu0 %v1869_v4  ;;  %v1896_v19 = vld [vmem:[%s2196_s5 + $0xb0] ss:$28 sps:$4 sm:$0xff]   ;;  %v1889_v21 = vld [vmem:[%s2196_s5 + $0x118] ss:$28 sps:$4 sm:$0xff]   ;;  %v1902_v23 = vld [vmem:[%s2196_s5 + $0xe8] ss:$28 sps:$4 sm:$0xff]  }
  0x48   : > { %890 = vmatprep.subr.bf16.mxu0 %v1870_v5  ;;  %960 = vmatpush1.bf16.msra.mxu1 %v1884_v11  ;;  %v1899_v20 = vld [vmem:[%s2196_s5 + $0xec] ss:$28 sps:$4 sm:$0xff]   ;;  %v1891_v22 = vld [vmem:[%s2196_s5 + $0x154] ss:$28 sps:$4 sm:$0xff]   ;;  %v1904_v24 = vld [vmem:[%s2196_s5 + $0x124] ss:$28 sps:$4 sm:$0xff]  }
  0x49   : > { %961 = vmatprep.subr.bf16.mxu1 %v1887_v14  ;;  %v1895_v25 = vld [vmem:[%s2196_s5 + $0x150] ss:$28 sps:$4 sm:$0xff]   ;;  %v1909_v27 = vld [vmem:[%s2196_s5 + $0x120] ss:$28 sps:$4 sm:$0xff]   ;;  %v1901_v29 = vld [vmem:[%s2196_s5 + $0x188] ss:$28 sps:$4 sm:$0xff]  }
  0x4a   : > { %v1897_v26 = vld [vmem:[%s2196_s5 + $0x18c] ss:$28 sps:$4 sm:$0xff]   ;;  %v1910_v28 = vld [vmem:[%s2196_s5 + $0x15c] ss:$28 sps:$4 sm:$0xff]   ;;  %v1908_v31 = vld [vmem:[%s2196_s5 + $0x14] ss:$28 sps:$4 sm:$0xff]  }
  0x4b   : > { %891 = vmatpush1.bf16.msra.mxu0 %v1872_v8  ;;  %v1915_v32 = vld [vmem:[%s2196_s5 + $0x158] ss:$28 sps:$4 sm:$0xff]   ;;  %v1906_v34 = vld [vmem:[%s2196_s5 + $0x10] ss:$28 sps:$4 sm:$0xff]   ;;  %v1912_v38 = vld [vmem:[%s2196_s5 + $0x48] ss:$28 sps:$4 sm:$0xff]  }
  0x4c   : > { %892 = vmatprep.subr.bf16.mxu0 %v1873_v9  ;;  %962 = vmatpush1.bf16.msra.mxu1 %v1890_v15  ;;  %v1917_v33 = vld [vmem:[%s2196_s5 + $0x194] ss:$28 sps:$4 sm:$0xff]   ;;  %v1914_v35 = vld [vmem:[%s2196_s5 + $0x4c] ss:$28 sps:$4 sm:$0xff]   ;;  %v1921_v39 = vld [vmem:[%s2196_s5 + $0x84] ss:$28 sps:$4 sm:$0xff]  }
  0x4d   : > { %963 = vmatprep.subr.bf16.mxu1 %v1893_v16  ;;  %v1922_v36 = vld [vmem:[%s2196_s5 + $0x190] ss:$28 sps:$4 sm:$0xff]   ;;  %v1926_v37 = vld [vmem:[%s2196_s5 + $0x18] ss:$28 sps:$4 sm:$0xff]   ;;  %v1919_v42 = vld [vmem:[%s2196_s5 + $0x80] ss:$28 sps:$4 sm:$0xff]  }
  0x4e   : > { %v1931_v40 = vld [vmem:[%s2196_s5 + $0x50] ss:$28 sps:$4 sm:$0xff]   ;;  %v1925_v43 = vld [vmem:[%s2196_s5 + $0xbc] ss:$28 sps:$4 sm:$0xff]   ;;  %v1935_v44 = vld [vmem:[%s2196_s5 + $0x88] ss:$28 sps:$4 sm:$0xff]  }
  0x4f   : > { %893 = vmatpush1.bf16.msra.mxu0 %v1877_v12  ;;  %v1923_v45 = vld [vmem:[%s2196_s5 + $0xb8] ss:$28 sps:$4 sm:$0xff]   ;;  %v1940_v47 = vld [vmem:[%s2196_s5 + $0xc0] ss:$28 sps:$4 sm:$0xff]   ;;  %v1928_v49 = vld [vmem:[%s2196_s5 + $0xf0] ss:$28 sps:$4 sm:$0xff]  }
  0x50   : > { %894 = vmatprep.subr.bf16.mxu0 %v1879_v13  ;;  %964 = vmatpush1.bf16.msra.mxu1 %v1896_v19  ;;  %v1930_v46 = vld [vmem:[%s2196_s5 + $0xf4] ss:$28 sps:$4 sm:$0xff]   ;;  %v1934_v50 = vld [vmem:[%s2196_s5 + $0x12c] ss:$28 sps:$4 sm:$0xff]   ;;  %v1939_v53 = vld [vmem:[%s2196_s5 + $0x164] ss:$28 sps:$4 sm:$0xff]  }
  0x51   : > { %965 = vmatprep.subr.bf16.mxu1 %v1899_v20  ;;  %v1944_v51 = vld [vmem:[%s2196_s5 + $0xf8] ss:$28 sps:$4 sm:$0xff]   ;;  %v1932_v52 = vld [vmem:[%s2196_s5 + $0x128] ss:$28 sps:$4 sm:$0xff]   ;;  %v1945_v54 = vld [vmem:[%s2196_s5 + $0x130] ss:$28 sps:$4 sm:$0xff]  }
  0x52   : > { %v1937_v56 = vld [vmem:[%s2196_s5 + $0x160] ss:$28 sps:$4 sm:$0xff]   ;;  %v1946_v58 = vld [vmem:[%s2196_s5 + $0x168] ss:$28 sps:$4 sm:$0xff]   ;;  %v1941_v59 = vld [vmem:[%s2196_s5 + $0x198] ss:$28 sps:$4 sm:$0xff]  }
  0x53   : > { %895 = vmatpush1.bf16.msra.mxu0 %v1883_v17  ;;  %v1943_v57 = vld [vmem:[%s2196_s5 + $0x19c] ss:$28 sps:$4 sm:$0xff]   ;;  %s2550_s20 = smov (!%p396_p11, %s395_s20), 13  ;;  %v1321_v2 = vsub.s32 1, %v2289_v62  ;;  %v1325_v5 = vsub.s32 2, %v2289_v62  ;;  %v1329_v7 = vsub.s32 3, %v2289_v62 }
  0x54   : > { %896 = vmatprep.subr.bf16.mxu0 %v1885_v18  ;;  %966 = vmatpush1.bf16.msra.mxu1 %v1902_v23  ;;  %v1947_v60 = vld [vmem:[%s2196_s5 + $0x1a0] ss:$28 sps:$4 sm:$0xff]   ;;  %s398_s25 = scalar_lea.vmem %s2540_s2, %s2550_s20  ;;  %s2313_s12 = scalar_lea.vmem [#allocation3], %s1821_s26 }
  0x55   : > { %967 = vmatprep.subr.bf16.mxu1 %v1904_v24  ;;  %v2295_v1 = vld [vmem:[%s398_s25] sm:$0xff]  ;;  %s1782_s27 = smul.u32 (%p2044_p6), 56, %s1978_s14 }
  0x56   : > { %v2304_v4 = vrot.slane %v2295_v1, %v1321_v2  ;;  %v2311_v12 = vrot.slane %v2295_v1, %v1325_v5  ;;  %v2318_v15 = vrot.slane %v2295_v1, %v1329_v7  ;;  %v1337_v2 = vsub.s32 5, %v2289_v62 }
  0x57   : > { %897 = vmatpush1.bf16.msra.mxu0 %v1889_v21  ;;  %s2429_s29 = scalar_lea.vmem (%p2044_p6), %s2541_s3, %s1782_s27 }
  0x58   : > { %898 = vmatprep.subr.bf16.mxu0 %v1891_v22  ;;  %968 = vmatpush1.bf16.msra.mxu1 %v1909_v27 }
  0x59   : > { %969 = vmatprep.subr.bf16.mxu1 %v1910_v28 }
  0x5b   : > { %899 = vmatpush1.bf16.msra.mxu0 %v1895_v25 }
  0x5c   : > { %900 = vmatprep.subr.bf16.mxu0 %v1897_v26  ;;  %970 = vmatpush1.bf16.msra.mxu1 %v1915_v32 }
  0x5d   : > { %971 = vmatprep.subr.bf16.mxu1 %v1917_v33 }
  0x5f   : > { %901 = vmatpush1.bf16.msra.mxu0 %v1901_v29 }
  0x60   : > { %1028 = vmatprep.subr.bf16.mxu0 %v1908_v31  ;;  %972 = vmatpush1.bf16.msra.mxu1 %v1922_v36 }
  0x61   : > { %1795 = vmatprep.subr.bf16.mxu1 %v1926_v37 }
  0x62   : > { %919 = vmatmul.mubr.bf16.vlgmr.msra.gmra.mrb[0].mxu0 %v2230_v30 }
  0x63   : > { %1029 = vmatpush1.bf16.msra.mxu0 %v1906_v34  ;;  %928 = vmatprep.mubr.bf16.mxu0 %v1988_v0 }
  0x64   : > { %1030 = vmatprep.subr.bf16.mxu0 %v1914_v35  ;;  %990 = vmatmul.mubr.bf16.vlgmr.msra.gmra.mrb[0].mxu1 %v2230_v30 }
  0x65   : > { %1796 = vmatpush3.bf16.msra.mxu1 %v1926_v37  ;;  %999 = vmatprep.mubr.bf16.mxu1 %v1988_v0 }
  0x66   : > { %1797 = vmatprep.subr.bf16.mxu1 %v1931_v40 }
  0x67   : > { %1031 = vmatpush1.bf16.msra.mxu0 %v1912_v38 }
  0x68   : > { %1032 = vmatprep.subr.bf16.mxu0 %v1921_v39 }
  0x69   : > { %1798 = vmatpush3.bf16.msra.mxu1 %v1931_v40 }
  0x6a   : > { %929 = vmatmul.mubr.bf16.gmra.mrb[4].mxu0 %v2247_v41  ;;  %1799 = vmatprep.subr.bf16.mxu1 %v1935_v44 }
  0x6b   : > { %1033 = vmatpush1.bf16.msra.mxu0 %v1919_v42  ;;  %938 = vmatprep.mubr.bf16.mxu0 %v1988_v0 }
  0x6c   : > { %1034 = vmatprep.subr.bf16.mxu0 %v1925_v43  ;;  %1000 = vmatmul.mubr.bf16.gmra.mrb[4].mxu1 %v2247_v41 }
  0x6d   : > { %1800 = vmatpush3.bf16.msra.mxu1 %v1935_v44  ;;  %1009 = vmatprep.mubr.bf16.mxu1 %v1988_v0 }
  0x6e   : > { %1801 = vmatprep.subr.bf16.mxu1 %v1940_v47 }
  0x6f   : > { %1035 = vmatpush1.bf16.msra.mxu0 %v1923_v45 }
  0x70   : > { %1036 = vmatprep.subr.bf16.mxu0 %v1930_v46 }
  0x71   : > { %1802 = vmatpush3.bf16.msra.mxu1 %v1940_v47 }
  0x72   : > { %939 = vmatmul.mubr.bf16.gmra.mrb[8].mxu0 %v1927_v48  ;;  %1803 = vmatprep.subr.bf16.mxu1 %v1944_v51 }
  0x73   : > { %1037 = vmatpush1.bf16.msra.mxu0 %v1928_v49  ;;  %948 = vmatprep.mubr.bf16.mxu0 %v1988_v0 }
  0x74   : > { %1038 = vmatprep.subr.bf16.mxu0 %v1934_v50  ;;  %1010 = vmatmul.mubr.bf16.gmra.mrb[8].mxu1 %v1927_v48 }
  0x75   : > { %1804 = vmatpush3.bf16.msra.mxu1 %v1944_v51  ;;  %1019 = vmatprep.mubr.bf16.mxu1 %v1988_v0 }
  0x76   : > { %1805 = vmatprep.subr.bf16.mxu1 %v1945_v54 }
  0x77   : > { %1039 = vmatpush1.bf16.msra.mxu0 %v1932_v52 }
  0x78   : > { %1040 = vmatprep.subr.bf16.mxu0 %v1939_v53 }
  0x79   : > { %1806 = vmatpush3.bf16.msra.mxu1 %v1945_v54 }
  0x7a   : > { %949 = vmatmul.mubr.bf16.gmra.mrb[12].mxu0 %v1936_v55  ;;  %1807 = vmatprep.subr.bf16.mxu1 %v1946_v58 }
  0x7b   : > { %1041 = vmatpush1.bf16.msra.mxu0 %v1937_v56  ;;  %1060 = vmatprep.mubr.bf16.mxu0 %v1988_v0 }
  0x7c   : > { %1042 = vmatprep.subr.bf16.mxu0 %v1943_v57  ;;  %1020 = vmatmul.mubr.bf16.gmra.mrb[12].mxu1 %v1936_v55 }
  0x7d   : > { %1808 = vmatpush3.bf16.msra.mxu1 %v1946_v58  ;;  %1811 = vmatprep.mubr.bf16.mxu1 %v2230_v30 }
  0x7e   : > { %1809 = vmatprep.subr.bf16.mxu1 %v1947_v60 }
  0x7f   : > { %1043 = vmatpush1.bf16.msra.mxu0 %v1941_v59 }
  0x81   : > { %1810 = vmatpush3.bf16.msra.mxu1 %v1947_v60 }
  0x82   : > { %1061 = vmatmul.mubr.bf16.vlgmr.msra.gmra.mrb[16].mxu0 %v2230_v30 }
  0x83   : > { %1070 = vmatprep.mubr.bf16.mxu0 %v1988_v0 }
  0x84   : > { %1812 = vmatmul.mubr.bf16.vlgmr.msra.gmra.mrb[16].mxu1 %v2247_v41 }
  0x85   : > { %1815 = vmatprep.mubr.bf16.mxu1 %v1927_v48 }
  0x8a   : > { %1071 = vmatmul.mubr.bf16.gmra.mrb[20].mxu0 %v2247_v41 }
  0x8b   : > { %1080 = vmatprep.mubr.bf16.mxu0 %v1988_v0 }
  0x8c   : > { %1816 = vmatmul.mubr.bf16.gmra.mrb[20].mxu1 %v1936_v55 }
  0x92   : > { %1081 = vmatmul.mubr.bf16.gmra.mrb[24].mxu0 %v1927_v48 }
  0x93   : > { %1090 = vmatprep.mubr.bf16.mxu0 %v1988_v0  ;;  %v2301_v0 = vrot.slane %v2295_v1, %v1317_v63 }
  0x9a   : > { %1091 = vmatmul.mubr.bf16.gmra.mrb[28].mxu0 %v1936_v55 }
 0x135   : > { %v920_v3 = vpop.f32.mrb[0].mxu0 }
 0x136   : > { %v922_v6 = vpop.f32.mrb[1].mxu0  ;;  %v1350_v9 = vadd.f32 %v2301_v0, %v920_v3 }
 0x137   : > { %v924_v8 = vpop.f32.mrb[2].mxu0  ;;  %v1351_v11 = vadd.f32 %v2304_v4, %v922_v6  ;;  %v991_v14 = vpop.f32.mrb[0].mxu1 }
 0x138   : > { %v926_v10 = vpop.f32.mrb[3].mxu0  ;;  %1399 = vst [vmem:[%s2313_s12] sm:$0xff] %v1350_v9  ;;  %v1357_v13 = vadd.f32 %v2301_v0, %v924_v8  ;;  %v993_v17 = vpop.f32.mrb[1].mxu1  ;;  %v1352_v20 = vadd.f32 %v2311_v12, %v991_v14  ;;  %v2374_v8 = vrot.slane %v2295_v1, %v1337_v2 }
 0x139   : > { %1400 = vst [vmem:[%s2313_s12 + $0x8] sm:$0xff] %v1351_v11  ;;  %v1358_v16 = vadd.f32 %v2304_v4, %v926_v10  ;;  %v995_v18 = vpop.f32.mrb[2].mxu1  ;;  %v1353_v23 = vadd.f32 %v2318_v15, %v993_v17  ;;  %v1341_v10 = vsub.s32 6, %v2289_v62 }
 0x13a   : > { %1406 = vst [vmem:[%s2313_s12 + $0x38] sm:$0xff] %v1357_v13  ;;  %v997_v21 = vpop.f32.mrb[3].mxu1  ;;  %1401 = vst [vmem:[%s2313_s12 + $0x10] sm:$0xff] %v1352_v20  ;;  %v1359_v25 = vadd.f32 %v2311_v12, %v995_v18 }
 0x13b   : > { %1407 = vst [vmem:[%s2313_s12 + $0x40] sm:$0xff] %v1358_v16  ;;  %1402 = vst [vmem:[%s2313_s12 + $0x18] sm:$0xff] %v1353_v23  ;;  %v1360_v28 = vadd.f32 %v2318_v15, %v997_v21 }
 0x13c   : > { %1408 = vst [vmem:[%s2313_s12 + $0x48] sm:$0xff] %v1359_v25 }
 0x13d   : > { %v930_v19 = vpop.f32.mrb[4].mxu0  ;;  %1409 = vst [vmem:[%s2313_s12 + $0x50] sm:$0xff] %v1360_v28 }
 0x13e   : > { %v932_v22 = vpop.f32.mrb[5].mxu0  ;;  %v1364_v26 = vadd.f32 %v2301_v0, %v930_v19  ;;  %v1342_v19 = vrot.slane %v2295_v1, %v1341_v10 }
 0x13f   : > { %v934_v24 = vpop.f32.mrb[6].mxu0  ;;  %v1365_v29 = vadd.f32 %v2304_v4, %v932_v22  ;;  %v1001_v31 = vpop.f32.mrb[4].mxu1 }
 0x140   : > { %v936_v27 = vpop.f32.mrb[7].mxu0  ;;  %1413 = vst [vmem:[%s2313_s12 + $0x70] sm:$0xff] %v1364_v26  ;;  %v1371_v30 = vadd.f32 %v2301_v0, %v934_v24  ;;  %v1003_v33 = vpop.f32.mrb[5].mxu1  ;;  %v1366_v36 = vadd.f32 %v2311_v12, %v1001_v31 }
 0x141   : > { %1414 = vst [vmem:[%s2313_s12 + $0x78] sm:$0xff] %v1365_v29  ;;  %v1372_v32 = vadd.f32 %v2304_v4, %v936_v27  ;;  %v1005_v34 = vpop.f32.mrb[6].mxu1  ;;  %v1367_v39 = vadd.f32 %v2318_v15, %v1003_v33 }
 0x142   : > { %1420 = vst [vmem:[%s2313_s12 + $0xa8] sm:$0xff] %v1371_v30  ;;  %v1007_v37 = vpop.f32.mrb[7].mxu1  ;;  %1415 = vst [vmem:[%s2313_s12 + $0x80] sm:$0xff] %v1366_v36  ;;  %v1373_v41 = vadd.f32 %v2311_v12, %v1005_v34  ;;  %v1489_v2 = vld [vmem:[%s2313_s12 + $0x40] sm:$0xff] (%p2044_p6) }
 0x143   : > { %1421 = vst [vmem:[%s2313_s12 + $0xb0] sm:$0xff] %v1372_v32  ;;  %1416 = vst [vmem:[%s2313_s12 + $0x88] sm:$0xff] %v1367_v39  ;;  %v1374_v44 = vadd.f32 %v2318_v15, %v1007_v37 }
 0x144   : > { %1422 = vst [vmem:[%s2313_s12 + $0xb8] sm:$0xff] %v1373_v41  ;;  %1490 = vst [vmem:[%s2429_s29 + $0x78] sm:$0xff] (%p2044_p6), %v1489_v2 }
 0x145   : > { %v940_v35 = vpop.f32.mrb[8].mxu0  ;;  %1423 = vst [vmem:[%s2313_s12 + $0xc0] sm:$0xff] %v1374_v44 }
 0x146   : > { %v942_v38 = vpop.f32.mrb[9].mxu0  ;;  %v1378_v42 = vadd.f32 %v2301_v0, %v940_v35 }
 0x147   : > { %v944_v40 = vpop.f32.mrb[10].mxu0  ;;  %v1379_v45 = vadd.f32 %v2304_v4, %v942_v38  ;;  %v1011_v47 = vpop.f32.mrb[8].mxu1 }
 0x148   : > { %v946_v43 = vpop.f32.mrb[11].mxu0  ;;  %1427 = vst [vmem:[%s2313_s12 + $0xe0] sm:$0xff] %v1378_v42  ;;  %v1385_v46 = vadd.f32 %v2301_v0, %v944_v40  ;;  %v1013_v49 = vpop.f32.mrb[9].mxu1  ;;  %v1380_v52 = vadd.f32 %v2311_v12, %v1011_v47 }
 0x149   : > { %1428 = vst [vmem:[%s2313_s12 + $0xe8] sm:$0xff] %v1379_v45  ;;  %v1386_v48 = vadd.f32 %v2304_v4, %v946_v43  ;;  %v1015_v50 = vpop.f32.mrb[10].mxu1  ;;  %v1381_v55 = vadd.f32 %v2318_v15, %v1013_v49 }
 0x14a   : > { %1434 = vst [vmem:[%s2313_s12 + $0x118] sm:$0xff] %v1385_v46  ;;  %v1017_v53 = vpop.f32.mrb[11].mxu1  ;;  %1429 = vst [vmem:[%s2313_s12 + $0xf0] sm:$0xff] %v1380_v52  ;;  %v1387_v57 = vadd.f32 %v2311_v12, %v1015_v50  ;;  %v1507_v10 = vld [vmem:[%s2313_s12 + $0x88] sm:$0xff] (%p2044_p6) }
 0x14b   : > { %1435 = vst [vmem:[%s2313_s12 + $0x120] sm:$0xff] %v1386_v48  ;;  %1430 = vst [vmem:[%s2313_s12 + $0xf8] sm:$0xff] %v1381_v55  ;;  %v1388_v60 = vadd.f32 %v2318_v15, %v1017_v53  ;;  %v1473_v55 = vld [vmem:[%s2313_s12] sm:$0xff] (%p2044_p6) }
 0x14c   : > { %1436 = vst [vmem:[%s2313_s12 + $0x128] sm:$0xff] %v1387_v57  ;;  %v1477_v57 = vld [vmem:[%s2313_s12 + $0x10] sm:$0xff] (%p2044_p6)  ;;  %1474 = vst [vmem:[%s2429_s29] sm:$0xff] (%p2044_p6), %v1473_v55 }
 0x14d   : > { %v950_v51 = vpop.f32.mrb[12].mxu0  ;;  %1437 = vst [vmem:[%s2313_s12 + $0x130] sm:$0xff] %v1388_v60  ;;  %1478 = vst [vmem:[%s2429_s29 + $0x10] sm:$0xff] (%p2044_p6), %v1477_v57 }
 0x14e   : > { %v952_v54 = vpop.f32.mrb[13].mxu0  ;;  %v1392_v58 = vadd.f32 %v2301_v0, %v950_v51  ;;  %v2371_v0 = vrot.slane %v2295_v1, %v1333_v61  ;;  %1508 = vst [vmem:[%s2429_s29 + $0xf8] sm:$0xff] (%p2044_p6), %v1507_v10 }
 0x14f   : > { %v954_v56 = vpop.f32.mrb[14].mxu0  ;;  %v1393_v63 = vadd.f32 %v2304_v4, %v952_v54  ;;  %v1021_v3 = vpop.f32.mrb[12].mxu1 }
 0x150   : > { %v955_v59 = vpop.f32.mrb[15].mxu0  ;;  %1441 = vst [vmem:[%s2313_s12 + $0x150] sm:$0xff] %v1392_v58  ;;  %v1023_v5 = vpop.f32.mrb[13].mxu1  ;;  %v1394_v4 = vadd.f32 %v2311_v12, %v1021_v3  ;;  %v1475_v56 = vld [vmem:[%s2313_s12 + $0x8] sm:$0xff] (%p2044_p6)  ;;  %v1479_v58 = vld [vmem:[%s2313_s12 + $0x18] sm:$0xff] (%p2044_p6) }
 0x151   : > { %1442 = vst [vmem:[%s2313_s12 + $0x158] sm:$0xff] %v1393_v63  ;;  %v1025_v6 = vpop.f32.mrb[14].mxu1  ;;  %v1395_v13 = vadd.f32 %v2318_v15, %v1023_v5  ;;  %v1487_v63 = vld [vmem:[%s2313_s12 + $0x38] sm:$0xff] (%p2044_p6)  ;;  %1476 = vst [vmem:[%s2429_s29 + $0x8] sm:$0xff] (%p2044_p6), %v1475_v56  ;;  %v1491_v3 = vld [vmem:[%s2313_s12 + $0x48] sm:$0xff] (%p2044_p6) }
 0x152   : > { %v1026_v9 = vpop.f32.mrb[15].mxu1  ;;  %1443 = vst [vmem:[%s2313_s12 + $0x160] sm:$0xff] %v1394_v4  ;;  %1480 = vst [vmem:[%s2429_s29 + $0x18] sm:$0xff] (%p2044_p6), %v1479_v58  ;;  %v1493_v5 = vld [vmem:[%s2313_s12 + $0x50] sm:$0xff] (%p2044_p6)  ;;  %v1503_v4 = vld [vmem:[%s2313_s12 + $0x78] sm:$0xff] (%p2044_p6) }
 0x153   : > { %1444 = vst [vmem:[%s2313_s12 + $0x168] sm:$0xff] %v1395_v13  ;;  %1488 = vst [vmem:[%s2429_s29 + $0x70] sm:$0xff] (%p2044_p6), %v1487_v63  ;;  %v1505_v9 = vld [vmem:[%s2313_s12 + $0x80] sm:$0xff] (%p2044_p6) }
 0x154   : > { %1492 = vst [vmem:[%s2429_s29 + $0x80] sm:$0xff] (%p2044_p6), %v1491_v3  ;;  %1494 = vst [vmem:[%s2429_s29 + $0x88] sm:$0xff] (%p2044_p6), %v1493_v5 }
 0x155   : > { %v1062_v7 = vpop.f32.mrb[16].mxu0  ;;  %1504 = vst [vmem:[%s2429_s29 + $0xe8] sm:$0xff] (%p2044_p6), %v1503_v4  ;;  %1506 = vst [vmem:[%s2429_s29 + $0xf0] sm:$0xff] (%p2044_p6), %v1505_v9 }
 0x156   : > { %v1064_v11 = vpop.f32.mrb[17].mxu0  ;;  %v1354_v16 = vadd.f32 %v2371_v0, %v1062_v7 }
 0x157   : > { %v1066_v14 = vpop.f32.mrb[18].mxu0  ;;  %v1355_v18 = vadd.f32 %v2374_v8, %v1064_v11  ;;  %v1813_v62 = vpop.f32.mrb[16].mxu1 }
 0x158   : > { %v1068_v17 = vpop.f32.mrb[19].mxu0  ;;  %1403 = vst [vmem:[%s2313_s12 + $0x20] sm:$0xff] %v1354_v16  ;;  %v1361_v12 = vadd.f32 %v2371_v0, %v1066_v14  ;;  %v1133_v20 = vpop.f32.mrb[17].mxu1  ;;  %v1370_v23 = vadd.f32 %v1813_v62, %v1342_v19  ;;  %v1515_v16 = vld [vmem:[%s2313_s12 + $0xa8] sm:$0xff] (%p2044_p6) }
 0x159   : > { %1404 = vst [vmem:[%s2313_s12 + $0x28] sm:$0xff] %v1355_v18  ;;  %v1362_v15 = vadd.f32 %v2374_v8, %v1068_v17  ;;  %v1814_v21 = vpop.f32.mrb[18].mxu1  ;;  %v1356_v25 = vadd.f32 %v1342_v19, %v1133_v20  ;;  %v1517_v17 = vld [vmem:[%s2313_s12 + $0xb0] sm:$0xff] (%p2044_p6)  ;;  %v1519_v18 = vld [vmem:[%s2313_s12 + $0xb8] sm:$0xff] (%p2044_p6)  ;;  %1516 = vst [vmem:[%s2429_s29 + $0x150] sm:$0xff] (%p2044_p6), %v1515_v16 }
 0x15a   : > { %1410 = vst [vmem:[%s2313_s12 + $0x58] sm:$0xff] %v1361_v12  ;;  %v1136_v24 = vpop.f32.mrb[19].mxu1  ;;  %1419 = vst [vmem:[%s2313_s12 + $0xa0] sm:$0xff] %v1370_v23  ;;  %v1377_v27 = vadd.f32 %v1814_v21, %v1342_v19  ;;  %v1529_v20 = vld [vmem:[%s2313_s12 + $0xe0] sm:$0xff] (%p2044_p6)  ;;  %v1531_v21 = vld [vmem:[%s2313_s12 + $0xe8] sm:$0xff] (%p2044_p6) }
 0x15b   : > { %1411 = vst [vmem:[%s2313_s12 + $0x60] sm:$0xff] %v1362_v15  ;;  %1405 = vst [vmem:[%s2313_s12 + $0x30] sm:$0xff] %v1356_v25  ;;  %v1363_v30 = vadd.f32 %v1342_v19, %v1136_v24  ;;  %v1535_v23 = vld [vmem:[%s2313_s12 + $0xf8] sm:$0xff] (%p2044_p6) }
 0x15c   : > { %1426 = vst [vmem:[%s2313_s12 + $0xd8] sm:$0xff] %v1377_v27  ;;  %1518 = vst [vmem:[%s2429_s29 + $0x158] sm:$0xff] (%p2044_p6), %v1517_v17  ;;  %v1545_v27 = vld [vmem:[%s2313_s12 + $0x120] sm:$0xff] (%p2044_p6) }
 0x15d   : > { %v1072_v22 = vpop.f32.mrb[20].mxu0  ;;  %1412 = vst [vmem:[%s2313_s12 + $0x68] sm:$0xff] %v1363_v30  ;;  %1520 = vst [vmem:[%s2429_s29 + $0x160] sm:$0xff] (%p2044_p6), %v1519_v18 }
 0x15e   : > { %v1074_v1 = vpop.f32.mrb[21].mxu0  ;;  %v1368_v28 = vadd.f32 %v2371_v0, %v1072_v22  ;;  %1530 = vst [vmem:[%s2429_s29 + $0x1c0] sm:$0xff] (%p2044_p6), %v1529_v20  ;;  %1532 = vst [vmem:[%s2429_s29 + $0x1c8] sm:$0xff] (%p2044_p6), %v1531_v21  ;;  %v1533_v22 = vld [vmem:[%s2313_s12 + $0xf0] sm:$0xff] (%p2044_p6) }
 0x15f   : > { %v1076_v26 = vpop.f32.mrb[22].mxu0  ;;  %v1369_v31 = vadd.f32 %v2374_v8, %v1074_v1  ;;  %v1817_v33 = vpop.f32.mrb[20].mxu1  ;;  %v1481_v59 = vld [vmem:[%s2313_s12 + $0x20] sm:$0xff] (%p2044_p6)  ;;  %1534 = vst [vmem:[%s2429_s29 + $0x1d0] sm:$0xff] (%p2044_p6), %v1533_v22  ;;  %1536 = vst [vmem:[%s2429_s29 + $0x1d8] sm:$0xff] (%p2044_p6), %v1535_v23 }
 0x160   : > { %v1078_v29 = vpop.f32.mrb[23].mxu0  ;;  %1417 = vst [vmem:[%s2313_s12 + $0x90] sm:$0xff] %v1368_v28  ;;  %v1375_v32 = vadd.f32 %v2371_v0, %v1076_v26  ;;  %v1149_v35 = vpop.f32.mrb[21].mxu1  ;;  %v1398_v38 = vadd.f32 %v1817_v33, %v1342_v19  ;;  %v1483_v60 = vld [vmem:[%s2313_s12 + $0x28] sm:$0xff] (%p2044_p6)  ;;  %1482 = vst [vmem:[%s2429_s29 + $0x20] sm:$0xff] (%p2044_p6), %v1481_v59  ;;  %v1543_v26 = vld [vmem:[%s2313_s12 + $0x118] sm:$0xff] (%p2044_p6) }
 0x161   : > { %1418 = vst [vmem:[%s2313_s12 + $0x98] sm:$0xff] %v1369_v31  ;;  %v1376_v34 = vadd.f32 %v2374_v8, %v1078_v29  ;;  %v1818_v36 = vpop.f32.mrb[22].mxu1  ;;  %v1384_v41 = vadd.f32 %v1342_v19, %v1149_v35  ;;  %1484 = vst [vmem:[%s2429_s29 + $0x28] sm:$0xff] (%p2044_p6), %v1483_v60  ;;  %v1513_v14 = vld [vmem:[%s2313_s12 + $0xa0] sm:$0xff] (%p2044_p6)  ;;  %v1547_v28 = vld [vmem:[%s2313_s12 + $0x128] sm:$0xff] (%p2044_p6) }
 0x162   : > { %1424 = vst [vmem:[%s2313_s12 + $0xc8] sm:$0xff] %v1375_v32  ;;  %v1152_v39 = vpop.f32.mrb[23].mxu1  ;;  %1447 = vst [vmem:[%s2313_s12 + $0x180] sm:$0xff] %v1398_v38  ;;  %v1485_v61 = vld [vmem:[%s2313_s12 + $0x30] sm:$0xff] (%p2044_p6)  ;;  %v1497_v6 = vld [vmem:[%s2313_s12 + $0x60] sm:$0xff] (%p2044_p6) }
 0x163   : > { %1425 = vst [vmem:[%s2313_s12 + $0xd0] sm:$0xff] %v1376_v34  ;;  %1433 = vst [vmem:[%s2313_s12 + $0x110] sm:$0xff] %v1384_v41  ;;  %v1391_v45 = vadd.f32 %v1342_v19, %v1152_v39  ;;  %v1521_v19 = vld [vmem:[%s2313_s12 + $0xc0] sm:$0xff] (%p2044_p6)  ;;  %v1527_v15 = vld [vmem:[%s2313_s12 + $0xd8] sm:$0xff] (%p2044_p6) }
 0x164   : > { %1486 = vst [vmem:[%s2429_s29 + $0x30] sm:$0xff] (%p2044_p6), %v1485_v61  ;;  %v1499_v7 = vld [vmem:[%s2313_s12 + $0x68] sm:$0xff] (%p2044_p6)  ;;  %1498 = vst [vmem:[%s2429_s29 + $0x98] sm:$0xff] (%p2044_p6), %v1497_v6  ;;  %v1549_v29 = vld [vmem:[%s2313_s12 + $0x130] sm:$0xff] (%p2044_p6) }
 0x165   : > { %v1082_v37 = vpop.f32.mrb[24].mxu0  ;;  %1440 = vst [vmem:[%s2313_s12 + $0x148] sm:$0xff] %v1391_v45  ;;  %1500 = vst [vmem:[%s2429_s29 + $0xa0] sm:$0xff] (%p2044_p6), %v1499_v7  ;;  %v1557_v33 = vld [vmem:[%s2313_s12 + $0x150] sm:$0xff] (%p2044_p6)  ;;  %v1559_v34 = vld [vmem:[%s2313_s12 + $0x158] sm:$0xff] (%p2044_p6) }
 0x166   : > { %v1084_v40 = vpop.f32.mrb[25].mxu0  ;;  %v1382_v43 = vadd.f32 %v2371_v0, %v1082_v37  ;;  %1514 = vst [vmem:[%s2429_s29 + $0x110] sm:$0xff] (%p2044_p6), %v1513_v14  ;;  %1522 = vst [vmem:[%s2429_s29 + $0x168] sm:$0xff] (%p2044_p6), %v1521_v19  ;;  %v1561_v35 = vld [vmem:[%s2313_s12 + $0x160] sm:$0xff] (%p2044_p6)  ;;  %v1563_v36 = vld [vmem:[%s2313_s12 + $0x168] sm:$0xff] (%p2044_p6) }
 0x167   : > { %v1086_v42 = vpop.f32.mrb[26].mxu0  ;;  %v1383_v46 = vadd.f32 %v2374_v8, %v1084_v40  ;;  %v1509_v11 = vld [vmem:[%s2313_s12 + $0x90] sm:$0xff] (%p2044_p6)  ;;  %1528 = vst [vmem:[%s2429_s29 + $0x180] sm:$0xff] (%p2044_p6), %v1527_v15  ;;  %1544 = vst [vmem:[%s2429_s29 + $0x230] sm:$0xff] (%p2044_p6), %v1543_v26 }
 0x168   : > { %v1088_v44 = vpop.f32.mrb[27].mxu0  ;;  %1431 = vst [vmem:[%s2313_s12 + $0x100] sm:$0xff] %v1382_v43  ;;  %v1389_v47 = vadd.f32 %v2371_v0, %v1086_v42  ;;  %v1511_v13 = vld [vmem:[%s2313_s12 + $0x98] sm:$0xff] (%p2044_p6)  ;;  %1510 = vst [vmem:[%s2429_s29 + $0x100] sm:$0xff] (%p2044_p6), %v1509_v11 }
 0x169   : > { %1432 = vst [vmem:[%s2313_s12 + $0x108] sm:$0xff] %v1383_v46  ;;  %v1390_v48 = vadd.f32 %v2374_v8, %v1088_v44  ;;  %1512 = vst [vmem:[%s2429_s29 + $0x108] sm:$0xff] (%p2044_p6), %v1511_v13  ;;  %v1523_v12 = vld [vmem:[%s2313_s12 + $0xc8] sm:$0xff] (%p2044_p6)  ;;  %v1569_v39 = vld [vmem:[%s2313_s12 + $0x180] sm:$0xff] (%p2044_p6) }
 0x16a   : > { %1438 = vst [vmem:[%s2313_s12 + $0x138] sm:$0xff] %v1389_v47  ;;  %v1525_v62 = vld [vmem:[%s2313_s12 + $0xd0] sm:$0xff] (%p2044_p6)  ;;  %1524 = vst [vmem:[%s2429_s29 + $0x170] sm:$0xff] (%p2044_p6), %v1523_v12 }
 0x16b   : > { %1439 = vst [vmem:[%s2313_s12 + $0x140] sm:$0xff] %v1390_v48  ;;  %1454 = sbr.rel (!%p2044_p6) target bundleno = 378 (0x17a), region = 70  ;;  %1526 = vst [vmem:[%s2429_s29 + $0x178] sm:$0xff] (%p2044_p6), %v1525_v62  ;;  %v1541_v25 = vld [vmem:[%s2313_s12 + $0x110] sm:$0xff] (%p2044_p6) }
 0x16c   : > { %1542 = vst [vmem:[%s2429_s29 + $0x1f0] sm:$0xff] (%p2044_p6), %v1541_v25  ;;  %1546 = vst [vmem:[%s2429_s29 + $0x238] sm:$0xff] (%p2044_p6), %v1545_v27  ;;  %v1555_v32 = vld [vmem:[%s2313_s12 + $0x148] sm:$0xff] (%p2044_p6) }
 0x16d   : > { %v1092_v49 = vpop.f32.mrb[28].mxu0  ;;  %1548 = vst [vmem:[%s2429_s29 + $0x240] sm:$0xff] (%p2044_p6), %v1547_v28  ;;  %1550 = vst [vmem:[%s2429_s29 + $0x248] sm:$0xff] (%p2044_p6), %v1549_v29 }
 0x16e   : > { %v1094_v50 = vpop.f32.mrb[29].mxu0  ;;  %v1396_v52 = vadd.f32 %v2371_v0, %v1092_v49  ;;  %v1495_v0 = vld [vmem:[%s2313_s12 + $0x58] sm:$0xff] (%p2044_p6)  ;;  %1556 = vst [vmem:[%s2429_s29 + $0x260] sm:$0xff] (%p2044_p6), %v1555_v32  ;;  %1558 = vst [vmem:[%s2429_s29 + $0x2a0] sm:$0xff] (%p2044_p6), %v1557_v33 }
 0x16f   : > { %v1096_v51 = vpop.f32.mrb[30].mxu0  ;;  %v1397_v54 = vadd.f32 %v2374_v8, %v1094_v50  ;;  %1496 = vst [vmem:[%s2429_s29 + $0x90] sm:$0xff] (%p2044_p6), %v1495_v0  ;;  %v1501_v8 = vld [vmem:[%s2313_s12 + $0x70] sm:$0xff] (%p2044_p6)  ;;  %v1537_v24 = vld [vmem:[%s2313_s12 + $0x100] sm:$0xff] (%p2044_p6)  ;;  %1560 = vst [vmem:[%s2429_s29 + $0x2a8] sm:$0xff] (%p2044_p6), %v1559_v34 }
 0x170   : > { %v1097_v53 = vpop.f32.mrb[31].mxu0  ;;  %1445 = vst [vmem:[%s2313_s12 + $0x170] sm:$0xff] %v1396_v52  ;;  %1502 = vst [vmem:[%s2429_s29 + $0xe0] sm:$0xff] (%p2044_p6), %v1501_v8  ;;  %v1539_v1 = vld [vmem:[%s2313_s12 + $0x108] sm:$0xff] (%p2044_p6) }
 0x171   : > { %1446 = vst [vmem:[%s2313_s12 + $0x178] sm:$0xff] %v1397_v54  ;;  %1538 = vst [vmem:[%s2429_s29 + $0x1e0] sm:$0xff] (%p2044_p6), %v1537_v24  ;;  %v1551_v30 = vld [vmem:[%s2313_s12 + $0x138] sm:$0xff] (%p2044_p6) }
 0x172   : > { %1540 = vst [vmem:[%s2429_s29 + $0x1e8] sm:$0xff] %v1539_v1  ;;  %v1553_v31 = vld [vmem:[%s2313_s12 + $0x140] sm:$0xff]  ;;  %1552 = vst [vmem:[%s2429_s29 + $0x250] sm:$0xff] %v1551_v30 }
 0x173   : > { %1554 = vst [vmem:[%s2429_s29 + $0x258] sm:$0xff] %v1553_v31  ;;  %1562 = vst [vmem:[%s2429_s29 + $0x2b0] sm:$0xff] %v1561_v35 }
 0x174   : > { %1564 = vst [vmem:[%s2429_s29 + $0x2b8] sm:$0xff] %v1563_v36  ;;  %1570 = vst [vmem:[%s2429_s29 + $0x2d0] sm:$0xff] %v1569_v39 }
 0x177   : > { %v1565_v37 = vld [vmem:[%s2313_s12 + $0x170] sm:$0xff] }
 0x178   : > { %v1567_v38 = vld [vmem:[%s2313_s12 + $0x178] sm:$0xff]  ;;  %1566 = vst [vmem:[%s2429_s29 + $0x2c0] sm:$0xff] %v1565_v37 }
 0x179   : > { %1568 = vst [vmem:[%s2429_s29 + $0x2c8] sm:$0xff] %v1567_v38 }
 0x17a PF: > { %s13_s16 = sadd.s32 1, %s1986_s16   ;;  %s2543_s12 = smov %s1974_s13 }
 0x17b   : > { %p10_p12 = scmp.ge.s32.totalorder %s13_s16, 4   ;;  %s2544_s13 = smov %s2049_s22 }
 0x17c   : > { %s2545_s14 = smov %s1982_s15  ;;  %s2546_s15 = smov %s2548_s17 }
 0x17d   :  { %12 = sbr.rel (!%p10_p12) target bundleno = 3 (0x3), region = 136 }

// kernel: decoder_forward.8
= control target key start
LH: loop header
LB: loop body
LE: loop exit
PB: predicated region body
PF: predicated region fallthrough
CT: control target
= control target key end

     0   :  { %s2805_s12 = smov 0   ;;  %s2807_s13 = smov 0   ;;  %s3619_s0 = inlined_call_operand.vmem [shape: bf16[344,128], index: 0, kind: input, shape index: {}]   ;;  %s3620_s1 = inlined_call_operand.vmem [shape: bf16[128,1152], index: 1, kind: input, shape index: {}]   ;;  %s3621_s2 = inlined_call_operand.vmem [shape: f32[1,1152], index: 2, kind: input, shape index: {}]   ;;  %s3622_s3 = inlined_call_operand.vmem [shape: f32[344,1152], index: 3, kind: output, shape index: {}]  }
   0x1   :  { %s2809_s14 = smov 0   ;;  %s2811_s15 = smov 0  }
   0x2   :  { %s2813_s16 = smov 0  }
   0x3 LB: > { %s28_s17 = sadd.s32 1, %s2778_s15  ;;  %s2449_s18 = sadd.s32 4294967295, %s2782_s16   ;;  %s2782_s16 = sphi %s2813_s16, %s13_s16   ;;  %s2778_s15 = sphi %s2811_s15, %s3627_s15   ;;  %s2774_s14 = sphi %s2809_s14, %s3626_s14   ;;  %s2770_s13 = sphi %s2807_s13, %s3625_s13   ;;  %s2766_s12 = sphi %s2805_s12, %s3624_s12  }
   0x4   : > { %p30_p0 = scmp.ge.s32.totalorder %s28_s17, 3  ;;  %p76_p1 = scmp.ne.s32.totalorder %s2770_s13, %s2766_s12 }
   0x5   : > { %p77_p2 = scmp.eq.s32.totalorder %s2782_s16, 0  ;;  %p134_p4 = scmp.eq.s32.totalorder %s2449_s18, 2 }
   0x6   : > { %s3629_s17 = smov (%p30_p0, %s28_s17), 0  ;;  %s69_s20 = sadd.s32 1, %s2770_s13 }
   0x7   : > { %p78_p3 = por %p77_p2, %p76_p1  ;;  %s65_s19 = ssub.s32 %s2778_s15, %s3629_s17 }
   0x8   : > { %p67_p5 = scmp.eq.s32.totalorder %s65_s19, 0  ;;  %p2840_p6 = por %p134_p4, %p76_p1 }
   0x9   : > { %p2453_p7 = scmp.ge.s32.totalorder %s2782_s16, 3 }
   0xa   : > { %s2845_s22 = scalar_select %p67_p5, %s2770_s13, %s69_s20  }
   0xb   : > { %168 = sbr.rel (%p2453_p7) target bundleno = 41 (0x29), region = 20 }
  0x12   : > { %171 = sbr.rel (!%p78_p3) target bundleno = 41 (0x29), region = 24  ;;  %s173_s23 = sand.u32 (%p78_p3), 1, %s2770_s13  }
  0x13   : > { %s2537_s24 = smul.u32 (%p78_p3), 12, %s2778_s15 }
  0x14   : > { %s2645_s25 = smul.u32 (%p78_p3), 192, %s173_s23 }
  0x15   : > { %s2853_s28 = scalar_lea.vmem (%p78_p3), %s3620_s1, %s2537_s24 }
  0x16   : > { %v196_v0 = vld [vmem:[%s2853_s28] sm:$0xff] (%p78_p3)  ;;  %v200_v2 = vld [vmem:[%s2853_s28 + $0x48] sm:$0xff] (%p78_p3)  ;;  %s2858_s29 = scalar_lea.vmem (%p78_p3), [#allocation2], %s2645_s25  ;;  %v204_v4 = vld [vmem:[%s2853_s28 + $0x90] sm:$0xff] (%p78_p3) }
  0x17   : > { %v198_v1 = vld [vmem:[%s2853_s28 + $0x24] sm:$0xff] (%p78_p3)  ;;  %197 = vst [vmem:[%s2858_s29] sm:$0xff] (%p78_p3), %v196_v0  ;;  %201 = vst [vmem:[%s2858_s29 + $0x18] sm:$0xff] (%p78_p3), %v200_v2  ;;  %v202_v3 = vld [vmem:[%s2853_s28 + $0x6c] sm:$0xff] (%p78_p3) }
  0x18   : > { %199 = vst [vmem:[%s2858_s29 + $0xc] sm:$0xff] (%p78_p3), %v198_v1  ;;  %v206_v5 = vld [vmem:[%s2853_s28 + $0xb4] sm:$0xff] (%p78_p3)  ;;  %203 = vst [vmem:[%s2858_s29 + $0x24] sm:$0xff] (%p78_p3), %v202_v3  ;;  %v210_v7 = vld [vmem:[%s2853_s28 + $0xfc] sm:$0xff] (%p78_p3) }
  0x19   : > { %205 = vst [vmem:[%s2858_s29 + $0x30] sm:$0xff] %v204_v4  ;;  %207 = vst [vmem:[%s2858_s29 + $0x3c] sm:$0xff] %v206_v5  ;;  %v208_v6 = vld [vmem:[%s2853_s28 + $0xd8] sm:$0xff]  ;;  %v212_v8 = vld [vmem:[%s2853_s28 + $0x120] sm:$0xff] }
  0x1a   : > { %209 = vst [vmem:[%s2858_s29 + $0x48] sm:$0xff] %v208_v6  ;;  %211 = vst [vmem:[%s2858_s29 + $0x54] sm:$0xff] %v210_v7  ;;  %v214_v9 = vld [vmem:[%s2853_s28 + $0x144] sm:$0xff]  ;;  %v218_v11 = vld [vmem:[%s2853_s28 + $0x18c] sm:$0xff] }
  0x1b   : > { %213 = vst [vmem:[%s2858_s29 + $0x60] sm:$0xff] %v212_v8  ;;  %v216_v10 = vld [vmem:[%s2853_s28 + $0x168] sm:$0xff]  ;;  %215 = vst [vmem:[%s2858_s29 + $0x6c] sm:$0xff] %v214_v9  ;;  %v220_v12 = vld [vmem:[%s2853_s28 + $0x1b0] sm:$0xff] }
  0x1c   : > { %217 = vst [vmem:[%s2858_s29 + $0x78] sm:$0xff] %v216_v10  ;;  %219 = vst [vmem:[%s2858_s29 + $0x84] sm:$0xff] %v218_v11  ;;  %v222_v13 = vld [vmem:[%s2853_s28 + $0x1d4] sm:$0xff]  ;;  %v226_v15 = vld [vmem:[%s2853_s28 + $0x21c] sm:$0xff] }
  0x1d   : > { %v224_v14 = vld [vmem:[%s2853_s28 + $0x1f8] sm:$0xff]  ;;  %221 = vst [vmem:[%s2858_s29 + $0x90] sm:$0xff] %v220_v12  ;;  %223 = vst [vmem:[%s2858_s29 + $0x9c] sm:$0xff] %v222_v13  ;;  %v2455_v16 = vld [vmem:[%s2853_s28 + $0x8] sm:$0xf] }
  0x1e   : > { %225 = vst [vmem:[%s2858_s29 + $0xa8] sm:$0xff] %v224_v14  ;;  %v2457_v17 = vld [vmem:[%s2853_s28 + $0x2c] sm:$0xf]  ;;  %227 = vst [vmem:[%s2858_s29 + $0xb4] sm:$0xff] %v226_v15  ;;  %v2459_v18 = vld [vmem:[%s2853_s28 + $0x50] sm:$0xf] }
  0x1f   : > { %2456 = vst [vmem:[%s2858_s29 + $0x8] sm:$0xf] %v2455_v16  ;;  %2458 = vst [vmem:[%s2858_s29 + $0x14] sm:$0xf] %v2457_v17  ;;  %v2461_v19 = vld [vmem:[%s2853_s28 + $0x74] sm:$0xf] }
  0x20   : > { %v2463_v20 = vld [vmem:[%s2853_s28 + $0x98] sm:$0xf]  ;;  %2460 = vst [vmem:[%s2858_s29 + $0x20] sm:$0xf] %v2459_v18  ;;  %2462 = vst [vmem:[%s2858_s29 + $0x2c] sm:$0xf] %v2461_v19 }
  0x21   : > { %2464 = vst [vmem:[%s2858_s29 + $0x38] sm:$0xf] %v2463_v20  ;;  %v2465_v21 = vld [vmem:[%s2853_s28 + $0xbc] sm:$0xf]  ;;  %v2467_v22 = vld [vmem:[%s2853_s28 + $0xe0] sm:$0xf] }
  0x22   : > { %v2469_v23 = vld [vmem:[%s2853_s28 + $0x104] sm:$0xf]  ;;  %2466 = vst [vmem:[%s2858_s29 + $0x44] sm:$0xf] %v2465_v21  ;;  %2468 = vst [vmem:[%s2858_s29 + $0x50] sm:$0xf] %v2467_v22 }
  0x23   : > { %2470 = vst [vmem:[%s2858_s29 + $0x5c] sm:$0xf] %v2469_v23  ;;  %v2471_v24 = vld [vmem:[%s2853_s28 + $0x128] sm:$0xf]  ;;  %v2473_v25 = vld [vmem:[%s2853_s28 + $0x14c] sm:$0xf] }
  0x24   : > { %v2475_v26 = vld [vmem:[%s2853_s28 + $0x170] sm:$0xf]  ;;  %2472 = vst [vmem:[%s2858_s29 + $0x68] sm:$0xf] %v2471_v24  ;;  %2474 = vst [vmem:[%s2858_s29 + $0x74] sm:$0xf] %v2473_v25 }
  0x25   : > { %2476 = vst [vmem:[%s2858_s29 + $0x80] sm:$0xf] %v2475_v26  ;;  %v2477_v27 = vld [vmem:[%s2853_s28 + $0x194] sm:$0xf]  ;;  %v2479_v28 = vld [vmem:[%s2853_s28 + $0x1b8] sm:$0xf] }
  0x26   : > { %v2481_v29 = vld [vmem:[%s2853_s28 + $0x1dc] sm:$0xf]  ;;  %2478 = vst [vmem:[%s2858_s29 + $0x8c] sm:$0xf] %v2477_v27  ;;  %2480 = vst [vmem:[%s2858_s29 + $0x98] sm:$0xf] %v2479_v28 }
  0x27   : > { %2482 = vst [vmem:[%s2858_s29 + $0xa4] sm:$0xf] %v2481_v29  ;;  %v2483_v30 = vld [vmem:[%s2853_s28 + $0x200] sm:$0xf]  ;;  %v2485_v31 = vld [vmem:[%s2853_s28 + $0x224] sm:$0xf] }
  0x28   : > { %2484 = vst [vmem:[%s2858_s29 + $0xb0] sm:$0xf] %v2483_v30  ;;  %2486 = vst [vmem:[%s2858_s29 + $0xbc] sm:$0xf] %v2485_v31 }
  0x29 PF: > { %p2487_p8 = scmp.ge.s32.totalorder %s2782_s16, 1  ;;  %p279_p9 = scmp.lt.s32.totalorder %s2782_s16, 4 }
  0x2b   : > { %p280_p10 = pnand %p2487_p8, %p279_p9 }
  0x2c   : > { %s286_s30 = sand.u32 (!%p280_p10), 1, %s2766_s12   ;;  %v2784_v32 = vmov (!%p280_p10), 0   ;;  %v2714_v50 = vld [vmem:[%s3619_s0] sm:$0xff] (!%p280_p10)   ;;  %v2953_v51 = vld [vmem:[%s3619_s0 + $0x88] sm:$0xff] (!%p280_p10)   ;;  %v2966_v55 = vld [vmem:[%s3619_s0 + $0x90] sm:$0xff] (!%p280_p10)   ;;  %s331_s20 = smul.u32 (!%p280_p10), 3, %s2774_s14  ;;  %v1785_v15 = vlaneseq (!%p280_p10) }
  0x2d   : > { %283 = sbr.rel (%p280_p10) target bundleno = 474 (0x1da), region = 54  ;;  %966 = vmatprep.mubr.bf16.mxu0 (!%p280_p10), %v2784_v32  ;;  %1136 = vmatprep.mubr.bf16.mxu1 (!%p280_p10), %v2784_v32  ;;  %v2717_v54 = vld [vmem:[%s3619_s0 + $0x8] sm:$0xff] (!%p280_p10)   ;;  %v2720_v58 = vld [vmem:[%s3619_s0 + $0x10] sm:$0xff] (!%p280_p10)   ;;  %v2979_v59 = vld [vmem:[%s3619_s0 + $0x98] sm:$0xff] (!%p280_p10)  }
  0x2e   : > { %s2646_s4 = smul.u32 (!%p280_p10), 192, %s286_s30  ;;  %v2724_v62 = vld [vmem:[%s3619_s0 + $0x18] sm:$0xff] (!%p280_p10)   ;;  %v2992_v63 = vld [vmem:[%s3619_s0 + $0xa0] sm:$0xff] (!%p280_p10)   ;;  %v2729_v2 = vld [vmem:[%s3619_s0 + $0xa8] ss:$0 sps:$4 sm:$0xff] (!%p280_p10)   ;;  %p332_p11 = scmp.lt.s32.totalorder (!%p280_p10), %s331_s20, 8 }
  0x2f   : > { %v2727_v1 = vld [vmem:[%s3619_s0 + $0x20] sm:$0xff] (!%p280_p10)   ;;  %v2731_v3 = vld [vmem:[%s3619_s0 + $0x28] sm:$0xff] (!%p280_p10)   ;;  %v2733_v4 = vld [vmem:[%s3619_s0 + $0x30] sm:$0xff] (!%p280_p10)   ;;  %v3057_v16 = vshrl.u32 (!%p280_p10), %v1785_v15, 7  ;;  %s2647_s26 = smul.u32 (!%p280_p10), 1032, %s286_s30 }
  0x30   : > { %s2928_s5 = scalar_lea.vmem (!%p280_p10), [#allocation2], %s2646_s4  ;;  %v2734_v5 = vld [vmem:[%s3619_s0 + $0x38] sm:$0xff] (!%p280_p10)   ;;  %v2735_v6 = vld [vmem:[%s3619_s0 + $0x40] sm:$0xff] (!%p280_p10)   ;;  %v2736_v7 = vld [vmem:[%s3619_s0 + $0x48] sm:$0xff] (!%p280_p10)  }
  0x31   : > { %v2690_v33 = vld [vmem:[%s2928_s5 + $0x4] ss:$12 sps:$4 sm:$0xff] (!%p280_p10)   ;;  %v2692_v34 = vld [vmem:[%s2928_s5] ss:$12 sps:$4 sm:$0xff] (!%p280_p10)   ;;  %v2693_v35 = vld [vmem:[%s2928_s5 + $0x1c] ss:$12 sps:$4 sm:$0xff] (!%p280_p10)  }
  0x32   : > { %934 = vmatprep.subr.bf16.mxu0 (!%p280_p10), %v2690_v33  ;;  %2629 = vmatprep.subr.bf16.mxu1 (!%p280_p10), %v2690_v33  ;;  %v2695_v36 = vld [vmem:[%s2928_s5 + $0x18] ss:$12 sps:$4 sm:$0xff] (!%p280_p10)   ;;  %v2696_v37 = vld [vmem:[%s2928_s5 + $0x34] ss:$12 sps:$4 sm:$0xff] (!%p280_p10)   ;;  %v2698_v38 = vld [vmem:[%s2928_s5 + $0x30] ss:$12 sps:$4 sm:$0xff] (!%p280_p10)  }
  0x33   : > { %935 = vmatpush1.bf16.msra.mxu0 (!%p280_p10), %v2692_v34  ;;  %2637 = vmatpush1.bf16.msra.mxu1 (!%p280_p10), %v2692_v34  ;;  %v2699_v39 = vld [vmem:[%s2928_s5 + $0x4c] ss:$12 sps:$4 sm:$0xff] (!%p280_p10)   ;;  %v2701_v40 = vld [vmem:[%s2928_s5 + $0x48] ss:$12 sps:$4 sm:$0xff] (!%p280_p10)   ;;  %v2702_v41 = vld [vmem:[%s2928_s5 + $0x64] ss:$12 sps:$4 sm:$0xff] (!%p280_p10)  }
  0x34   : > { %936 = vmatprep.subr.bf16.mxu0 %v2693_v35  ;;  %2630 = vmatprep.subr.bf16.mxu1 %v2693_v35  ;;  %v2704_v42 = vld [vmem:[%s2928_s5 + $0x60] ss:$12 sps:$4 sm:$0xff]   ;;  %v2705_v43 = vld [vmem:[%s2928_s5 + $0x7c] ss:$12 sps:$4 sm:$0xff]   ;;  %v2707_v44 = vld [vmem:[%s2928_s5 + $0x78] ss:$12 sps:$4 sm:$0xff]  }
  0x35   : > { %v2708_v45 = vld [vmem:[%s2928_s5 + $0x94] ss:$12 sps:$4 sm:$0xff]   ;;  %v2710_v46 = vld [vmem:[%s2928_s5 + $0x90] ss:$12 sps:$4 sm:$0xff]   ;;  %v2711_v47 = vld [vmem:[%s2928_s5 + $0xac] ss:$12 sps:$4 sm:$0xff]  }
  0x36   : > { %v2713_v48 = vld [vmem:[%s2928_s5 + $0xa8] ss:$12 sps:$4 sm:$0xff]   ;;  %v2718_v52 = vld [vmem:[%s2928_s5 + $0x20] ss:$12 sps:$4 sm:$0xff]   ;;  %v2721_v53 = vld [vmem:[%s2928_s5 + $0x38] ss:$12 sps:$4 sm:$0xff]  }
  0x37   : > { %937 = vmatpush1.bf16.msra.mxu0 %v2695_v36  ;;  %2638 = vmatpush1.bf16.msra.mxu1 %v2695_v36  ;;  %v2716_v49 = vld [vmem:[%s2928_s5 + $0x8] ss:$12 sps:$4 sm:$0xff]   ;;  %v2723_v56 = vld [vmem:[%s2928_s5 + $0x50] ss:$12 sps:$4 sm:$0xff]   ;;  %v2728_v60 = vld [vmem:[%s2928_s5 + $0x80] ss:$12 sps:$4 sm:$0xff]  }
  0x38   : > { %938 = vmatprep.subr.bf16.mxu0 %v2696_v37  ;;  %2631 = vmatprep.subr.bf16.mxu1 %v2696_v37  ;;  %v2725_v57 = vld [vmem:[%s2928_s5 + $0x68] ss:$12 sps:$4 sm:$0xff]   ;;  %v2730_v61 = vld [vmem:[%s2928_s5 + $0x98] ss:$12 sps:$4 sm:$0xff]   ;;  %v2732_v0 = vld [vmem:[%s2928_s5 + $0xb0] ss:$12 sps:$4 sm:$0xff]  }
  0x39   : > { %v2737_v8 = vld [vmem:[%s3619_s0 + $0x50] sm:$0xff]   ;;  %v2738_v9 = vld [vmem:[%s3619_s0 + $0x58] sm:$0xff]   ;;  %v2739_v10 = vld [vmem:[%s3619_s0 + $0x60] sm:$0xff]   ;;  %s3631_s20 = smov (!%p332_p11, %s331_s20), 8  ;;  %v1787_v17 = vsub.s32 0, %v3057_v16  ;;  %v1791_v19 = vsub.s32 1, %v3057_v16 }
  0x3a   : > { %v2740_v11 = vld [vmem:[%s3619_s0 + $0x68] sm:$0xff]   ;;  %v2741_v12 = vld [vmem:[%s3619_s0 + $0x70] sm:$0xff]   ;;  %v2742_v13 = vld [vmem:[%s3619_s0 + $0x78] sm:$0xff]   ;;  %s334_s25 = scalar_lea.vmem %s3621_s2, %s3631_s20  ;;  %s3078_s12 = scalar_lea.vmem [#allocation3], %s2647_s26 }
  0x3b   : > { %939 = vmatpush1.bf16.msra.mxu0 %v2698_v38  ;;  %2639 = vmatpush1.bf16.msra.mxu1 %v2698_v38  ;;  %v2743_v14 = vld [vmem:[%s3619_s0 + $0x80] sm:$0xff]   ;;  %s2538_s30 = smul.u32 (%p2840_p6), 24, %s2774_s14 }
  0x3c   : > { %940 = vmatprep.subr.bf16.mxu0 %v2699_v39  ;;  %2632 = vmatprep.subr.bf16.mxu1 %v2699_v39  ;;  %v3063_v18 = vld [vmem:[%s334_s25] sm:$0x7] }
  0x3d   : > { %v3069_v20 = vrot.slane %v3063_v18, %v1787_v17  ;;  %v3072_v22 = vrot.slane %v3063_v18, %v1791_v19  ;;  %s3350_s28 = scalar_lea.vmem (%p2840_p6), %s3622_s3, %s2538_s30 }
  0x3f   : > { %941 = vmatpush1.bf16.msra.mxu0 %v2701_v40  ;;  %2640 = vmatpush1.bf16.msra.mxu1 %v2701_v40 }
  0x40   : > { %942 = vmatprep.subr.bf16.mxu0 %v2702_v41  ;;  %2633 = vmatprep.subr.bf16.mxu1 %v2702_v41 }
  0x43   : > { %943 = vmatpush1.bf16.msra.mxu0 %v2704_v42  ;;  %2641 = vmatpush1.bf16.msra.mxu1 %v2704_v42 }
  0x44   : > { %944 = vmatprep.subr.bf16.mxu0 %v2705_v43  ;;  %2634 = vmatprep.subr.bf16.mxu1 %v2705_v43 }
  0x47   : > { %945 = vmatpush1.bf16.msra.mxu0 %v2707_v44  ;;  %2642 = vmatpush1.bf16.msra.mxu1 %v2707_v44 }
  0x48   : > { %946 = vmatprep.subr.bf16.mxu0 %v2708_v45  ;;  %2635 = vmatprep.subr.bf16.mxu1 %v2708_v45 }
  0x4b   : > { %947 = vmatpush1.bf16.msra.mxu0 %v2710_v46  ;;  %2643 = vmatpush1.bf16.msra.mxu1 %v2710_v46 }
  0x4c   : > { %948 = vmatprep.subr.bf16.mxu0 %v2711_v47  ;;  %2636 = vmatprep.subr.bf16.mxu1 %v2711_v47 }
  0x4f   : > { %949 = vmatpush1.bf16.msra.mxu0 %v2713_v48  ;;  %2644 = vmatpush1.bf16.msra.mxu1 %v2713_v48 }
  0x50   : > { %2569 = vmatprep.subr.bf16.mxu1 %v2716_v49 }
  0x52   : > { %967 = vmatmul.mubr.bf16.vlgmr.msra.gmra.mrb[0].mxu0 %v2714_v50  ;;  %1137 = vmatmul.mubr.bf16.vlgmr.msra.gmra.mrb[0].mxu1 %v2953_v51 }
  0x53   : > { %976 = vmatprep.mubr.bf16.mxu0 %v2784_v32  ;;  %2570 = vmatpush3.bf16.msra.mxu1 %v2716_v49 }
  0x54   : > { %1146 = vmatprep.mubr.bf16.mxu1 %v2784_v32  ;;  %2571 = vmatprep.subr.bf16.mxu1 %v2718_v52 }
  0x57   : > { %2572 = vmatpush3.bf16.msra.mxu1 %v2718_v52 }
  0x58   : > { %2573 = vmatprep.subr.bf16.mxu1 %v2721_v53 }
  0x5a   : > { %977 = vmatmul.mubr.bf16.gmra.mrb[4].mxu0 %v2717_v54  ;;  %1147 = vmatmul.mubr.bf16.gmra.mrb[4].mxu1 %v2966_v55 }
  0x5b   : > { %986 = vmatprep.mubr.bf16.mxu0 %v2784_v32  ;;  %2574 = vmatpush3.bf16.msra.mxu1 %v2721_v53 }
  0x5c   : > { %1156 = vmatprep.mubr.bf16.mxu1 %v2784_v32  ;;  %2575 = vmatprep.subr.bf16.mxu1 %v2723_v56 }
  0x5f   : > { %2576 = vmatpush3.bf16.msra.mxu1 %v2723_v56 }
  0x60   : > { %2577 = vmatprep.subr.bf16.mxu1 %v2725_v57 }
  0x62   : > { %987 = vmatmul.mubr.bf16.gmra.mrb[8].mxu0 %v2720_v58  ;;  %1157 = vmatmul.mubr.bf16.gmra.mrb[8].mxu1 %v2979_v59 }
  0x63   : > { %996 = vmatprep.mubr.bf16.mxu0 %v2784_v32  ;;  %1166 = vmatprep.mubr.bf16.mxu1 %v2784_v32 }
  0x64   : > { %2578 = vmatpush3.bf16.msra.mxu1 %v2725_v57 }
  0x65   : > { %2579 = vmatprep.subr.bf16.mxu1 %v2728_v60 }
  0x68   : > { %2580 = vmatpush3.bf16.msra.mxu1 %v2728_v60 }
  0x69   : > { %2581 = vmatprep.subr.bf16.mxu1 %v2730_v61 }
  0x6a   : > { %997 = vmatmul.mubr.bf16.gmra.mrb[12].mxu0 %v2724_v62  ;;  %1167 = vmatmul.mubr.bf16.gmra.mrb[12].mxu1 %v2992_v63 }
  0x6b   : > { %1006 = vmatprep.mubr.bf16.mxu0 %v2784_v32  ;;  %1176 = vmatprep.mubr.bf16.mxu1 %v2784_v32 }
  0x6c   : > { %2582 = vmatpush3.bf16.msra.mxu1 %v2730_v61 }
  0x6d   : > { %2583 = vmatprep.subr.bf16.mxu1 %v2732_v0 }
  0x70   : > { %2584 = vmatpush3.bf16.msra.mxu1 %v2732_v0 }
  0x72   : > { %1007 = vmatmul.mubr.bf16.gmra.mrb[16].mxu0 %v2727_v1  ;;  %1177 = vmatmul.mubr.bf16.gmra.mrb[16].mxu1 %v2729_v2 }
  0x73   : > { %1016 = vmatprep.mubr.bf16.mxu0 %v2784_v32  ;;  %2585 = vmatprep.mubr.bf16.mxu1 %v2714_v50 }
  0x7a   : > { %1017 = vmatmul.mubr.bf16.gmra.mrb[20].mxu0 %v2731_v3  ;;  %2586 = vmatmul.mubr.bf16.vlgmr.msra.gmra.mrb[20].mxu1 %v2717_v54 }
  0x7b   : > { %1026 = vmatprep.mubr.bf16.mxu0 %v2784_v32  ;;  %2589 = vmatprep.mubr.bf16.mxu1 %v2720_v58 }
  0x82   : > { %1027 = vmatmul.mubr.bf16.gmra.mrb[24].mxu0 %v2733_v4  ;;  %2590 = vmatmul.mubr.bf16.gmra.mrb[24].mxu1 %v2724_v62 }
  0x83   : > { %1036 = vmatprep.mubr.bf16.mxu0 %v2784_v32  ;;  %2593 = vmatprep.mubr.bf16.mxu1 %v2727_v1 }
  0x8a   : > { %1037 = vmatmul.mubr.bf16.gmra.mrb[28].mxu0 %v2734_v5  ;;  %2594 = vmatmul.mubr.bf16.gmra.mrb[28].mxu1 %v2731_v3 }
  0x8b   : > { %1046 = vmatprep.mubr.bf16.mxu0 %v2784_v32  ;;  %2597 = vmatprep.mubr.bf16.mxu1 %v2733_v4 }
  0x92   : > { %1047 = vmatmul.mubr.bf16.gmra.mrb[32].mxu0 %v2735_v6  ;;  %2598 = vmatmul.mubr.bf16.gmra.mrb[32].mxu1 %v2734_v5 }
  0x93   : > { %1056 = vmatprep.mubr.bf16.mxu0 %v2784_v32  ;;  %2601 = vmatprep.mubr.bf16.mxu1 %v2735_v6 }
  0x9a   : > { %1057 = vmatmul.mubr.bf16.gmra.mrb[36].mxu0 %v2736_v7  ;;  %2602 = vmatmul.mubr.bf16.gmra.mrb[36].mxu1 %v2736_v7 }
  0x9b   : > { %1066 = vmatprep.mubr.bf16.mxu0 %v2784_v32  ;;  %2605 = vmatprep.mubr.bf16.mxu1 %v2737_v8 }
  0xa2   : > { %1067 = vmatmul.mubr.bf16.gmra.mrb[40].mxu0 %v2737_v8  ;;  %2606 = vmatmul.mubr.bf16.gmra.mrb[40].mxu1 %v2738_v9 }
  0xa3   : > { %1076 = vmatprep.mubr.bf16.mxu0 %v2784_v32  ;;  %2609 = vmatprep.mubr.bf16.mxu1 %v2739_v10 }
  0xaa   : > { %1077 = vmatmul.mubr.bf16.gmra.mrb[44].mxu0 %v2738_v9  ;;  %2610 = vmatmul.mubr.bf16.gmra.mrb[44].mxu1 %v2740_v11 }
  0xab   : > { %1086 = vmatprep.mubr.bf16.mxu0 %v2784_v32  ;;  %2613 = vmatprep.mubr.bf16.mxu1 %v2741_v12 }
  0xb2   : > { %1087 = vmatmul.mubr.bf16.gmra.mrb[48].mxu0 %v2739_v10  ;;  %2614 = vmatmul.mubr.bf16.gmra.mrb[48].mxu1 %v2742_v13 }
  0xb3   : > { %1096 = vmatprep.mubr.bf16.mxu0 %v2784_v32  ;;  %2617 = vmatprep.mubr.bf16.mxu1 %v2743_v14 }
  0xba   : > { %1097 = vmatmul.mubr.bf16.gmra.mrb[52].mxu0 %v2740_v11  ;;  %2618 = vmatmul.mubr.bf16.gmra.mrb[52].mxu1 %v2953_v51 }
  0xbb   : > { %1106 = vmatprep.mubr.bf16.mxu0 %v2784_v32  ;;  %2621 = vmatprep.mubr.bf16.mxu1 %v2966_v55 }
  0xc2   : > { %1107 = vmatmul.mubr.bf16.gmra.mrb[56].mxu0 %v2741_v12  ;;  %2622 = vmatmul.mubr.bf16.gmra.mrb[56].mxu1 %v2979_v59 }
  0xc3   : > { %1116 = vmatprep.mubr.bf16.mxu0 %v2784_v32  ;;  %2625 = vmatprep.mubr.bf16.mxu1 %v2992_v63 }
  0xca   : > { %1117 = vmatmul.mubr.bf16.gmra.mrb[60].mxu0 %v2742_v13  ;;  %2626 = vmatmul.mubr.bf16.gmra.mrb[60].mxu1 %v2729_v2 }
  0xcb   : > { %1126 = vmatprep.mubr.bf16.mxu0 %v2784_v32 }
  0xd2   : > { %1127 = vmatmul.mubr.bf16.gmra.mrb[64].mxu0 %v2743_v14 }
 0x125   : > { %v968_v21 = vpop.f32.mrb[0].mxu0  ;;  %v1138_v23 = vpop.f32.mrb[0].mxu1 }
 0x126   : > { %v970_v24 = vpop.f32.mrb[1].mxu0  ;;  %v1140_v25 = vpop.f32.mrb[1].mxu1  ;;  %v1800_v28 = vadd.f32 %v3069_v20, %v968_v21  ;;  %v1902_v30 = vadd.f32 %v3069_v20, %v1138_v23 }
 0x127   : > { %v972_v26 = vpop.f32.mrb[2].mxu0  ;;  %v1142_v27 = vpop.f32.mrb[2].mxu1  ;;  %v1801_v32 = vadd.f32 %v3072_v22, %v970_v24  ;;  %v1903_v33 = vadd.f32 %v3072_v22, %v1140_v25 }
 0x128   : > { %v974_v29 = vpop.f32.mrb[3].mxu0  ;;  %v1144_v31 = vpop.f32.mrb[3].mxu1  ;;  %1929 = vst [vmem:[%s3078_s12] sm:$0xff] %v1800_v28  ;;  %v1803_v34 = vadd.f32 %v3069_v20, %v972_v26  ;;  %2031 = vst [vmem:[%s3078_s12 + $0x330] sm:$0xff] %v1902_v30  ;;  %v1905_v35 = vadd.f32 %v3069_v20, %v1142_v27 }
 0x129   : > { %1930 = vst [vmem:[%s3078_s12 + $0x8] sm:$0xff] %v1801_v32  ;;  %v1804_v36 = vadd.f32 %v3072_v22, %v974_v29  ;;  %2032 = vst [vmem:[%s3078_s12 + $0x338] sm:$0xff] %v1903_v33  ;;  %v1906_v37 = vadd.f32 %v3072_v22, %v1144_v31 }
 0x12a   : > { %1932 = vst [vmem:[%s3078_s12 + $0x18] sm:$0xff] %v1803_v34  ;;  %2034 = vst [vmem:[%s3078_s12 + $0x348] sm:$0xff] %v1905_v35 }
 0x12b   : > { %1933 = vst [vmem:[%s3078_s12 + $0x20] sm:$0xff] %v1804_v36  ;;  %2035 = vst [vmem:[%s3078_s12 + $0x350] sm:$0xff] %v1906_v37  ;;  %v1795_v36 = vsub.s32 2, %v3057_v16 }
 0x12d   : > { %v978_v38 = vpop.f32.mrb[4].mxu0  ;;  %v1148_v39 = vpop.f32.mrb[4].mxu1 }
 0x12e   : > { %v980_v40 = vpop.f32.mrb[5].mxu0  ;;  %v1150_v41 = vpop.f32.mrb[5].mxu1  ;;  %v1806_v44 = vadd.f32 %v3069_v20, %v978_v38  ;;  %v1908_v46 = vadd.f32 %v3069_v20, %v1148_v39 }
 0x12f   : > { %v982_v42 = vpop.f32.mrb[6].mxu0  ;;  %v1152_v43 = vpop.f32.mrb[6].mxu1  ;;  %v1807_v48 = vadd.f32 %v3072_v22, %v980_v40  ;;  %v1909_v49 = vadd.f32 %v3072_v22, %v1150_v41  ;;  %v3153_v41 = vrot.slane %v3063_v18, %v1795_v36 }
 0x130   : > { %v984_v45 = vpop.f32.mrb[7].mxu0  ;;  %v1154_v47 = vpop.f32.mrb[7].mxu1  ;;  %1935 = vst [vmem:[%s3078_s12 + $0x30] sm:$0xff] %v1806_v44  ;;  %v1809_v50 = vadd.f32 %v3069_v20, %v982_v42  ;;  %2037 = vst [vmem:[%s3078_s12 + $0x360] sm:$0xff] %v1908_v46  ;;  %v1911_v51 = vadd.f32 %v3069_v20, %v1152_v43 }
 0x131   : > { %1936 = vst [vmem:[%s3078_s12 + $0x38] sm:$0xff] %v1807_v48  ;;  %v1810_v52 = vadd.f32 %v3072_v22, %v984_v45  ;;  %2038 = vst [vmem:[%s3078_s12 + $0x368] sm:$0xff] %v1909_v49  ;;  %v1912_v53 = vadd.f32 %v3072_v22, %v1154_v47 }
 0x132   : > { %1938 = vst [vmem:[%s3078_s12 + $0x48] sm:$0xff] %v1809_v50  ;;  %2040 = vst [vmem:[%s3078_s12 + $0x378] sm:$0xff] %v1911_v51 }
 0x133   : > { %1939 = vst [vmem:[%s3078_s12 + $0x50] sm:$0xff] %v1810_v52  ;;  %2041 = vst [vmem:[%s3078_s12 + $0x380] sm:$0xff] %v1912_v53 }
 0x135   : > { %v988_v54 = vpop.f32.mrb[8].mxu0  ;;  %v1158_v55 = vpop.f32.mrb[8].mxu1 }
 0x136   : > { %v990_v56 = vpop.f32.mrb[9].mxu0  ;;  %v1160_v57 = vpop.f32.mrb[9].mxu1  ;;  %v1812_v60 = vadd.f32 %v3069_v20, %v988_v54  ;;  %v1914_v62 = vadd.f32 %v3069_v20, %v1158_v55 }
 0x137   : > { %v992_v58 = vpop.f32.mrb[10].mxu0  ;;  %v1162_v59 = vpop.f32.mrb[10].mxu1  ;;  %v1813_v0 = vadd.f32 %v3072_v22, %v990_v56  ;;  %v1915_v1 = vadd.f32 %v3072_v22, %v1160_v57 }
 0x138   : > { %v994_v61 = vpop.f32.mrb[11].mxu0  ;;  %v1164_v63 = vpop.f32.mrb[11].mxu1  ;;  %1941 = vst [vmem:[%s3078_s12 + $0x60] sm:$0xff] %v1812_v60  ;;  %v1815_v2 = vadd.f32 %v3069_v20, %v992_v58  ;;  %2043 = vst [vmem:[%s3078_s12 + $0x390] sm:$0xff] %v1914_v62  ;;  %v1917_v3 = vadd.f32 %v3069_v20, %v1162_v59 }
 0x139   : > { %1942 = vst [vmem:[%s3078_s12 + $0x68] sm:$0xff] %v1813_v0  ;;  %v1816_v4 = vadd.f32 %v3072_v22, %v994_v61  ;;  %2044 = vst [vmem:[%s3078_s12 + $0x398] sm:$0xff] %v1915_v1  ;;  %v1918_v5 = vadd.f32 %v3072_v22, %v1164_v63 }
 0x13a   : > { %1944 = vst [vmem:[%s3078_s12 + $0x78] sm:$0xff] %v1815_v2  ;;  %2046 = vst [vmem:[%s3078_s12 + $0x3a8] sm:$0xff] %v1917_v3 }
 0x13b   : > { %1945 = vst [vmem:[%s3078_s12 + $0x80] sm:$0xff] %v1816_v4  ;;  %2047 = vst [vmem:[%s3078_s12 + $0x3b0] sm:$0xff] %v1918_v5 }
 0x13d   : > { %v998_v6 = vpop.f32.mrb[12].mxu0  ;;  %v1168_v7 = vpop.f32.mrb[12].mxu1 }
 0x13e   : > { %v1000_v8 = vpop.f32.mrb[13].mxu0  ;;  %v1170_v9 = vpop.f32.mrb[13].mxu1  ;;  %v1818_v12 = vadd.f32 %v3069_v20, %v998_v6  ;;  %v1920_v14 = vadd.f32 %v3069_v20, %v1168_v7 }
 0x13f   : > { %v1002_v10 = vpop.f32.mrb[14].mxu0  ;;  %v1172_v11 = vpop.f32.mrb[14].mxu1  ;;  %v1819_v17 = vadd.f32 %v3072_v22, %v1000_v8  ;;  %v1921_v19 = vadd.f32 %v3072_v22, %v1170_v9 }
 0x140   : > { %v1004_v13 = vpop.f32.mrb[15].mxu0  ;;  %v1174_v15 = vpop.f32.mrb[15].mxu1  ;;  %1947 = vst [vmem:[%s3078_s12 + $0x90] sm:$0xff] %v1818_v12  ;;  %v1821_v21 = vadd.f32 %v3069_v20, %v1002_v10  ;;  %2049 = vst [vmem:[%s3078_s12 + $0x3c0] sm:$0xff] %v1920_v14  ;;  %v1923_v23 = vadd.f32 %v3069_v20, %v1172_v11 }
 0x141   : > { %1948 = vst [vmem:[%s3078_s12 + $0x98] sm:$0xff] %v1819_v17  ;;  %v1822_v24 = vadd.f32 %v3072_v22, %v1004_v13  ;;  %2050 = vst [vmem:[%s3078_s12 + $0x3c8] sm:$0xff] %v1921_v19  ;;  %v1924_v25 = vadd.f32 %v3072_v22, %v1174_v15 }
 0x142   : > { %1950 = vst [vmem:[%s3078_s12 + $0xa8] sm:$0xff] %v1821_v21  ;;  %2052 = vst [vmem:[%s3078_s12 + $0x3d8] sm:$0xff] %v1923_v23 }
 0x143   : > { %1951 = vst [vmem:[%s3078_s12 + $0xb0] sm:$0xff] %v1822_v24  ;;  %2053 = vst [vmem:[%s3078_s12 + $0x3e0] sm:$0xff] %v1924_v25 }
 0x145   : > { %v1008_v26 = vpop.f32.mrb[16].mxu0  ;;  %v1178_v27 = vpop.f32.mrb[16].mxu1 }
 0x146   : > { %v1010_v28 = vpop.f32.mrb[17].mxu0  ;;  %v1180_v29 = vpop.f32.mrb[17].mxu1  ;;  %v1824_v32 = vadd.f32 %v3069_v20, %v1008_v26  ;;  %v1926_v34 = vadd.f32 %v3069_v20, %v1178_v27 }
 0x147   : > { %v1012_v30 = vpop.f32.mrb[18].mxu0  ;;  %v1182_v31 = vpop.f32.mrb[18].mxu1  ;;  %v1825_v37 = vadd.f32 %v3072_v22, %v1010_v28  ;;  %v1927_v38 = vadd.f32 %v3072_v22, %v1180_v29 }
 0x148   : > { %v1014_v33 = vpop.f32.mrb[19].mxu0  ;;  %v1183_v35 = vpop.f32.mrb[19].mxu1  ;;  %1953 = vst [vmem:[%s3078_s12 + $0xc0] sm:$0xff] %v1824_v32  ;;  %v1827_v39 = vadd.f32 %v3069_v20, %v1012_v30  ;;  %2055 = vst [vmem:[%s3078_s12 + $0x3f0] sm:$0xff] %v1926_v34 }
 0x149   : > { %1954 = vst [vmem:[%s3078_s12 + $0xc8] sm:$0xff] %v1825_v37  ;;  %v1828_v40 = vadd.f32 %v3072_v22, %v1014_v33  ;;  %2056 = vst [vmem:[%s3078_s12 + $0x3f8] sm:$0xff] %v1927_v38 }
 0x14a   : > { %1956 = vst [vmem:[%s3078_s12 + $0xd8] sm:$0xff] %v1827_v39 }
 0x14b   : > { %1957 = vst [vmem:[%s3078_s12 + $0xe0] sm:$0xff] %v1828_v40 }
 0x14d   : > { %v1018_v16 = vpop.f32.mrb[20].mxu0  ;;  %v2587_v42 = vpop.f32.mrb[20].mxu1 }
 0x14e   : > { %v1020_v43 = vpop.f32.mrb[21].mxu0  ;;  %v1219_v44 = vpop.f32.mrb[21].mxu1  ;;  %v1830_v47 = vadd.f32 %v3069_v20, %v1018_v16  ;;  %v1808_v49 = vadd.f32 %v2587_v42, %v3153_v41 }
 0x14f   : > { %v1022_v45 = vpop.f32.mrb[22].mxu0  ;;  %v2588_v46 = vpop.f32.mrb[22].mxu1  ;;  %v1831_v50 = vadd.f32 %v3072_v22, %v1020_v43  ;;  %v1802_v51 = vadd.f32 %v3153_v41, %v1219_v44 }
 0x150   : > { %v1024_v48 = vpop.f32.mrb[23].mxu0  ;;  %v1222_v18 = vpop.f32.mrb[23].mxu1  ;;  %1959 = vst [vmem:[%s3078_s12 + $0xf0] sm:$0xff] %v1830_v47  ;;  %v1833_v52 = vadd.f32 %v3069_v20, %v1022_v45  ;;  %1937 = vst [vmem:[%s3078_s12 + $0x40] sm:$0xff] %v1808_v49  ;;  %v1811_v53 = vadd.f32 %v2588_v46, %v3153_v41 }
 0x151   : > { %1960 = vst [vmem:[%s3078_s12 + $0xf8] sm:$0xff] %v1831_v50  ;;  %v1834_v54 = vadd.f32 %v3072_v22, %v1024_v48  ;;  %1931 = vst [vmem:[%s3078_s12 + $0x10] sm:$0xff] %v1802_v51  ;;  %v1805_v55 = vadd.f32 %v3153_v41, %v1222_v18 }
 0x152   : > { %1962 = vst [vmem:[%s3078_s12 + $0x108] sm:$0xff] %v1833_v52  ;;  %1940 = vst [vmem:[%s3078_s12 + $0x58] sm:$0xff] %v1811_v53 }
 0x153   : > { %1963 = vst [vmem:[%s3078_s12 + $0x110] sm:$0xff] %v1834_v54  ;;  %1934 = vst [vmem:[%s3078_s12 + $0x28] sm:$0xff] %v1805_v55 }
 0x155   : > { %v1028_v56 = vpop.f32.mrb[24].mxu0  ;;  %v2591_v57 = vpop.f32.mrb[24].mxu1 }
 0x156   : > { %v1030_v58 = vpop.f32.mrb[25].mxu0  ;;  %v1235_v59 = vpop.f32.mrb[25].mxu1  ;;  %v1836_v62 = vadd.f32 %v3069_v20, %v1028_v56  ;;  %v1820_v0 = vadd.f32 %v2591_v57, %v3153_v41 }
 0x157   : > { %v1032_v60 = vpop.f32.mrb[26].mxu0  ;;  %v2592_v61 = vpop.f32.mrb[26].mxu1  ;;  %v1837_v2 = vadd.f32 %v3072_v22, %v1030_v58  ;;  %v1814_v3 = vadd.f32 %v3153_v41, %v1235_v59 }
 0x158   : > { %v1034_v63 = vpop.f32.mrb[27].mxu0  ;;  %v1238_v1 = vpop.f32.mrb[27].mxu1  ;;  %1965 = vst [vmem:[%s3078_s12 + $0x120] sm:$0xff] %v1836_v62  ;;  %v1839_v4 = vadd.f32 %v3069_v20, %v1032_v60  ;;  %1949 = vst [vmem:[%s3078_s12 + $0xa0] sm:$0xff] %v1820_v0  ;;  %v1823_v5 = vadd.f32 %v2592_v61, %v3153_v41 }
 0x159   : > { %1966 = vst [vmem:[%s3078_s12 + $0x128] sm:$0xff] %v1837_v2  ;;  %v1840_v6 = vadd.f32 %v3072_v22, %v1034_v63  ;;  %1943 = vst [vmem:[%s3078_s12 + $0x70] sm:$0xff] %v1814_v3  ;;  %v1817_v7 = vadd.f32 %v3153_v41, %v1238_v1 }
 0x15a   : > { %1968 = vst [vmem:[%s3078_s12 + $0x138] sm:$0xff] %v1839_v4  ;;  %1952 = vst [vmem:[%s3078_s12 + $0xb8] sm:$0xff] %v1823_v5 }
 0x15b   : > { %1969 = vst [vmem:[%s3078_s12 + $0x140] sm:$0xff] %v1840_v6  ;;  %1946 = vst [vmem:[%s3078_s12 + $0x88] sm:$0xff] %v1817_v7 }
 0x15d   : > { %v1038_v8 = vpop.f32.mrb[28].mxu0  ;;  %v2595_v9 = vpop.f32.mrb[28].mxu1 }
 0x15e   : > { %v1040_v10 = vpop.f32.mrb[29].mxu0  ;;  %v1251_v11 = vpop.f32.mrb[29].mxu1  ;;  %v1842_v14 = vadd.f32 %v3069_v20, %v1038_v8  ;;  %v1832_v17 = vadd.f32 %v2595_v9, %v3153_v41 }
 0x15f   : > { %v1042_v12 = vpop.f32.mrb[30].mxu0  ;;  %v2596_v13 = vpop.f32.mrb[30].mxu1  ;;  %v1843_v21 = vadd.f32 %v3072_v22, %v1040_v10  ;;  %v1826_v23 = vadd.f32 %v3153_v41, %v1251_v11 }
 0x160   : > { %v1044_v15 = vpop.f32.mrb[31].mxu0  ;;  %v1254_v19 = vpop.f32.mrb[31].mxu1  ;;  %1971 = vst [vmem:[%s3078_s12 + $0x150] sm:$0xff] %v1842_v14  ;;  %v1845_v24 = vadd.f32 %v3069_v20, %v1042_v12  ;;  %1961 = vst [vmem:[%s3078_s12 + $0x100] sm:$0xff] %v1832_v17  ;;  %v1835_v25 = vadd.f32 %v2596_v13, %v3153_v41 }
 0x161   : > { %1972 = vst [vmem:[%s3078_s12 + $0x158] sm:$0xff] %v1843_v21  ;;  %v1846_v26 = vadd.f32 %v3072_v22, %v1044_v15  ;;  %1955 = vst [vmem:[%s3078_s12 + $0xd0] sm:$0xff] %v1826_v23  ;;  %v1829_v27 = vadd.f32 %v3153_v41, %v1254_v19 }
 0x162   : > { %1974 = vst [vmem:[%s3078_s12 + $0x168] sm:$0xff] %v1845_v24  ;;  %1964 = vst [vmem:[%s3078_s12 + $0x118] sm:$0xff] %v1835_v25 }
 0x163   : > { %1975 = vst [vmem:[%s3078_s12 + $0x170] sm:$0xff] %v1846_v26  ;;  %1958 = vst [vmem:[%s3078_s12 + $0xe8] sm:$0xff] %v1829_v27 }
 0x165   : > { %v1048_v28 = vpop.f32.mrb[32].mxu0  ;;  %v2599_v29 = vpop.f32.mrb[32].mxu1 }
 0x166   : > { %v1050_v30 = vpop.f32.mrb[33].mxu0  ;;  %v1267_v31 = vpop.f32.mrb[33].mxu1  ;;  %v1848_v34 = vadd.f32 %v3069_v20, %v1048_v28  ;;  %v1844_v36 = vadd.f32 %v2599_v29, %v3153_v41 }
 0x167   : > { %v1052_v32 = vpop.f32.mrb[34].mxu0  ;;  %v2600_v33 = vpop.f32.mrb[34].mxu1  ;;  %v1849_v38 = vadd.f32 %v3072_v22, %v1050_v30  ;;  %v1838_v39 = vadd.f32 %v3153_v41, %v1267_v31 }
 0x168   : > { %v1054_v35 = vpop.f32.mrb[35].mxu0  ;;  %v1270_v37 = vpop.f32.mrb[35].mxu1  ;;  %1977 = vst [vmem:[%s3078_s12 + $0x180] sm:$0xff] %v1848_v34  ;;  %v1851_v40 = vadd.f32 %v3069_v20, %v1052_v32  ;;  %1973 = vst [vmem:[%s3078_s12 + $0x160] sm:$0xff] %v1844_v36  ;;  %v1847_v16 = vadd.f32 %v2600_v33, %v3153_v41 }
 0x169   : > { %1978 = vst [vmem:[%s3078_s12 + $0x188] sm:$0xff] %v1849_v38  ;;  %v1852_v42 = vadd.f32 %v3072_v22, %v1054_v35  ;;  %1967 = vst [vmem:[%s3078_s12 + $0x130] sm:$0xff] %v1838_v39  ;;  %v1841_v43 = vadd.f32 %v3153_v41, %v1270_v37 }
 0x16a   : > { %1980 = vst [vmem:[%s3078_s12 + $0x198] sm:$0xff] %v1851_v40  ;;  %1976 = vst [vmem:[%s3078_s12 + $0x178] sm:$0xff] %v1847_v16 }
 0x16b   : > { %1981 = vst [vmem:[%s3078_s12 + $0x1a0] sm:$0xff] %v1852_v42  ;;  %1970 = vst [vmem:[%s3078_s12 + $0x148] sm:$0xff] %v1841_v43 }
 0x16d   : > { %v1058_v44 = vpop.f32.mrb[36].mxu0  ;;  %v2603_v45 = vpop.f32.mrb[36].mxu1 }
 0x16e   : > { %v1060_v46 = vpop.f32.mrb[37].mxu0  ;;  %v1283_v47 = vpop.f32.mrb[37].mxu1  ;;  %v1854_v18 = vadd.f32 %v3069_v20, %v1058_v44  ;;  %v1856_v51 = vadd.f32 %v2603_v45, %v3153_v41 }
 0x16f   : > { %v1062_v48 = vpop.f32.mrb[38].mxu0  ;;  %v2604_v49 = vpop.f32.mrb[38].mxu1  ;;  %v1855_v53 = vadd.f32 %v3072_v22, %v1060_v46  ;;  %v1850_v54 = vadd.f32 %v3153_v41, %v1283_v47 }
 0x170   : > { %v1064_v50 = vpop.f32.mrb[39].mxu0  ;;  %v1286_v52 = vpop.f32.mrb[39].mxu1  ;;  %1983 = vst [vmem:[%s3078_s12 + $0x1b0] sm:$0xff] %v1854_v18  ;;  %v1857_v55 = vadd.f32 %v3069_v20, %v1062_v48  ;;  %1985 = vst [vmem:[%s3078_s12 + $0x1c0] sm:$0xff] %v1856_v51  ;;  %v1859_v56 = vadd.f32 %v2604_v49, %v3153_v41 }
 0x171   : > { %1984 = vst [vmem:[%s3078_s12 + $0x1b8] sm:$0xff] %v1855_v53  ;;  %v1858_v57 = vadd.f32 %v3072_v22, %v1064_v50  ;;  %1979 = vst [vmem:[%s3078_s12 + $0x190] sm:$0xff] %v1850_v54  ;;  %v1853_v58 = vadd.f32 %v3153_v41, %v1286_v52 }
 0x172   : > { %1986 = vst [vmem:[%s3078_s12 + $0x1c8] sm:$0xff] %v1857_v55  ;;  %1988 = vst [vmem:[%s3078_s12 + $0x1d8] sm:$0xff] %v1859_v56 }
 0x173   : > { %1987 = vst [vmem:[%s3078_s12 + $0x1d0] sm:$0xff] %v1858_v57  ;;  %1982 = vst [vmem:[%s3078_s12 + $0x1a8] sm:$0xff] %v1853_v58 }
 0x175   : > { %v1068_v59 = vpop.f32.mrb[40].mxu0  ;;  %v2607_v60 = vpop.f32.mrb[40].mxu1 }
 0x176   : > { %v1070_v61 = vpop.f32.mrb[41].mxu0  ;;  %v1299_v62 = vpop.f32.mrb[41].mxu1  ;;  %v1860_v1 = vadd.f32 %v3069_v20, %v1068_v59  ;;  %v1868_v3 = vadd.f32 %v2607_v60, %v3153_v41 }
 0x177   : > { %v1072_v63 = vpop.f32.mrb[42].mxu0  ;;  %v2608_v0 = vpop.f32.mrb[42].mxu1  ;;  %v1861_v5 = vadd.f32 %v3072_v22, %v1070_v61  ;;  %v1862_v6 = vadd.f32 %v3153_v41, %v1299_v62 }
 0x178   : > { %v1074_v2 = vpop.f32.mrb[43].mxu0  ;;  %v1302_v4 = vpop.f32.mrb[43].mxu1  ;;  %1989 = vst [vmem:[%s3078_s12 + $0x1e0] sm:$0xff] %v1860_v1  ;;  %v1863_v7 = vadd.f32 %v3069_v20, %v1072_v63  ;;  %1997 = vst [vmem:[%s3078_s12 + $0x220] sm:$0xff] %v1868_v3  ;;  %v1871_v8 = vadd.f32 %v2608_v0, %v3153_v41 }
 0x179   : > { %1990 = vst [vmem:[%s3078_s12 + $0x1e8] sm:$0xff] %v1861_v5  ;;  %v1864_v9 = vadd.f32 %v3072_v22, %v1074_v2  ;;  %1991 = vst [vmem:[%s3078_s12 + $0x1f0] sm:$0xff] %v1862_v6  ;;  %v1865_v10 = vadd.f32 %v3153_v41, %v1302_v4 }
 0x17a   : > { %1992 = vst [vmem:[%s3078_s12 + $0x1f8] sm:$0xff] %v1863_v7  ;;  %2000 = vst [vmem:[%s3078_s12 + $0x238] sm:$0xff] %v1871_v8 }
 0x17b   : > { %1993 = vst [vmem:[%s3078_s12 + $0x200] sm:$0xff] %v1864_v9  ;;  %1994 = vst [vmem:[%s3078_s12 + $0x208] sm:$0xff] %v1865_v10 }
 0x17d   : > { %v1078_v11 = vpop.f32.mrb[44].mxu0  ;;  %v2611_v12 = vpop.f32.mrb[44].mxu1 }
 0x17e   : > { %v1080_v13 = vpop.f32.mrb[45].mxu0  ;;  %v1315_v14 = vpop.f32.mrb[45].mxu1  ;;  %v1866_v19 = vadd.f32 %v3069_v20, %v1078_v11  ;;  %v1880_v23 = vadd.f32 %v2611_v12, %v3153_v41 }
 0x17f   : > { %v1082_v15 = vpop.f32.mrb[46].mxu0  ;;  %v2612_v17 = vpop.f32.mrb[46].mxu1  ;;  %v1867_v25 = vadd.f32 %v3072_v22, %v1080_v13  ;;  %v1874_v26 = vadd.f32 %v3153_v41, %v1315_v14 }
 0x180   : > { %v1084_v21 = vpop.f32.mrb[47].mxu0  ;;  %v1318_v24 = vpop.f32.mrb[47].mxu1  ;;  %1995 = vst [vmem:[%s3078_s12 + $0x210] sm:$0xff] %v1866_v19  ;;  %v1869_v27 = vadd.f32 %v3069_v20, %v1082_v15  ;;  %2009 = vst [vmem:[%s3078_s12 + $0x280] sm:$0xff] %v1880_v23  ;;  %v1883_v28 = vadd.f32 %v2612_v17, %v3153_v41 }
 0x181   : > { %1996 = vst [vmem:[%s3078_s12 + $0x218] sm:$0xff] %v1867_v25  ;;  %v1870_v29 = vadd.f32 %v3072_v22, %v1084_v21  ;;  %2003 = vst [vmem:[%s3078_s12 + $0x250] sm:$0xff] %v1874_v26  ;;  %v1877_v30 = vadd.f32 %v3153_v41, %v1318_v24 }
 0x182   : > { %1998 = vst [vmem:[%s3078_s12 + $0x228] sm:$0xff] %v1869_v27  ;;  %2012 = vst [vmem:[%s3078_s12 + $0x298] sm:$0xff] %v1883_v28 }
 0x183   : > { %1999 = vst [vmem:[%s3078_s12 + $0x230] sm:$0xff] %v1870_v29  ;;  %2006 = vst [vmem:[%s3078_s12 + $0x268] sm:$0xff] %v1877_v30 }
 0x185   : > { %v1088_v31 = vpop.f32.mrb[48].mxu0  ;;  %v2615_v32 = vpop.f32.mrb[48].mxu1 }
 0x186   : > { %v1090_v33 = vpop.f32.mrb[49].mxu0  ;;  %v1331_v34 = vpop.f32.mrb[49].mxu1  ;;  %v1872_v37 = vadd.f32 %v3069_v20, %v1088_v31  ;;  %v1892_v39 = vadd.f32 %v2615_v32, %v3153_v41 }
 0x187   : > { %v1092_v35 = vpop.f32.mrb[50].mxu0  ;;  %v2616_v36 = vpop.f32.mrb[50].mxu1  ;;  %v1873_v16 = vadd.f32 %v3072_v22, %v1090_v33  ;;  %v1886_v42 = vadd.f32 %v3153_v41, %v1331_v34 }
 0x188   : > { %v1094_v38 = vpop.f32.mrb[51].mxu0  ;;  %v1334_v40 = vpop.f32.mrb[51].mxu1  ;;  %2001 = vst [vmem:[%s3078_s12 + $0x240] sm:$0xff] %v1872_v37  ;;  %v1875_v43 = vadd.f32 %v3069_v20, %v1092_v35  ;;  %2021 = vst [vmem:[%s3078_s12 + $0x2e0] sm:$0xff] %v1892_v39  ;;  %v1895_v44 = vadd.f32 %v2616_v36, %v3153_v41 }
 0x189   : > { %2002 = vst [vmem:[%s3078_s12 + $0x248] sm:$0xff] %v1873_v16  ;;  %v1876_v45 = vadd.f32 %v3072_v22, %v1094_v38  ;;  %2015 = vst [vmem:[%s3078_s12 + $0x2b0] sm:$0xff] %v1886_v42  ;;  %v1889_v46 = vadd.f32 %v3153_v41, %v1334_v40  ;;  %v2087_v16 = vld [vmem:[%s3078_s12 + $0x10] sm:$0xff] (%p2840_p6)  ;;  %v2091_v42 = vld [vmem:[%s3078_s12 + $0x20] sm:$0xff] (%p2840_p6) }
 0x18a   : > { %2004 = vst [vmem:[%s3078_s12 + $0x258] sm:$0xff] %v1875_v43  ;;  %2024 = vst [vmem:[%s3078_s12 + $0x2f8] sm:$0xff] %v1895_v44  ;;  %v2093_v43 = vld [vmem:[%s3078_s12 + $0x28] sm:$0xff] (%p2840_p6)  ;;  %v2095_v44 = vld [vmem:[%s3078_s12 + $0x30] sm:$0xff] (%p2840_p6) }
 0x18b   : > { %2005 = vst [vmem:[%s3078_s12 + $0x260] sm:$0xff] %v1876_v45  ;;  %2018 = vst [vmem:[%s3078_s12 + $0x2c8] sm:$0xff] %v1889_v46  ;;  %v2097_v45 = vld [vmem:[%s3078_s12 + $0x38] sm:$0xff] (%p2840_p6)  ;;  %v2099_v46 = vld [vmem:[%s3078_s12 + $0x40] sm:$0xff] (%p2840_p6) }
 0x18c   : > { %2088 = vst [vmem:[%s3350_s28 + $0x10] sm:$0xff] (%p2840_p6), %v2087_v16  ;;  %2092 = vst [vmem:[%s3350_s28 + $0x50] sm:$0xff] (%p2840_p6), %v2091_v42  ;;  %v2215_v16 = vld [vmem:[%s3078_s12 + $0x210] sm:$0xff] (%p2840_p6)  ;;  %v2219_v42 = vld [vmem:[%s3078_s12 + $0x220] sm:$0xff] (%p2840_p6) }
 0x18d   : > { %v1098_v47 = vpop.f32.mrb[52].mxu0  ;;  %v2619_v48 = vpop.f32.mrb[52].mxu1  ;;  %2094 = vst [vmem:[%s3350_s28 + $0x58] sm:$0xff] (%p2840_p6), %v2093_v43  ;;  %2096 = vst [vmem:[%s3350_s28 + $0x90] sm:$0xff] (%p2840_p6), %v2095_v44  ;;  %v2221_v43 = vld [vmem:[%s3078_s12 + $0x228] sm:$0xff] (%p2840_p6)  ;;  %v2223_v44 = vld [vmem:[%s3078_s12 + $0x230] sm:$0xff] (%p2840_p6) }
 0x18e   : > { %v1100_v49 = vpop.f32.mrb[53].mxu0  ;;  %v1347_v18 = vpop.f32.mrb[53].mxu1  ;;  %v1878_v52 = vadd.f32 %v3069_v20, %v1098_v47  ;;  %v1904_v54 = vadd.f32 %v2619_v48, %v3153_v41  ;;  %2098 = vst [vmem:[%s3350_s28 + $0x98] sm:$0xff] (%p2840_p6), %v2097_v45  ;;  %2100 = vst [vmem:[%s3350_s28 + $0xa0] sm:$0xff] (%p2840_p6), %v2099_v46  ;;  %v2101_v47 = vld [vmem:[%s3078_s12 + $0x48] sm:$0xff] (%p2840_p6)  ;;  %v2103_v48 = vld [vmem:[%s3078_s12 + $0x50] sm:$0xff] (%p2840_p6) }
 0x18f   : > { %v1102_v50 = vpop.f32.mrb[54].mxu0  ;;  %v2620_v51 = vpop.f32.mrb[54].mxu1  ;;  %v1879_v56 = vadd.f32 %v3072_v22, %v1100_v49  ;;  %v1898_v57 = vadd.f32 %v3153_v41, %v1347_v18  ;;  %v2105_v49 = vld [vmem:[%s3078_s12 + $0x58] sm:$0xff] (%p2840_p6)  ;;  %2102 = vst [vmem:[%s3350_s28 + $0xd8] sm:$0xff] (%p2840_p6), %v2101_v47  ;;  %2104 = vst [vmem:[%s3350_s28 + $0xe0] sm:$0xff] (%p2840_p6), %v2103_v48  ;;  %v2107_v18 = vld [vmem:[%s3078_s12 + $0x60] sm:$0xff] (%p2840_p6) }
 0x190   : > { %v1104_v53 = vpop.f32.mrb[55].mxu0  ;;  %v1350_v55 = vpop.f32.mrb[55].mxu1  ;;  %2007 = vst [vmem:[%s3078_s12 + $0x270] sm:$0xff] %v1878_v52  ;;  %v1881_v58 = vadd.f32 %v3069_v20, %v1102_v50  ;;  %2033 = vst [vmem:[%s3078_s12 + $0x340] sm:$0xff] %v1904_v54  ;;  %v1907_v59 = vadd.f32 %v2620_v51, %v3153_v41  ;;  %v2109_v50 = vld [vmem:[%s3078_s12 + $0x68] sm:$0xff] (%p2840_p6)  ;;  %v2111_v51 = vld [vmem:[%s3078_s12 + $0x70] sm:$0xff] (%p2840_p6) }
 0x191   : > { %2008 = vst [vmem:[%s3078_s12 + $0x278] sm:$0xff] %v1879_v56  ;;  %v1882_v60 = vadd.f32 %v3072_v22, %v1104_v53  ;;  %2027 = vst [vmem:[%s3078_s12 + $0x310] sm:$0xff] %v1898_v57  ;;  %v1901_v61 = vadd.f32 %v3153_v41, %v1350_v55  ;;  %v2113_v52 = vld [vmem:[%s3078_s12 + $0x78] sm:$0xff] (%p2840_p6)  ;;  %v2115_v53 = vld [vmem:[%s3078_s12 + $0x80] sm:$0xff] (%p2840_p6) }
 0x192   : > { %2010 = vst [vmem:[%s3078_s12 + $0x288] sm:$0xff] %v1881_v58  ;;  %2036 = vst [vmem:[%s3078_s12 + $0x358] sm:$0xff] %v1907_v59  ;;  %v2117_v54 = vld [vmem:[%s3078_s12 + $0x88] sm:$0xff] (%p2840_p6)  ;;  %v2119_v55 = vld [vmem:[%s3078_s12 + $0x90] sm:$0xff] (%p2840_p6) }
 0x193   : > { %2011 = vst [vmem:[%s3078_s12 + $0x290] sm:$0xff] %v1882_v60  ;;  %2030 = vst [vmem:[%s3078_s12 + $0x328] sm:$0xff] %v1901_v61  ;;  %v2121_v56 = vld [vmem:[%s3078_s12 + $0x98] sm:$0xff] (%p2840_p6)  ;;  %v2123_v57 = vld [vmem:[%s3078_s12 + $0xa0] sm:$0xff] (%p2840_p6) }
 0x194   : > { %2106 = vst [vmem:[%s3350_s28 + $0xe8] sm:$0xff] (%p2840_p6), %v2105_v49  ;;  %2108 = vst [vmem:[%s3350_s28 + $0x120] sm:$0xff] (%p2840_p6), %v2107_v18  ;;  %v2125_v58 = vld [vmem:[%s3078_s12 + $0xa8] sm:$0xff] (%p2840_p6)  ;;  %v2127_v59 = vld [vmem:[%s3078_s12 + $0xb0] sm:$0xff] (%p2840_p6) }
 0x195   : > { %v1108_v62 = vpop.f32.mrb[56].mxu0  ;;  %v2623_v63 = vpop.f32.mrb[56].mxu1  ;;  %2110 = vst [vmem:[%s3350_s28 + $0x128] sm:$0xff] (%p2840_p6), %v2109_v50  ;;  %2112 = vst [vmem:[%s3350_s28 + $0x130] sm:$0xff] (%p2840_p6), %v2111_v51  ;;  %v2129_v60 = vld [vmem:[%s3078_s12 + $0xb8] sm:$0xff] (%p2840_p6)  ;;  %v2131_v61 = vld [vmem:[%s3078_s12 + $0xc0] sm:$0xff] (%p2840_p6) }
 0x196   : > { %v1110_v0 = vpop.f32.mrb[57].mxu0  ;;  %v1363_v1 = vpop.f32.mrb[57].mxu1  ;;  %v1884_v4 = vadd.f32 %v3069_v20, %v1108_v62  ;;  %v1916_v6 = vadd.f32 %v2623_v63, %v3153_v41  ;;  %2114 = vst [vmem:[%s3350_s28 + $0x168] sm:$0xff] (%p2840_p6), %v2113_v52  ;;  %2116 = vst [vmem:[%s3350_s28 + $0x170] sm:$0xff] (%p2840_p6), %v2115_v53  ;;  %v2133_v62 = vld [vmem:[%s3078_s12 + $0xc8] sm:$0xff] (%p2840_p6)  ;;  %v2135_v63 = vld [vmem:[%s3078_s12 + $0xd0] sm:$0xff] (%p2840_p6) }
 0x197   : > { %v1112_v2 = vpop.f32.mrb[58].mxu0  ;;  %v2624_v3 = vpop.f32.mrb[58].mxu1  ;;  %v1885_v8 = vadd.f32 %v3072_v22, %v1110_v0  ;;  %v1910_v9 = vadd.f32 %v3153_v41, %v1363_v1  ;;  %2118 = vst [vmem:[%s3350_s28 + $0x178] sm:$0xff] (%p2840_p6), %v2117_v54  ;;  %2120 = vst [vmem:[%s3350_s28 + $0x1b0] sm:$0xff] (%p2840_p6), %v2119_v55  ;;  %v2137_v0 = vld [vmem:[%s3078_s12 + $0xd8] sm:$0xff] (%p2840_p6)  ;;  %v2139_v1 = vld [vmem:[%s3078_s12 + $0xe0] sm:$0xff] (%p2840_p6) }
 0x198   : > { %v1114_v5 = vpop.f32.mrb[59].mxu0  ;;  %v1366_v7 = vpop.f32.mrb[59].mxu1  ;;  %2013 = vst [vmem:[%s3078_s12 + $0x2a0] sm:$0xff] %v1884_v4  ;;  %v1887_v10 = vadd.f32 %v3069_v20, %v1112_v2  ;;  %2045 = vst [vmem:[%s3078_s12 + $0x3a0] sm:$0xff] %v1916_v6  ;;  %v1919_v11 = vadd.f32 %v2624_v3, %v3153_v41  ;;  %v2141_v2 = vld [vmem:[%s3078_s12 + $0xe8] sm:$0xff] (%p2840_p6)  ;;  %v2143_v3 = vld [vmem:[%s3078_s12 + $0xf0] sm:$0xff] (%p2840_p6) }
 0x199   : > { %2014 = vst [vmem:[%s3078_s12 + $0x2a8] sm:$0xff] %v1885_v8  ;;  %v1888_v12 = vadd.f32 %v3072_v22, %v1114_v5  ;;  %2039 = vst [vmem:[%s3078_s12 + $0x370] sm:$0xff] %v1910_v9  ;;  %v1913_v13 = vadd.f32 %v3153_v41, %v1366_v7  ;;  %v2145_v4 = vld [vmem:[%s3078_s12 + $0xf8] sm:$0xff] (%p2840_p6)  ;;  %v2147_v5 = vld [vmem:[%s3078_s12 + $0x100] sm:$0xff] (%p2840_p6) }
 0x19a   : > { %2016 = vst [vmem:[%s3078_s12 + $0x2b8] sm:$0xff] %v1887_v10  ;;  %2048 = vst [vmem:[%s3078_s12 + $0x3b8] sm:$0xff] %v1919_v11  ;;  %v2149_v6 = vld [vmem:[%s3078_s12 + $0x108] sm:$0xff] (%p2840_p6)  ;;  %v2151_v7 = vld [vmem:[%s3078_s12 + $0x110] sm:$0xff] (%p2840_p6) }
 0x19b   : > { %2017 = vst [vmem:[%s3078_s12 + $0x2c0] sm:$0xff] %v1888_v12  ;;  %2042 = vst [vmem:[%s3078_s12 + $0x388] sm:$0xff] %v1913_v13  ;;  %v2153_v8 = vld [vmem:[%s3078_s12 + $0x118] sm:$0xff] (%p2840_p6)  ;;  %v2155_v9 = vld [vmem:[%s3078_s12 + $0x120] sm:$0xff] (%p2840_p6) }
 0x19c   : > { %2122 = vst [vmem:[%s3350_s28 + $0x1b8] sm:$0xff] (%p2840_p6), %v2121_v56  ;;  %2124 = vst [vmem:[%s3350_s28 + $0x1c0] sm:$0xff] (%p2840_p6), %v2123_v57  ;;  %v2157_v10 = vld [vmem:[%s3078_s12 + $0x128] sm:$0xff] (%p2840_p6)  ;;  %v2159_v11 = vld [vmem:[%s3078_s12 + $0x130] sm:$0xff] (%p2840_p6) }
 0x19d   : > { %v1118_v14 = vpop.f32.mrb[60].mxu0  ;;  %v2627_v15 = vpop.f32.mrb[60].mxu1  ;;  %2126 = vst [vmem:[%s3350_s28 + $0x1f8] sm:$0xff] (%p2840_p6), %v2125_v58  ;;  %2128 = vst [vmem:[%s3350_s28 + $0x200] sm:$0xff] (%p2840_p6), %v2127_v59  ;;  %v2161_v12 = vld [vmem:[%s3078_s12 + $0x138] sm:$0xff] (%p2840_p6)  ;;  %v2163_v13 = vld [vmem:[%s3078_s12 + $0x140] sm:$0xff] (%p2840_p6) }
 0x19e   : > { %v1120_v17 = vpop.f32.mrb[61].mxu0  ;;  %v1379_v19 = vpop.f32.mrb[61].mxu1  ;;  %v1890_v24 = vadd.f32 %v3069_v20, %v1118_v14  ;;  %v1928_v26 = vadd.f32 %v2627_v15, %v3153_v41  ;;  %2130 = vst [vmem:[%s3350_s28 + $0x208] sm:$0xff] (%p2840_p6), %v2129_v60  ;;  %2132 = vst [vmem:[%s3350_s28 + $0x240] sm:$0xff] (%p2840_p6), %v2131_v61  ;;  %v2165_v14 = vld [vmem:[%s3078_s12 + $0x148] sm:$0xff] (%p2840_p6)  ;;  %v2167_v15 = vld [vmem:[%s3078_s12 + $0x150] sm:$0xff] (%p2840_p6) }
 0x19f   : > { %v1122_v21 = vpop.f32.mrb[62].mxu0  ;;  %v2628_v23 = vpop.f32.mrb[62].mxu1  ;;  %v1891_v28 = vadd.f32 %v3072_v22, %v1120_v17  ;;  %v1922_v29 = vadd.f32 %v3153_v41, %v1379_v19  ;;  %2134 = vst [vmem:[%s3350_s28 + $0x248] sm:$0xff] (%p2840_p6), %v2133_v62  ;;  %2136 = vst [vmem:[%s3350_s28 + $0x250] sm:$0xff] (%p2840_p6), %v2135_v63  ;;  %v2169_v17 = vld [vmem:[%s3078_s12 + $0x158] sm:$0xff] (%p2840_p6)  ;;  %v2171_v19 = vld [vmem:[%s3078_s12 + $0x160] sm:$0xff] (%p2840_p6) }
 0x1a0   : > { %v1124_v25 = vpop.f32.mrb[63].mxu0  ;;  %v1382_v27 = vpop.f32.mrb[63].mxu1  ;;  %2019 = vst [vmem:[%s3078_s12 + $0x2d0] sm:$0xff] %v1890_v24  ;;  %v1893_v30 = vadd.f32 %v3069_v20, %v1122_v21  ;;  %2057 = vst [vmem:[%s3078_s12 + $0x400] sm:$0xff] %v1928_v26  ;;  %v2173_v21 = vld [vmem:[%s3078_s12 + $0x168] sm:$0xff] (%p2840_p6)  ;;  %v2175_v23 = vld [vmem:[%s3078_s12 + $0x170] sm:$0xff] (%p2840_p6) }
 0x1a1   : > { %2020 = vst [vmem:[%s3078_s12 + $0x2d8] sm:$0xff] %v1891_v28  ;;  %v1894_v31 = vadd.f32 %v3072_v22, %v1124_v25  ;;  %2051 = vst [vmem:[%s3078_s12 + $0x3d0] sm:$0xff] %v1922_v29  ;;  %v1925_v32 = vadd.f32 %v3153_v41, %v1382_v27  ;;  %v2085_v41 = vld [vmem:[%s3078_s12 + $0x8] sm:$0xff] (%p2840_p6)  ;;  %v2177_v24 = vld [vmem:[%s3078_s12 + $0x178] sm:$0xff] (%p2840_p6) }
 0x1a2   : > { %2022 = vst [vmem:[%s3078_s12 + $0x2e8] sm:$0xff] %v1893_v30  ;;  %2086 = vst [vmem:[%s3350_s28 + $0x8] sm:$0xff] (%p2840_p6), %v2085_v41  ;;  %v2179_v25 = vld [vmem:[%s3078_s12 + $0x180] sm:$0xff] (%p2840_p6)  ;;  %v2181_v26 = vld [vmem:[%s3078_s12 + $0x188] sm:$0xff] (%p2840_p6) }
 0x1a3   : > { %2023 = vst [vmem:[%s3078_s12 + $0x2f0] sm:$0xff] %v1894_v31  ;;  %2054 = vst [vmem:[%s3078_s12 + $0x3e8] sm:$0xff] %v1925_v32  ;;  %v2183_v27 = vld [vmem:[%s3078_s12 + $0x190] sm:$0xff] (%p2840_p6)  ;;  %v2185_v28 = vld [vmem:[%s3078_s12 + $0x198] sm:$0xff] (%p2840_p6) }
 0x1a4   : > { %2138 = vst [vmem:[%s3350_s28 + $0x288] sm:$0xff] (%p2840_p6), %v2137_v0  ;;  %2140 = vst [vmem:[%s3350_s28 + $0x290] sm:$0xff] (%p2840_p6), %v2139_v1  ;;  %v2187_v29 = vld [vmem:[%s3078_s12 + $0x1a0] sm:$0xff] (%p2840_p6)  ;;  %v2189_v30 = vld [vmem:[%s3078_s12 + $0x1a8] sm:$0xff] (%p2840_p6) }
 0x1a5   : > { %v1128_v33 = vpop.f32.mrb[64].mxu0  ;;  %2064 = sbr.rel (!%p2840_p6) target bundleno = 474 (0x1da), region = 70  ;;  %2142 = vst [vmem:[%s3350_s28 + $0x298] sm:$0xff] (%p2840_p6), %v2141_v2  ;;  %2144 = vst [vmem:[%s3350_s28 + $0x2d0] sm:$0xff] (%p2840_p6), %v2143_v3  ;;  %v2191_v31 = vld [vmem:[%s3078_s12 + $0x1b0] sm:$0xff] (%p2840_p6)  ;;  %v2193_v32 = vld [vmem:[%s3078_s12 + $0x1b8] sm:$0xff] (%p2840_p6) }
 0x1a6   : > { %v1130_v34 = vpop.f32.mrb[65].mxu0  ;;  %v1896_v36 = vadd.f32 %v3069_v20, %v1128_v33  ;;  %2146 = vst [vmem:[%s3350_s28 + $0x2d8] sm:$0xff] (%p2840_p6), %v2145_v4  ;;  %2148 = vst [vmem:[%s3350_s28 + $0x2e0] sm:$0xff] (%p2840_p6), %v2147_v5  ;;  %v2195_v33 = vld [vmem:[%s3078_s12 + $0x1c0] sm:$0xff] (%p2840_p6)  ;;  %v2213_v41 = vld [vmem:[%s3078_s12 + $0x208] sm:$0xff] (%p2840_p6) }
 0x1a7   : > { %v1132_v35 = vpop.f32.mrb[66].mxu0  ;;  %v1897_v38 = vadd.f32 %v3072_v22, %v1130_v34  ;;  %2150 = vst [vmem:[%s3350_s28 + $0x318] sm:$0xff] (%p2840_p6), %v2149_v6  ;;  %2152 = vst [vmem:[%s3350_s28 + $0x320] sm:$0xff] (%p2840_p6), %v2151_v7  ;;  %v2197_v34 = vld [vmem:[%s3078_s12 + $0x1c8] sm:$0xff] (%p2840_p6)  ;;  %v2225_v45 = vld [vmem:[%s3078_s12 + $0x238] sm:$0xff] (%p2840_p6) }
 0x1a8   : > { %v1134_v37 = vpop.f32.mrb[67].mxu0  ;;  %2025 = vst [vmem:[%s3078_s12 + $0x300] sm:$0xff] %v1896_v36  ;;  %v1899_v39 = vadd.f32 %v3069_v20, %v1132_v35  ;;  %v2083_v20 = vld [vmem:[%s3078_s12] sm:$0xff] (%p2840_p6)  ;;  %2154 = vst [vmem:[%s3350_s28 + $0x328] sm:$0xff] (%p2840_p6), %v2153_v8  ;;  %v2199_v35 = vld [vmem:[%s3078_s12 + $0x1d0] sm:$0xff] (%p2840_p6) }
 0x1a9   : > { %2026 = vst [vmem:[%s3078_s12 + $0x308] sm:$0xff] %v1897_v38  ;;  %v1900_v40 = vadd.f32 %v3072_v22, %v1134_v37  ;;  %v2089_v22 = vld [vmem:[%s3078_s12 + $0x18] sm:$0xff] (%p2840_p6)  ;;  %2084 = vst [vmem:[%s3350_s28] sm:$0xff] (%p2840_p6), %v2083_v20  ;;  %v2203_v37 = vld [vmem:[%s3078_s12 + $0x1e0] sm:$0xff] (%p2840_p6) }
 0x1aa   : > { %2028 = vst [vmem:[%s3078_s12 + $0x318] sm:$0xff] %v1899_v39  ;;  %2090 = vst [vmem:[%s3350_s28 + $0x48] sm:$0xff] (%p2840_p6), %v2089_v22  ;;  %v2201_v36 = vld [vmem:[%s3078_s12 + $0x1d8] sm:$0xff] (%p2840_p6)  ;;  %v2205_v38 = vld [vmem:[%s3078_s12 + $0x1e8] sm:$0xff] (%p2840_p6) }
 0x1ab   : > { %2029 = vst [vmem:[%s3078_s12 + $0x320] sm:$0xff] %v1900_v40  ;;  %2156 = vst [vmem:[%s3350_s28 + $0x360] sm:$0xff] (%p2840_p6), %v2155_v9  ;;  %v2207_v39 = vld [vmem:[%s3078_s12 + $0x1f0] sm:$0xff] (%p2840_p6)  ;;  %v2209_v40 = vld [vmem:[%s3078_s12 + $0x1f8] sm:$0xff] (%p2840_p6) }
 0x1ac   : > { %2158 = vst [vmem:[%s3350_s28 + $0x368] sm:$0xff] %v2157_v10  ;;  %2160 = vst [vmem:[%s3350_s28 + $0x370] sm:$0xff] %v2159_v11  ;;  %v2211_v20 = vld [vmem:[%s3078_s12 + $0x200] sm:$0xff]  ;;  %v2217_v22 = vld [vmem:[%s3078_s12 + $0x218] sm:$0xff] }
 0x1ad   : > { %2162 = vst [vmem:[%s3350_s28 + $0x3a8] sm:$0xff] %v2161_v12  ;;  %2164 = vst [vmem:[%s3350_s28 + $0x3b0] sm:$0xff] %v2163_v13  ;;  %v2227_v46 = vld [vmem:[%s3078_s12 + $0x240] sm:$0xff]  ;;  %v2229_v47 = vld [vmem:[%s3078_s12 + $0x248] sm:$0xff] }
 0x1ae   : > { %2166 = vst [vmem:[%s3350_s28 + $0x3b8] sm:$0xff] %v2165_v14  ;;  %2168 = vst [vmem:[%s3350_s28 + $0x3f0] sm:$0xff] %v2167_v15  ;;  %v2231_v48 = vld [vmem:[%s3078_s12 + $0x250] sm:$0xff]  ;;  %v2233_v49 = vld [vmem:[%s3078_s12 + $0x258] sm:$0xff] }
 0x1af   : > { %2170 = vst [vmem:[%s3350_s28 + $0x3f8] sm:$0xff] %v2169_v17  ;;  %2172 = vst [vmem:[%s3350_s28 + $0x400] sm:$0xff] %v2171_v19  ;;  %v2235_v18 = vld [vmem:[%s3078_s12 + $0x260] sm:$0xff]  ;;  %v2237_v50 = vld [vmem:[%s3078_s12 + $0x268] sm:$0xff] }
 0x1b0   : > { %2174 = vst [vmem:[%s3350_s28 + $0x438] sm:$0xff] %v2173_v21  ;;  %2176 = vst [vmem:[%s3350_s28 + $0x440] sm:$0xff] %v2175_v23  ;;  %v2239_v51 = vld [vmem:[%s3078_s12 + $0x270] sm:$0xff]  ;;  %v2241_v52 = vld [vmem:[%s3078_s12 + $0x278] sm:$0xff] }
 0x1b1   : > { %2178 = vst [vmem:[%s3350_s28 + $0x448] sm:$0xff] %v2177_v24  ;;  %2180 = vst [vmem:[%s3350_s28 + $0x480] sm:$0xff] %v2179_v25  ;;  %v2243_v53 = vld [vmem:[%s3078_s12 + $0x280] sm:$0xff]  ;;  %v2245_v54 = vld [vmem:[%s3078_s12 + $0x288] sm:$0xff] }
 0x1b2   : > { %2182 = vst [vmem:[%s3350_s28 + $0x488] sm:$0xff] %v2181_v26  ;;  %2184 = vst [vmem:[%s3350_s28 + $0x490] sm:$0xff] %v2183_v27  ;;  %v2247_v55 = vld [vmem:[%s3078_s12 + $0x290] sm:$0xff]  ;;  %v2249_v56 = vld [vmem:[%s3078_s12 + $0x298] sm:$0xff] }
 0x1b3   : > { %2186 = vst [vmem:[%s3350_s28 + $0x4c8] sm:$0xff] %v2185_v28  ;;  %2188 = vst [vmem:[%s3350_s28 + $0x4d0] sm:$0xff] %v2187_v29  ;;  %v2251_v57 = vld [vmem:[%s3078_s12 + $0x2a0] sm:$0xff]  ;;  %v2253_v58 = vld [vmem:[%s3078_s12 + $0x2a8] sm:$0xff] }
 0x1b4   : > { %2190 = vst [vmem:[%s3350_s28 + $0x4d8] sm:$0xff] %v2189_v30  ;;  %2192 = vst [vmem:[%s3350_s28 + $0x510] sm:$0xff] %v2191_v31  ;;  %v2255_v59 = vld [vmem:[%s3078_s12 + $0x2b0] sm:$0xff]  ;;  %v2257_v60 = vld [vmem:[%s3078_s12 + $0x2b8] sm:$0xff] }
 0x1b5   : > { %2194 = vst [vmem:[%s3350_s28 + $0x518] sm:$0xff] %v2193_v32  ;;  %2196 = vst [vmem:[%s3350_s28 + $0x520] sm:$0xff] %v2195_v33  ;;  %v2259_v61 = vld [vmem:[%s3078_s12 + $0x2c0] sm:$0xff]  ;;  %v2261_v62 = vld [vmem:[%s3078_s12 + $0x2c8] sm:$0xff] }
 0x1b6   : > { %2198 = vst [vmem:[%s3350_s28 + $0x558] sm:$0xff] %v2197_v34  ;;  %2200 = vst [vmem:[%s3350_s28 + $0x560] sm:$0xff] %v2199_v35  ;;  %v2263_v63 = vld [vmem:[%s3078_s12 + $0x2d0] sm:$0xff]  ;;  %v2265_v0 = vld [vmem:[%s3078_s12 + $0x2d8] sm:$0xff] }
 0x1b7   : > { %2202 = vst [vmem:[%s3350_s28 + $0x568] sm:$0xff] %v2201_v36  ;;  %2204 = vst [vmem:[%s3350_s28 + $0x5a0] sm:$0xff] %v2203_v37  ;;  %v2267_v1 = vld [vmem:[%s3078_s12 + $0x2e0] sm:$0xff]  ;;  %v2269_v2 = vld [vmem:[%s3078_s12 + $0x2e8] sm:$0xff] }
 0x1b8   : > { %2206 = vst [vmem:[%s3350_s28 + $0x5a8] sm:$0xff] %v2205_v38  ;;  %2208 = vst [vmem:[%s3350_s28 + $0x5b0] sm:$0xff] %v2207_v39  ;;  %v2271_v3 = vld [vmem:[%s3078_s12 + $0x2f0] sm:$0xff]  ;;  %v2273_v4 = vld [vmem:[%s3078_s12 + $0x2f8] sm:$0xff] }
 0x1b9   : > { %2210 = vst [vmem:[%s3350_s28 + $0x5e8] sm:$0xff] %v2209_v40  ;;  %2212 = vst [vmem:[%s3350_s28 + $0x5f0] sm:$0xff] %v2211_v20  ;;  %v2275_v5 = vld [vmem:[%s3078_s12 + $0x300] sm:$0xff]  ;;  %v2277_v6 = vld [vmem:[%s3078_s12 + $0x308] sm:$0xff] }
 0x1ba   : > { %2214 = vst [vmem:[%s3350_s28 + $0x5f8] sm:$0xff] %v2213_v41  ;;  %2216 = vst [vmem:[%s3350_s28 + $0x630] sm:$0xff] %v2215_v16  ;;  %v2279_v7 = vld [vmem:[%s3078_s12 + $0x310] sm:$0xff]  ;;  %v2281_v8 = vld [vmem:[%s3078_s12 + $0x318] sm:$0xff] }
 0x1bb   : > { %2218 = vst [vmem:[%s3350_s28 + $0x638] sm:$0xff] %v2217_v22  ;;  %2220 = vst [vmem:[%s3350_s28 + $0x640] sm:$0xff] %v2219_v42  ;;  %v2283_v9 = vld [vmem:[%s3078_s12 + $0x320] sm:$0xff]  ;;  %v2285_v10 = vld [vmem:[%s3078_s12 + $0x328] sm:$0xff] }
 0x1bc   : > { %2222 = vst [vmem:[%s3350_s28 + $0x678] sm:$0xff] %v2221_v43  ;;  %2224 = vst [vmem:[%s3350_s28 + $0x680] sm:$0xff] %v2223_v44  ;;  %v2287_v11 = vld [vmem:[%s3078_s12 + $0x330] sm:$0xff]  ;;  %v2289_v12 = vld [vmem:[%s3078_s12 + $0x338] sm:$0xff] }
 0x1bd   : > { %2226 = vst [vmem:[%s3350_s28 + $0x688] sm:$0xff] %v2225_v45  ;;  %2228 = vst [vmem:[%s3350_s28 + $0x6c0] sm:$0xff] %v2227_v46  ;;  %v2291_v13 = vld [vmem:[%s3078_s12 + $0x340] sm:$0xff]  ;;  %v2293_v14 = vld [vmem:[%s3078_s12 + $0x348] sm:$0xff] }
 0x1be   : > { %2230 = vst [vmem:[%s3350_s28 + $0x6c8] sm:$0xff] %v2229_v47  ;;  %2232 = vst [vmem:[%s3350_s28 + $0x6d0] sm:$0xff] %v2231_v48  ;;  %v2295_v15 = vld [vmem:[%s3078_s12 + $0x350] sm:$0xff]  ;;  %v2297_v17 = vld [vmem:[%s3078_s12 + $0x358] sm:$0xff] }
 0x1bf   : > { %2234 = vst [vmem:[%s3350_s28 + $0x708] sm:$0xff] %v2233_v49  ;;  %2236 = vst [vmem:[%s3350_s28 + $0x710] sm:$0xff] %v2235_v18  ;;  %v2299_v19 = vld [vmem:[%s3078_s12 + $0x360] sm:$0xff]  ;;  %v2301_v21 = vld [vmem:[%s3078_s12 + $0x368] sm:$0xff] }
 0x1c0   : > { %2238 = vst [vmem:[%s3350_s28 + $0x718] sm:$0xff] %v2237_v50  ;;  %2240 = vst [vmem:[%s3350_s28 + $0x750] sm:$0xff] %v2239_v51  ;;  %v2303_v23 = vld [vmem:[%s3078_s12 + $0x370] sm:$0xff]  ;;  %v2305_v24 = vld [vmem:[%s3078_s12 + $0x378] sm:$0xff] }
 0x1c1   : > { %2242 = vst [vmem:[%s3350_s28 + $0x758] sm:$0xff] %v2241_v52  ;;  %2244 = vst [vmem:[%s3350_s28 + $0x760] sm:$0xff] %v2243_v53  ;;  %v2307_v25 = vld [vmem:[%s3078_s12 + $0x380] sm:$0xff]  ;;  %v2309_v26 = vld [vmem:[%s3078_s12 + $0x388] sm:$0xff] }
 0x1c2   : > { %2246 = vst [vmem:[%s3350_s28 + $0x798] sm:$0xff] %v2245_v54  ;;  %2248 = vst [vmem:[%s3350_s28 + $0x7a0] sm:$0xff] %v2247_v55  ;;  %v2311_v27 = vld [vmem:[%s3078_s12 + $0x390] sm:$0xff]  ;;  %v2313_v28 = vld [vmem:[%s3078_s12 + $0x398] sm:$0xff] }
 0x1c3   : > { %2250 = vst [vmem:[%s3350_s28 + $0x7a8] sm:$0xff] %v2249_v56  ;;  %2252 = vst [vmem:[%s3350_s28 + $0x7e0] sm:$0xff] %v2251_v57  ;;  %v2315_v29 = vld [vmem:[%s3078_s12 + $0x3a0] sm:$0xff]  ;;  %v2317_v30 = vld [vmem:[%s3078_s12 + $0x3a8] sm:$0xff] }
 0x1c4   : > { %2254 = vst [vmem:[%s3350_s28 + $0x7e8] sm:$0xff] %v2253_v58  ;;  %2256 = vst [vmem:[%s3350_s28 + $0x7f0] sm:$0xff] %v2255_v59  ;;  %v2319_v31 = vld [vmem:[%s3078_s12 + $0x3b0] sm:$0xff]  ;;  %v2321_v32 = vld [vmem:[%s3078_s12 + $0x3b8] sm:$0xff] }
 0x1c5   : > { %2258 = vst [vmem:[%s3350_s28 + $0x828] sm:$0xff] %v2257_v60  ;;  %2260 = vst [vmem:[%s3350_s28 + $0x830] sm:$0xff] %v2259_v61  ;;  %v2323_v33 = vld [vmem:[%s3078_s12 + $0x3c0] sm:$0xff]  ;;  %v2325_v34 = vld [vmem:[%s3078_s12 + $0x3c8] sm:$0xff] }
 0x1c6   : > { %2262 = vst [vmem:[%s3350_s28 + $0x838] sm:$0xff] %v2261_v62  ;;  %2264 = vst [vmem:[%s3350_s28 + $0x870] sm:$0xff] %v2263_v63  ;;  %v2327_v35 = vld [vmem:[%s3078_s12 + $0x3d0] sm:$0xff]  ;;  %v2329_v36 = vld [vmem:[%s3078_s12 + $0x3d8] sm:$0xff] }
 0x1c7   : > { %2266 = vst [vmem:[%s3350_s28 + $0x878] sm:$0xff] %v2265_v0  ;;  %2268 = vst [vmem:[%s3350_s28 + $0x880] sm:$0xff] %v2267_v1  ;;  %v2331_v37 = vld [vmem:[%s3078_s12 + $0x3e0] sm:$0xff]  ;;  %v2333_v38 = vld [vmem:[%s3078_s12 + $0x3e8] sm:$0xff] }
 0x1c8   : > { %2270 = vst [vmem:[%s3350_s28 + $0x8b8] sm:$0xff] %v2269_v2  ;;  %2272 = vst [vmem:[%s3350_s28 + $0x8c0] sm:$0xff] %v2271_v3  ;;  %v2335_v39 = vld [vmem:[%s3078_s12 + $0x3f0] sm:$0xff]  ;;  %v2337_v40 = vld [vmem:[%s3078_s12 + $0x3f8] sm:$0xff] }
 0x1c9   : > { %2274 = vst [vmem:[%s3350_s28 + $0x8c8] sm:$0xff] %v2273_v4  ;;  %2276 = vst [vmem:[%s3350_s28 + $0x900] sm:$0xff] %v2275_v5  ;;  %v2339_v20 = vld [vmem:[%s3078_s12 + $0x400] sm:$0xff] }
 0x1ca   : > { %2278 = vst [vmem:[%s3350_s28 + $0x908] sm:$0xff] %v2277_v6  ;;  %2280 = vst [vmem:[%s3350_s28 + $0x910] sm:$0xff] %v2279_v7 }
 0x1cb   : > { %2282 = vst [vmem:[%s3350_s28 + $0x948] sm:$0xff] %v2281_v8  ;;  %2284 = vst [vmem:[%s3350_s28 + $0x950] sm:$0xff] %v2283_v9 }
 0x1cc   : > { %2286 = vst [vmem:[%s3350_s28 + $0x958] sm:$0xff] %v2285_v10  ;;  %2288 = vst [vmem:[%s3350_s28 + $0x990] sm:$0xff] %v2287_v11 }
 0x1cd   : > { %2290 = vst [vmem:[%s3350_s28 + $0x998] sm:$0xff] %v2289_v12  ;;  %2292 = vst [vmem:[%s3350_s28 + $0x9a0] sm:$0xff] %v2291_v13 }
 0x1ce   : > { %2294 = vst [vmem:[%s3350_s28 + $0x9d8] sm:$0xff] %v2293_v14  ;;  %2296 = vst [vmem:[%s3350_s28 + $0x9e0] sm:$0xff] %v2295_v15 }
 0x1cf   : > { %2298 = vst [vmem:[%s3350_s28 + $0x9e8] sm:$0xff] %v2297_v17  ;;  %2300 = vst [vmem:[%s3350_s28 + $0xa20] sm:$0xff] %v2299_v19 }
 0x1d0   : > { %2302 = vst [vmem:[%s3350_s28 + $0xa28] sm:$0xff] %v2301_v21  ;;  %2304 = vst [vmem:[%s3350_s28 + $0xa30] sm:$0xff] %v2303_v23 }
 0x1d1   : > { %2306 = vst [vmem:[%s3350_s28 + $0xa68] sm:$0xff] %v2305_v24  ;;  %2308 = vst [vmem:[%s3350_s28 + $0xa70] sm:$0xff] %v2307_v25 }
 0x1d2   : > { %2310 = vst [vmem:[%s3350_s28 + $0xa78] sm:$0xff] %v2309_v26  ;;  %2312 = vst [vmem:[%s3350_s28 + $0xab0] sm:$0xff] %v2311_v27 }
 0x1d3   : > { %2314 = vst [vmem:[%s3350_s28 + $0xab8] sm:$0xff] %v2313_v28  ;;  %2316 = vst [vmem:[%s3350_s28 + $0xac0] sm:$0xff] %v2315_v29 }
 0x1d4   : > { %2318 = vst [vmem:[%s3350_s28 + $0xaf8] sm:$0xff] %v2317_v30  ;;  %2320 = vst [vmem:[%s3350_s28 + $0xb00] sm:$0xff] %v2319_v31 }
 0x1d5   : > { %2322 = vst [vmem:[%s3350_s28 + $0xb08] sm:$0xff] %v2321_v32  ;;  %2324 = vst [vmem:[%s3350_s28 + $0xb40] sm:$0xff] %v2323_v33 }
 0x1d6   : > { %2326 = vst [vmem:[%s3350_s28 + $0xb48] sm:$0xff] %v2325_v34  ;;  %2328 = vst [vmem:[%s3350_s28 + $0xb50] sm:$0xff] %v2327_v35 }
 0x1d7   : > { %2330 = vst [vmem:[%s3350_s28 + $0xb88] sm:$0xff] %v2329_v36  ;;  %2332 = vst [vmem:[%s3350_s28 + $0xb90] sm:$0xff] %v2331_v37 }
 0x1d8   : > { %2334 = vst [vmem:[%s3350_s28 + $0xb98] sm:$0xff] %v2333_v38  ;;  %2336 = vst [vmem:[%s3350_s28 + $0xbd0] sm:$0xff] %v2335_v39 }
 0x1d9   : > { %2338 = vst [vmem:[%s3350_s28 + $0xbd8] sm:$0xff] %v2337_v40  ;;  %2340 = vst [vmem:[%s3350_s28 + $0xbe0] sm:$0xff] %v2339_v20 }
 0x1da PF: > { %s13_s16 = sadd.s32 1, %s2782_s16   ;;  %s3624_s12 = smov %s2770_s13 }
 0x1db   : > { %p10_p12 = scmp.ge.s32.totalorder %s13_s16, 5   ;;  %s3625_s13 = smov %s2845_s22 }
 0x1dc   : > { %s3626_s14 = smov %s2778_s15  ;;  %s3627_s15 = smov %s3629_s17 }
 0x1dd   :  { %12 = sbr.rel (!%p10_p12) target bundleno = 3 (0x3), region = 136 }

// kernel: decoder_forward.9
= control target key start
LH: loop header
LB: loop body
LE: loop exit
PB: predicated region body
PF: predicated region fallthrough
CT: control target
= control target key end

     0   :  { %s2721_s12 = smov 0   ;;  %s2723_s13 = smov 0   ;;  %s3194_s0 = inlined_call_operand.vmem [shape: bf16[1808,128], index: 0, kind: input, shape index: {}]   ;;  %s3195_s1 = inlined_call_operand.vmem [shape: bf16[128,128], index: 1, kind: input, shape index: {}]   ;;  %s3196_s2 = inlined_call_operand.vmem [shape: f32[1,128], index: 2, kind: input, shape index: {}]   ;;  %s3197_s3 = inlined_call_operand.vmem [shape: f32[1808,128], index: 3, kind: output, shape index: {}]  }
   0x1   :  { %s2725_s14 = smov 0  }
   0x2 LB: > { %s32_s15 = sadd.s32 1, %s2693_s13  ;;  %p2187_p0 = scmp.ge.s32.totalorder %s2697_s14, 1  ;;  %s2697_s14 = sphi %s2725_s14, %s13_s14   ;;  %s2693_s13 = sphi %s2723_s13, %s3199_s13   ;;  %s2689_s12 = sphi %s2721_s12, %s3198_s12  }
   0x3   : > { %p34_p1 = scmp.ge.s32.totalorder %s32_s15, 2  ;;  %p188_p2 = scmp.lt.s32.totalorder %s2697_s14, 3 }
   0x5   : > { %s3201_s15 = smov (%p34_p1, %s32_s15), 0  ;;  %p189_p3 = pnand %p2187_p0, %p188_p2 }
   0x6   : > { %v2609_v0 = vld [vmem:[%s3195_s1] sm:$0xff] (!%p189_p3)   ;;  %v2699_v1 = vmov (!%p189_p3), 0.0   ;;  %v2610_v2 = vld [vmem:[%s3195_s1 + $0x8] sm:$0xff] (!%p189_p3)   ;;  %s229_s20 = smul.u32 (!%p189_p3), 113, %s2689_s12  ;;  %vm2700_vm0 = vmmov (!%p189_p3), 0   ;;  %v2611_v3 = vld [vmem:[%s3195_s1 + $0x10] sm:$0xff] (!%p189_p3)  }
   0x7   : > { %192 = sbr.rel (%p189_p3) target bundleno = 480 (0x1e0), region = 32  ;;  %2323 = vmatprep.subr.bf16.mxu0 (!%p189_p3), %v2699_v1  ;;  %2567 = vmatprep.subr.bf16.mxu1 (!%p189_p3), %v2699_v1  ;;  %v2612_v4 = vld [vmem:[%s3195_s1 + $0x18] sm:$0xff] (!%p189_p3)   ;;  %v2613_v5 = vld [vmem:[%s3195_s1 + $0x20] sm:$0xff] (!%p189_p3)   ;;  %v2614_v6 = vld [vmem:[%s3195_s1 + $0x28] sm:$0xff] (!%p189_p3)  }
   0x8   : > { %2324 = vmatpush3.bf16.msra.mxu0 (!%p189_p3), %v2609_v0  ;;  %2575 = vmatpush3.bf16.msra.mxu1 (!%p189_p3), %v2609_v0  ;;  %p230_p4 = scmp.lt.s32.totalorder (!%p189_p3), %s229_s20, 225  ;;  %v2615_v7 = vld [vmem:[%s3195_s1 + $0x30] sm:$0xff] (!%p189_p3)   ;;  %v2616_v8 = vld [vmem:[%s3195_s1 + $0x38] sm:$0xff] (!%p189_p3)   ;;  %v2957_v0 = vld [vmem:[%s3196_s2] ss:$0 sm:$0xff] (!%p189_p3) }
   0x9   : > { %2325 = vmatprep.subr.bf16.mxu0 (!%p189_p3), %v2699_v1  ;;  %2568 = vmatprep.subr.bf16.mxu1 (!%p189_p3), %v2699_v1 }
   0xa   : > { %2339 = vmatprep.mubr.msk.bf16.mxu0 (!%p189_p3), %vm2700_vm0, %v2699_v1  ;;  %2455 = vmatprep.mubr.msk.bf16.mxu1 (!%p189_p3), %vm2700_vm0, %v2699_v1 }
   0xc   : > { %2326 = vmatpush3.bf16.msra.mxu0 (!%p189_p3), %v2610_v2  ;;  %2576 = vmatpush3.bf16.msra.mxu1 (!%p189_p3), %v2610_v2 }
   0xd   : > { %2327 = vmatprep.subr.bf16.mxu0 (!%p189_p3), %v2699_v1  ;;  %2569 = vmatprep.subr.bf16.mxu1 (!%p189_p3), %v2699_v1 }
   0xe   : > { %s3203_s20 = smov (!%p230_p4, %s229_s20), 225 }
   0xf   : > { %s2188_s23 = sshll.u32 %s3203_s20, 2  ;;  %s2189_s10 = sshll.u32 %s3203_s20, 3 }
  0x10   : > { %s2764_s26 = scalar_lea.vmem %s3194_s0, %s2188_s23  ;;  %2328 = vmatpush3.bf16.msra.mxu0 %v2611_v3  ;;  %2577 = vmatpush3.bf16.msra.mxu1 %v2611_v3  ;;  %s2964_s18 = scalar_lea.vmem %s3197_s3, %s2189_s10 }
  0x11   : > { %2329 = vmatprep.subr.bf16.mxu0 %v2699_v1  ;;  %2570 = vmatprep.subr.bf16.mxu1 %v2699_v1  ;;  %v2617_v9 = vld [vmem:[%s2764_s26] sm:$0xff]   ;;  %v2618_v10 = vld [vmem:[%s2764_s26 + $0xe8] sm:$0xff]   ;;  %v2620_v12 = vld [vmem:[%s2764_s26 + $0xf0] sm:$0xff]  }
  0x12   : > { %v2619_v11 = vld [vmem:[%s2764_s26 + $0x8] sm:$0xff]   ;;  %v2621_v13 = vld [vmem:[%s2764_s26 + $0x10] sm:$0xff]   ;;  %v2622_v14 = vld [vmem:[%s2764_s26 + $0xf8] sm:$0xff]  }
  0x13   : > { %v2623_v15 = vld [vmem:[%s2764_s26 + $0x18] sm:$0xff]   ;;  %v2624_v16 = vld [vmem:[%s2764_s26 + $0x100] sm:$0xff]   ;;  %v2626_v18 = vld [vmem:[%s2764_s26 + $0x108] sm:$0xff]  }
  0x14   : > { %2330 = vmatpush3.bf16.msra.mxu0 %v2612_v4  ;;  %2578 = vmatpush3.bf16.msra.mxu1 %v2612_v4  ;;  %v2625_v17 = vld [vmem:[%s2764_s26 + $0x20] sm:$0xff]   ;;  %v2627_v19 = vld [vmem:[%s2764_s26 + $0x28] sm:$0xff]   ;;  %v2628_v20 = vld [vmem:[%s2764_s26 + $0x110] sm:$0xff]  }
  0x15   : > { %2331 = vmatprep.subr.bf16.mxu0 %v2699_v1  ;;  %2571 = vmatprep.subr.bf16.mxu1 %v2699_v1  ;;  %v2629_v21 = vld [vmem:[%s2764_s26 + $0x30] sm:$0xff]   ;;  %v2630_v22 = vld [vmem:[%s2764_s26 + $0x118] sm:$0xff]   ;;  %v2632_v24 = vld [vmem:[%s2764_s26 + $0x120] sm:$0xff]  }
  0x16   : > { %v2631_v23 = vld [vmem:[%s2764_s26 + $0x38] sm:$0xff]   ;;  %v2633_v25 = vld [vmem:[%s2764_s26 + $0x40] sm:$0xff]   ;;  %v2634_v26 = vld [vmem:[%s2764_s26 + $0x128] sm:$0xff]  }
  0x17   : > { %v2635_v27 = vld [vmem:[%s2764_s26 + $0x48] sm:$0xff]   ;;  %v2636_v28 = vld [vmem:[%s2764_s26 + $0x130] sm:$0xff]   ;;  %v2638_v30 = vld [vmem:[%s2764_s26 + $0x138] sm:$0xff]  }
  0x18   : > { %2332 = vmatpush3.bf16.msra.mxu0 %v2613_v5  ;;  %2579 = vmatpush3.bf16.msra.mxu1 %v2613_v5  ;;  %v2637_v29 = vld [vmem:[%s2764_s26 + $0x50] sm:$0xff]   ;;  %v2639_v31 = vld [vmem:[%s2764_s26 + $0x58] sm:$0xff]   ;;  %v2640_v32 = vld [vmem:[%s2764_s26 + $0x140] sm:$0xff]  }
  0x19   : > { %2333 = vmatprep.subr.bf16.mxu0 %v2699_v1  ;;  %2572 = vmatprep.subr.bf16.mxu1 %v2699_v1  ;;  %v2641_v33 = vld [vmem:[%s2764_s26 + $0x60] sm:$0xff]   ;;  %v2642_v34 = vld [vmem:[%s2764_s26 + $0x148] sm:$0xff]   ;;  %v2644_v36 = vld [vmem:[%s2764_s26 + $0x150] sm:$0xff]  }
  0x1a   : > { %v2643_v35 = vld [vmem:[%s2764_s26 + $0x68] sm:$0xff]   ;;  %v2645_v37 = vld [vmem:[%s2764_s26 + $0x70] sm:$0xff]   ;;  %v2646_v38 = vld [vmem:[%s2764_s26 + $0x158] sm:$0xff]  }
  0x1b   : > { %v2647_v39 = vld [vmem:[%s2764_s26 + $0x78] sm:$0xff]   ;;  %v2648_v40 = vld [vmem:[%s2764_s26 + $0x160] sm:$0xff]   ;;  %v2650_v42 = vld [vmem:[%s2764_s26 + $0x168] sm:$0xff]  }
  0x1c   : > { %2334 = vmatpush3.bf16.msra.mxu0 %v2614_v6  ;;  %2580 = vmatpush3.bf16.msra.mxu1 %v2614_v6  ;;  %v2649_v41 = vld [vmem:[%s2764_s26 + $0x80] sm:$0xff]   ;;  %v2651_v43 = vld [vmem:[%s2764_s26 + $0x88] sm:$0xff]   ;;  %v2652_v44 = vld [vmem:[%s2764_s26 + $0x170] sm:$0xff]  }
  0x1d   : > { %2335 = vmatprep.subr.bf16.mxu0 %v2699_v1  ;;  %2573 = vmatprep.subr.bf16.mxu1 %v2699_v1  ;;  %v2653_v45 = vld [vmem:[%s2764_s26 + $0x90] sm:$0xff]   ;;  %v2654_v46 = vld [vmem:[%s2764_s26 + $0x178] sm:$0xff]   ;;  %v2656_v48 = vld [vmem:[%s2764_s26 + $0x180] sm:$0xff]  }
  0x1e   : > { %v2655_v47 = vld [vmem:[%s2764_s26 + $0x98] sm:$0xff]   ;;  %v2657_v49 = vld [vmem:[%s2764_s26 + $0xa0] sm:$0xff]   ;;  %v2658_v50 = vld [vmem:[%s2764_s26 + $0x188] sm:$0xff]  }
  0x1f   : > { %v2659_v51 = vld [vmem:[%s2764_s26 + $0xa8] sm:$0xff]   ;;  %v2660_v52 = vld [vmem:[%s2764_s26 + $0x190] sm:$0xff]   ;;  %v2662_v54 = vld [vmem:[%s2764_s26 + $0x198] sm:$0xff]  }
  0x20   : > { %2336 = vmatpush3.bf16.msra.mxu0 %v2615_v7  ;;  %2581 = vmatpush3.bf16.msra.mxu1 %v2615_v7  ;;  %v2661_v53 = vld [vmem:[%s2764_s26 + $0xb0] sm:$0xff]   ;;  %v2663_v55 = vld [vmem:[%s2764_s26 + $0xb8] sm:$0xff]   ;;  %v2664_v56 = vld [vmem:[%s2764_s26 + $0x1a0] sm:$0xff]  }
  0x21   : > { %2337 = vmatprep.subr.bf16.mxu0 %v2699_v1  ;;  %2574 = vmatprep.subr.bf16.mxu1 %v2699_v1  ;;  %v2665_v57 = vld [vmem:[%s2764_s26 + $0xc0] sm:$0xff]   ;;  %v2666_v58 = vld [vmem:[%s2764_s26 + $0x1a8] sm:$0xff]   ;;  %v2668_v60 = vld [vmem:[%s2764_s26 + $0x1b0] sm:$0xff]  }
  0x22   : > { %v2667_v59 = vld [vmem:[%s2764_s26 + $0xc8] sm:$0xff]   ;;  %v2669_v61 = vld [vmem:[%s2764_s26 + $0xd0] sm:$0xff]   ;;  %v2670_v62 = vld [vmem:[%s2764_s26 + $0x1b8] sm:$0xff]  }
  0x23   : > { %v2671_v4 = vld [vmem:[%s2764_s26 + $0xd8] sm:$0xff]   ;;  %v2672_v6 = vld [vmem:[%s2764_s26 + $0x1c0] ss:$0 sps:$4 sm:$0xff]  }
  0x24   : > { %2338 = vmatpush3.bf16.msra.mxu0 %v2616_v8  ;;  %2582 = vmatpush3.bf16.msra.mxu1 %v2616_v8 }
  0x27   : > { %2340 = vmatmul.mubr.bf16.vlgmr.msra.gmra.mrb[0].mxu0 %v2617_v9  ;;  %2456 = vmatmul.mubr.bf16.vlgmr.msra.gmra.mrb[0].mxu1 %v2618_v10 }
  0x28   : > { %2343 = vmatprep.mubr.msk.bf16.mxu0 %vm2700_vm0, %v2699_v1  ;;  %2459 = vmatprep.mubr.msk.bf16.mxu1 %vm2700_vm0, %v2699_v1 }
  0x2f   : > { %2344 = vmatmul.mubr.bf16.gmra.mrb[4].mxu0 %v2619_v11  ;;  %2460 = vmatmul.mubr.bf16.gmra.mrb[4].mxu1 %v2620_v12 }
  0x30   : > { %2347 = vmatprep.mubr.msk.bf16.mxu0 %vm2700_vm0, %v2699_v1  ;;  %2463 = vmatprep.mubr.msk.bf16.mxu1 %vm2700_vm0, %v2699_v1 }
  0x37   : > { %2348 = vmatmul.mubr.bf16.gmra.mrb[8].mxu0 %v2621_v13  ;;  %2464 = vmatmul.mubr.bf16.gmra.mrb[8].mxu1 %v2622_v14 }
  0x38   : > { %2351 = vmatprep.mubr.msk.bf16.mxu0 %vm2700_vm0, %v2699_v1  ;;  %2467 = vmatprep.mubr.msk.bf16.mxu1 %vm2700_vm0, %v2699_v1 }
  0x3f   : > { %2352 = vmatmul.mubr.bf16.gmra.mrb[12].mxu0 %v2623_v15  ;;  %2468 = vmatmul.mubr.bf16.gmra.mrb[12].mxu1 %v2624_v16 }
  0x40   : > { %2355 = vmatprep.mubr.msk.bf16.mxu0 %vm2700_vm0, %v2699_v1  ;;  %2471 = vmatprep.mubr.msk.bf16.mxu1 %vm2700_vm0, %v2699_v1 }
  0x47   : > { %2356 = vmatmul.mubr.bf16.gmra.mrb[16].mxu0 %v2625_v17  ;;  %2472 = vmatmul.mubr.bf16.gmra.mrb[16].mxu1 %v2626_v18  ;;  %v2673_v18 = vld [vmem:[%s2764_s26 + $0xe0] sm:$0xff]  }
  0x48   : > { %2359 = vmatprep.mubr.msk.bf16.mxu0 %vm2700_vm0, %v2699_v1  ;;  %2475 = vmatprep.mubr.msk.bf16.mxu1 %vm2700_vm0, %v2699_v1 }
  0x4f   : > { %2360 = vmatmul.mubr.bf16.gmra.mrb[20].mxu0 %v2627_v19  ;;  %2476 = vmatmul.mubr.bf16.gmra.mrb[20].mxu1 %v2628_v20 }
  0x50   : > { %2363 = vmatprep.mubr.msk.bf16.mxu0 %vm2700_vm0, %v2699_v1  ;;  %2479 = vmatprep.mubr.msk.bf16.mxu1 %vm2700_vm0, %v2699_v1 }
  0x57   : > { %2364 = vmatmul.mubr.bf16.gmra.mrb[24].mxu0 %v2629_v21  ;;  %2480 = vmatmul.mubr.bf16.gmra.mrb[24].mxu1 %v2630_v22 }
  0x58   : > { %2367 = vmatprep.mubr.msk.bf16.mxu0 %vm2700_vm0, %v2699_v1  ;;  %2483 = vmatprep.mubr.msk.bf16.mxu1 %vm2700_vm0, %v2699_v1 }
  0x5f   : > { %2368 = vmatmul.mubr.bf16.gmra.mrb[28].mxu0 %v2631_v23  ;;  %2484 = vmatmul.mubr.bf16.gmra.mrb[28].mxu1 %v2632_v24 }
  0x60   : > { %2371 = vmatprep.mubr.msk.bf16.mxu0 %vm2700_vm0, %v2699_v1  ;;  %2487 = vmatprep.mubr.msk.bf16.mxu1 %vm2700_vm0, %v2699_v1 }
  0x67   : > { %2372 = vmatmul.mubr.bf16.gmra.mrb[32].mxu0 %v2633_v25  ;;  %2488 = vmatmul.mubr.bf16.gmra.mrb[32].mxu1 %v2634_v26 }
  0x68   : > { %2375 = vmatprep.mubr.msk.bf16.mxu0 %vm2700_vm0, %v2699_v1  ;;  %2491 = vmatprep.mubr.msk.bf16.mxu1 %vm2700_vm0, %v2699_v1 }
  0x6f   : > { %2376 = vmatmul.mubr.bf16.gmra.mrb[36].mxu0 %v2635_v27  ;;  %2492 = vmatmul.mubr.bf16.gmra.mrb[36].mxu1 %v2636_v28 }
  0x70   : > { %2379 = vmatprep.mubr.msk.bf16.mxu0 %vm2700_vm0, %v2699_v1  ;;  %2495 = vmatprep.mubr.msk.bf16.mxu1 %vm2700_vm0, %v2699_v1 }
  0x77   : > { %2380 = vmatmul.mubr.bf16.gmra.mrb[40].mxu0 %v2637_v29  ;;  %2496 = vmatmul.mubr.bf16.gmra.mrb[40].mxu1 %v2638_v30 }
  0x78   : > { %2383 = vmatprep.mubr.msk.bf16.mxu0 %vm2700_vm0, %v2699_v1  ;;  %2499 = vmatprep.mubr.msk.bf16.mxu1 %vm2700_vm0, %v2699_v1 }
  0x7f   : > { %2384 = vmatmul.mubr.bf16.gmra.mrb[44].mxu0 %v2639_v31  ;;  %2500 = vmatmul.mubr.bf16.gmra.mrb[44].mxu1 %v2640_v32 }
  0x80   : > { %2387 = vmatprep.mubr.msk.bf16.mxu0 %vm2700_vm0, %v2699_v1  ;;  %2503 = vmatprep.mubr.msk.bf16.mxu1 %vm2700_vm0, %v2699_v1 }
  0x87   : > { %2388 = vmatmul.mubr.bf16.gmra.mrb[48].mxu0 %v2641_v33  ;;  %2504 = vmatmul.mubr.bf16.gmra.mrb[48].mxu1 %v2642_v34 }
  0x88   : > { %2391 = vmatprep.mubr.msk.bf16.mxu0 %vm2700_vm0, %v2699_v1  ;;  %2507 = vmatprep.mubr.msk.bf16.mxu1 %vm2700_vm0, %v2699_v1 }
  0x8f   : > { %2392 = vmatmul.mubr.bf16.gmra.mrb[52].mxu0 %v2643_v35  ;;  %2508 = vmatmul.mubr.bf16.gmra.mrb[52].mxu1 %v2644_v36 }
  0x90   : > { %2395 = vmatprep.mubr.msk.bf16.mxu0 %vm2700_vm0, %v2699_v1  ;;  %2511 = vmatprep.mubr.msk.bf16.mxu1 %vm2700_vm0, %v2699_v1 }
  0x97   : > { %2396 = vmatmul.mubr.bf16.gmra.mrb[56].mxu0 %v2645_v37  ;;  %2512 = vmatmul.mubr.bf16.gmra.mrb[56].mxu1 %v2646_v38 }
  0x98   : > { %2399 = vmatprep.mubr.msk.bf16.mxu0 %vm2700_vm0, %v2699_v1  ;;  %2515 = vmatprep.mubr.msk.bf16.mxu1 %vm2700_vm0, %v2699_v1 }
  0x9f   : > { %2400 = vmatmul.mubr.bf16.gmra.mrb[60].mxu0 %v2647_v39  ;;  %2516 = vmatmul.mubr.bf16.gmra.mrb[60].mxu1 %v2648_v40 }
  0xa0   : > { %2403 = vmatprep.mubr.msk.bf16.mxu0 %vm2700_vm0, %v2699_v1  ;;  %2519 = vmatprep.mubr.msk.bf16.mxu1 %vm2700_vm0, %v2699_v1 }
  0xa7   : > { %2404 = vmatmul.mubr.bf16.gmra.mrb[64].mxu0 %v2649_v41  ;;  %2520 = vmatmul.mubr.bf16.gmra.mrb[64].mxu1 %v2650_v42 }
  0xa8   : > { %2407 = vmatprep.mubr.msk.bf16.mxu0 %vm2700_vm0, %v2699_v1  ;;  %2523 = vmatprep.mubr.msk.bf16.mxu1 %vm2700_vm0, %v2699_v1 }
  0xaf   : > { %2408 = vmatmul.mubr.bf16.gmra.mrb[68].mxu0 %v2651_v43  ;;  %2524 = vmatmul.mubr.bf16.gmra.mrb[68].mxu1 %v2652_v44 }
  0xb0   : > { %2411 = vmatprep.mubr.msk.bf16.mxu0 %vm2700_vm0, %v2699_v1  ;;  %2527 = vmatprep.mubr.msk.bf16.mxu1 %vm2700_vm0, %v2699_v1 }
  0xb7   : > { %2412 = vmatmul.mubr.bf16.gmra.mrb[72].mxu0 %v2653_v45  ;;  %2528 = vmatmul.mubr.bf16.gmra.mrb[72].mxu1 %v2654_v46 }
  0xb8   : > { %2415 = vmatprep.mubr.msk.bf16.mxu0 %vm2700_vm0, %v2699_v1  ;;  %2531 = vmatprep.mubr.msk.bf16.mxu1 %vm2700_vm0, %v2699_v1 }
  0xbf   : > { %2416 = vmatmul.mubr.bf16.gmra.mrb[76].mxu0 %v2655_v47  ;;  %2532 = vmatmul.mubr.bf16.gmra.mrb[76].mxu1 %v2656_v48 }
  0xc0   : > { %2419 = vmatprep.mubr.msk.bf16.mxu0 %vm2700_vm0, %v2699_v1  ;;  %2535 = vmatprep.mubr.msk.bf16.mxu1 %vm2700_vm0, %v2699_v1 }
  0xc7   : > { %2420 = vmatmul.mubr.bf16.gmra.mrb[80].mxu0 %v2657_v49  ;;  %2536 = vmatmul.mubr.bf16.gmra.mrb[80].mxu1 %v2658_v50 }
  0xc8   : > { %2423 = vmatprep.mubr.msk.bf16.mxu0 %vm2700_vm0, %v2699_v1  ;;  %2539 = vmatprep.mubr.msk.bf16.mxu1 %vm2700_vm0, %v2699_v1 }
  0xcf   : > { %2424 = vmatmul.mubr.bf16.gmra.mrb[84].mxu0 %v2659_v51  ;;  %2540 = vmatmul.mubr.bf16.gmra.mrb[84].mxu1 %v2660_v52 }
  0xd0   : > { %2427 = vmatprep.mubr.msk.bf16.mxu0 %vm2700_vm0, %v2699_v1  ;;  %2543 = vmatprep.mubr.msk.bf16.mxu1 %vm2700_vm0, %v2699_v1 }
  0xd7   : > { %2428 = vmatmul.mubr.bf16.gmra.mrb[88].mxu0 %v2661_v53  ;;  %2544 = vmatmul.mubr.bf16.gmra.mrb[88].mxu1 %v2662_v54 }
  0xd8   : > { %2431 = vmatprep.mubr.msk.bf16.mxu0 %vm2700_vm0, %v2699_v1  ;;  %2547 = vmatprep.mubr.msk.bf16.mxu1 %vm2700_vm0, %v2699_v1 }
  0xdf   : > { %2432 = vmatmul.mubr.bf16.gmra.mrb[92].mxu0 %v2663_v55  ;;  %2548 = vmatmul.mubr.bf16.gmra.mrb[92].mxu1 %v2664_v56 }
  0xe0   : > { %2435 = vmatprep.mubr.msk.bf16.mxu0 %vm2700_vm0, %v2699_v1  ;;  %2551 = vmatprep.mubr.msk.bf16.mxu1 %vm2700_vm0, %v2699_v1 }
  0xe7   : > { %2436 = vmatmul.mubr.bf16.gmra.mrb[96].mxu0 %v2665_v57  ;;  %2552 = vmatmul.mubr.bf16.gmra.mrb[96].mxu1 %v2666_v58 }
  0xe8   : > { %2439 = vmatprep.mubr.msk.bf16.mxu0 %vm2700_vm0, %v2699_v1  ;;  %2555 = vmatprep.mubr.msk.bf16.mxu1 %vm2700_vm0, %v2699_v1 }
  0xef   : > { %2440 = vmatmul.mubr.bf16.gmra.mrb[100].mxu0 %v2667_v59  ;;  %2556 = vmatmul.mubr.bf16.gmra.mrb[100].mxu1 %v2668_v60 }
  0xf0   : > { %2443 = vmatprep.mubr.msk.bf16.mxu0 %vm2700_vm0, %v2699_v1  ;;  %2559 = vmatprep.mubr.msk.bf16.mxu1 %vm2700_vm0, %v2699_v1 }
  0xf7   : > { %2444 = vmatmul.mubr.bf16.gmra.mrb[104].mxu0 %v2669_v61  ;;  %2560 = vmatmul.mubr.bf16.gmra.mrb[104].mxu1 %v2670_v62 }
  0xf8   : > { %2447 = vmatprep.mubr.msk.bf16.mxu0 %vm2700_vm0, %v2699_v1  ;;  %2563 = vmatprep.mubr.msk.bf16.mxu1 %vm2700_vm0, %v2699_v1 }
  0xfa   : > { %v1041_v63 = vpop.f32.mrb[0].mxu0  ;;  %v1273_v2 = vpop.f32.mrb[0].mxu1 }
  0xfb   : > { %v2341_v3 = vpop.f32.mrb[1].mxu0  ;;  %v2457_v5 = vpop.f32.mrb[1].mxu1  ;;  %v1844_v9 = vadd.f32 %v2957_v0, %v1041_v63  ;;  %v1902_v11 = vadd.f32 %v2957_v0, %v1273_v2 }
  0xfc   : > { %v1044_v7 = vpop.f32.mrb[2].mxu0  ;;  %v1276_v8 = vpop.f32.mrb[2].mxu1 }
  0xfd   : > { %v2342_v10 = vpop.f32.mrb[3].mxu0  ;;  %v2458_v12 = vpop.f32.mrb[3].mxu1  ;;  %1957 = vst [vmem:[%s2964_s18] sm:$0xff] %v1844_v9  ;;  %v1845_v13 = vadd.f32 %v2957_v0, %v1044_v7  ;;  %2015 = vst [vmem:[%s2964_s18 + $0x1d0] sm:$0xff] %v1902_v11  ;;  %v1903_v14 = vadd.f32 %v2957_v0, %v1276_v8 }
  0xff   : > { %2448 = vmatmul.mubr.bf16.gmra.mrb[108].mxu0 %v2671_v4  ;;  %2564 = vmatmul.mubr.bf16.gmra.mrb[108].mxu1 %v2672_v6  ;;  %1958 = vst [vmem:[%s2964_s18 + $0x8] sm:$0xff] %v1845_v13  ;;  %2016 = vst [vmem:[%s2964_s18 + $0x1d8] sm:$0xff] %v1903_v14 }
 0x100   : > { %2451 = vmatprep.mubr.msk.bf16.mxu0 %vm2700_vm0, %v2699_v1 }
 0x102   : > { %v1049_v15 = vpop.f32.mrb[4].mxu0  ;;  %v1281_v16 = vpop.f32.mrb[4].mxu1 }
 0x103   : > { %v2345_v17 = vpop.f32.mrb[5].mxu0  ;;  %v2461_v19 = vpop.f32.mrb[5].mxu1  ;;  %v1846_v22 = vadd.f32 %v2957_v0, %v1049_v15  ;;  %v1904_v24 = vadd.f32 %v2957_v0, %v1281_v16 }
 0x104   : > { %v1052_v20 = vpop.f32.mrb[6].mxu0  ;;  %v1284_v21 = vpop.f32.mrb[6].mxu1 }
 0x105   : > { %v2346_v23 = vpop.f32.mrb[7].mxu0  ;;  %v2462_v25 = vpop.f32.mrb[7].mxu1  ;;  %1959 = vst [vmem:[%s2964_s18 + $0x10] sm:$0xff] %v1846_v22  ;;  %v1847_v1 = vadd.f32 %v2957_v0, %v1052_v20  ;;  %2017 = vst [vmem:[%s2964_s18 + $0x1e0] sm:$0xff] %v1904_v24  ;;  %v1905_v26 = vadd.f32 %v2957_v0, %v1284_v21 }
 0x107   : > { %2452 = vmatmul.mubr.bf16.gmra.mrb[112].mxu0 %v2673_v18  ;;  %1960 = vst [vmem:[%s2964_s18 + $0x18] sm:$0xff] %v1847_v1  ;;  %2018 = vst [vmem:[%s2964_s18 + $0x1e8] sm:$0xff] %v1905_v26 }
 0x10a   : > { %v1057_v27 = vpop.f32.mrb[8].mxu0  ;;  %v1289_v28 = vpop.f32.mrb[8].mxu1 }
 0x10b   : > { %v2349_v29 = vpop.f32.mrb[9].mxu0  ;;  %v2465_v30 = vpop.f32.mrb[9].mxu1  ;;  %v1848_v33 = vadd.f32 %v2957_v0, %v1057_v27  ;;  %v1906_v35 = vadd.f32 %v2957_v0, %v1289_v28 }
 0x10c   : > { %v1060_v31 = vpop.f32.mrb[10].mxu0  ;;  %v1292_v32 = vpop.f32.mrb[10].mxu1 }
 0x10d   : > { %v2350_v34 = vpop.f32.mrb[11].mxu0  ;;  %v2466_v36 = vpop.f32.mrb[11].mxu1  ;;  %1961 = vst [vmem:[%s2964_s18 + $0x20] sm:$0xff] %v1848_v33  ;;  %v1849_v37 = vadd.f32 %v2957_v0, %v1060_v31  ;;  %2019 = vst [vmem:[%s2964_s18 + $0x1f0] sm:$0xff] %v1906_v35  ;;  %v1907_v38 = vadd.f32 %v2957_v0, %v1292_v32 }
 0x10f   : > { %1962 = vst [vmem:[%s2964_s18 + $0x28] sm:$0xff] %v1849_v37  ;;  %2020 = vst [vmem:[%s2964_s18 + $0x1f8] sm:$0xff] %v1907_v38 }
 0x112   : > { %v1065_v39 = vpop.f32.mrb[12].mxu0  ;;  %v1297_v40 = vpop.f32.mrb[12].mxu1 }
 0x113   : > { %v2353_v41 = vpop.f32.mrb[13].mxu0  ;;  %v2469_v42 = vpop.f32.mrb[13].mxu1  ;;  %v1850_v45 = vadd.f32 %v2957_v0, %v1065_v39  ;;  %v1908_v47 = vadd.f32 %v2957_v0, %v1297_v40 }
 0x114   : > { %v1068_v43 = vpop.f32.mrb[14].mxu0  ;;  %v1300_v44 = vpop.f32.mrb[14].mxu1 }
 0x115   : > { %v2354_v46 = vpop.f32.mrb[15].mxu0  ;;  %v2470_v48 = vpop.f32.mrb[15].mxu1  ;;  %1963 = vst [vmem:[%s2964_s18 + $0x30] sm:$0xff] %v1850_v45  ;;  %v1851_v49 = vadd.f32 %v2957_v0, %v1068_v43  ;;  %2021 = vst [vmem:[%s2964_s18 + $0x200] sm:$0xff] %v1908_v47  ;;  %v1909_v50 = vadd.f32 %v2957_v0, %v1300_v44 }
 0x117   : > { %1964 = vst [vmem:[%s2964_s18 + $0x38] sm:$0xff] %v1851_v49  ;;  %2022 = vst [vmem:[%s2964_s18 + $0x208] sm:$0xff] %v1909_v50 }
 0x11a   : > { %v1073_v51 = vpop.f32.mrb[16].mxu0  ;;  %v1305_v52 = vpop.f32.mrb[16].mxu1 }
 0x11b   : > { %v2357_v53 = vpop.f32.mrb[17].mxu0  ;;  %v2473_v54 = vpop.f32.mrb[17].mxu1  ;;  %v1852_v57 = vadd.f32 %v2957_v0, %v1073_v51  ;;  %v1910_v59 = vadd.f32 %v2957_v0, %v1305_v52 }
 0x11c   : > { %v1076_v55 = vpop.f32.mrb[18].mxu0  ;;  %v1308_v56 = vpop.f32.mrb[18].mxu1 }
 0x11d   : > { %v2358_v58 = vpop.f32.mrb[19].mxu0  ;;  %v2474_v60 = vpop.f32.mrb[19].mxu1  ;;  %1965 = vst [vmem:[%s2964_s18 + $0x40] sm:$0xff] %v1852_v57  ;;  %v1853_v61 = vadd.f32 %v2957_v0, %v1076_v55  ;;  %2023 = vst [vmem:[%s2964_s18 + $0x210] sm:$0xff] %v1910_v59  ;;  %v1911_v62 = vadd.f32 %v2957_v0, %v1308_v56 }
 0x11f   : > { %1966 = vst [vmem:[%s2964_s18 + $0x48] sm:$0xff] %v1853_v61  ;;  %2024 = vst [vmem:[%s2964_s18 + $0x218] sm:$0xff] %v1911_v62 }
 0x122   : > { %v1081_v63 = vpop.f32.mrb[20].mxu0  ;;  %v1313_v2 = vpop.f32.mrb[20].mxu1 }
 0x123   : > { %v2361_v3 = vpop.f32.mrb[21].mxu0  ;;  %v2477_v4 = vpop.f32.mrb[21].mxu1  ;;  %v1854_v7 = vadd.f32 %v2957_v0, %v1081_v63  ;;  %v1912_v9 = vadd.f32 %v2957_v0, %v1313_v2 }
 0x124   : > { %v1084_v5 = vpop.f32.mrb[22].mxu0  ;;  %v1316_v6 = vpop.f32.mrb[22].mxu1 }
 0x125   : > { %v2362_v8 = vpop.f32.mrb[23].mxu0  ;;  %v2478_v10 = vpop.f32.mrb[23].mxu1  ;;  %1967 = vst [vmem:[%s2964_s18 + $0x50] sm:$0xff] %v1854_v7  ;;  %v1855_v11 = vadd.f32 %v2957_v0, %v1084_v5  ;;  %2025 = vst [vmem:[%s2964_s18 + $0x220] sm:$0xff] %v1912_v9  ;;  %v1913_v12 = vadd.f32 %v2957_v0, %v1316_v6 }
 0x127   : > { %1968 = vst [vmem:[%s2964_s18 + $0x58] sm:$0xff] %v1855_v11  ;;  %2026 = vst [vmem:[%s2964_s18 + $0x228] sm:$0xff] %v1913_v12 }
 0x12a   : > { %v1089_v13 = vpop.f32.mrb[24].mxu0  ;;  %v1321_v14 = vpop.f32.mrb[24].mxu1 }
 0x12b   : > { %v2365_v15 = vpop.f32.mrb[25].mxu0  ;;  %v2481_v16 = vpop.f32.mrb[25].mxu1  ;;  %v1856_v19 = vadd.f32 %v2957_v0, %v1089_v13  ;;  %v1914_v21 = vadd.f32 %v2957_v0, %v1321_v14 }
 0x12c   : > { %v1092_v17 = vpop.f32.mrb[26].mxu0  ;;  %v1324_v18 = vpop.f32.mrb[26].mxu1 }
 0x12d   : > { %v2366_v20 = vpop.f32.mrb[27].mxu0  ;;  %v2482_v22 = vpop.f32.mrb[27].mxu1  ;;  %1969 = vst [vmem:[%s2964_s18 + $0x60] sm:$0xff] %v1856_v19  ;;  %v1857_v23 = vadd.f32 %v2957_v0, %v1092_v17  ;;  %2027 = vst [vmem:[%s2964_s18 + $0x230] sm:$0xff] %v1914_v21  ;;  %v1915_v24 = vadd.f32 %v2957_v0, %v1324_v18 }
 0x12f   : > { %1970 = vst [vmem:[%s2964_s18 + $0x68] sm:$0xff] %v1857_v23  ;;  %2028 = vst [vmem:[%s2964_s18 + $0x238] sm:$0xff] %v1915_v24 }
 0x132   : > { %v1097_v25 = vpop.f32.mrb[28].mxu0  ;;  %v1329_v1 = vpop.f32.mrb[28].mxu1 }
 0x133   : > { %v2369_v26 = vpop.f32.mrb[29].mxu0  ;;  %v2485_v27 = vpop.f32.mrb[29].mxu1  ;;  %v1858_v30 = vadd.f32 %v2957_v0, %v1097_v25  ;;  %v1916_v32 = vadd.f32 %v2957_v0, %v1329_v1 }
 0x134   : > { %v1100_v28 = vpop.f32.mrb[30].mxu0  ;;  %v1332_v29 = vpop.f32.mrb[30].mxu1 }
 0x135   : > { %v2370_v31 = vpop.f32.mrb[31].mxu0  ;;  %v2486_v33 = vpop.f32.mrb[31].mxu1  ;;  %1971 = vst [vmem:[%s2964_s18 + $0x70] sm:$0xff] %v1858_v30  ;;  %v1859_v34 = vadd.f32 %v2957_v0, %v1100_v28  ;;  %2029 = vst [vmem:[%s2964_s18 + $0x240] sm:$0xff] %v1916_v32  ;;  %v1917_v35 = vadd.f32 %v2957_v0, %v1332_v29 }
 0x137   : > { %1972 = vst [vmem:[%s2964_s18 + $0x78] sm:$0xff] %v1859_v34  ;;  %2030 = vst [vmem:[%s2964_s18 + $0x248] sm:$0xff] %v1917_v35 }
 0x13a   : > { %v1105_v36 = vpop.f32.mrb[32].mxu0  ;;  %v1337_v37 = vpop.f32.mrb[32].mxu1 }
 0x13b   : > { %v2373_v38 = vpop.f32.mrb[33].mxu0  ;;  %v2489_v39 = vpop.f32.mrb[33].mxu1  ;;  %v1860_v42 = vadd.f32 %v2957_v0, %v1105_v36  ;;  %v1918_v44 = vadd.f32 %v2957_v0, %v1337_v37 }
 0x13c   : > { %v1108_v40 = vpop.f32.mrb[34].mxu0  ;;  %v1340_v41 = vpop.f32.mrb[34].mxu1 }
 0x13d   : > { %v2374_v43 = vpop.f32.mrb[35].mxu0  ;;  %v2490_v45 = vpop.f32.mrb[35].mxu1  ;;  %1973 = vst [vmem:[%s2964_s18 + $0x80] sm:$0xff] %v1860_v42  ;;  %v1861_v46 = vadd.f32 %v2957_v0, %v1108_v40  ;;  %2031 = vst [vmem:[%s2964_s18 + $0x250] sm:$0xff] %v1918_v44  ;;  %v1919_v47 = vadd.f32 %v2957_v0, %v1340_v41 }
 0x13f   : > { %1974 = vst [vmem:[%s2964_s18 + $0x88] sm:$0xff] %v1861_v46  ;;  %2032 = vst [vmem:[%s2964_s18 + $0x258] sm:$0xff] %v1919_v47 }
 0x142   : > { %v1113_v48 = vpop.f32.mrb[36].mxu0  ;;  %v1345_v49 = vpop.f32.mrb[36].mxu1 }
 0x143   : > { %v2377_v50 = vpop.f32.mrb[37].mxu0  ;;  %v2493_v51 = vpop.f32.mrb[37].mxu1  ;;  %v1862_v54 = vadd.f32 %v2957_v0, %v1113_v48  ;;  %v1920_v56 = vadd.f32 %v2957_v0, %v1345_v49 }
 0x144   : > { %v1116_v52 = vpop.f32.mrb[38].mxu0  ;;  %v1348_v53 = vpop.f32.mrb[38].mxu1 }
 0x145   : > { %v2378_v55 = vpop.f32.mrb[39].mxu0  ;;  %v2494_v57 = vpop.f32.mrb[39].mxu1  ;;  %1975 = vst [vmem:[%s2964_s18 + $0x90] sm:$0xff] %v1862_v54  ;;  %v1863_v58 = vadd.f32 %v2957_v0, %v1116_v52  ;;  %2033 = vst [vmem:[%s2964_s18 + $0x260] sm:$0xff] %v1920_v56  ;;  %v1921_v59 = vadd.f32 %v2957_v0, %v1348_v53 }
 0x147   : > { %1976 = vst [vmem:[%s2964_s18 + $0x98] sm:$0xff] %v1863_v58  ;;  %2034 = vst [vmem:[%s2964_s18 + $0x268] sm:$0xff] %v1921_v59 }
 0x14a   : > { %v1121_v60 = vpop.f32.mrb[40].mxu0  ;;  %v1353_v61 = vpop.f32.mrb[40].mxu1 }
 0x14b   : > { %v2381_v62 = vpop.f32.mrb[41].mxu0  ;;  %v2497_v63 = vpop.f32.mrb[41].mxu1  ;;  %v1864_v4 = vadd.f32 %v2957_v0, %v1121_v60  ;;  %v1922_v6 = vadd.f32 %v2957_v0, %v1353_v61 }
 0x14c   : > { %v1124_v2 = vpop.f32.mrb[42].mxu0  ;;  %v1356_v3 = vpop.f32.mrb[42].mxu1 }
 0x14d   : > { %v2382_v5 = vpop.f32.mrb[43].mxu0  ;;  %v2498_v7 = vpop.f32.mrb[43].mxu1  ;;  %1977 = vst [vmem:[%s2964_s18 + $0xa0] sm:$0xff] %v1864_v4  ;;  %v1865_v8 = vadd.f32 %v2957_v0, %v1124_v2  ;;  %2035 = vst [vmem:[%s2964_s18 + $0x270] sm:$0xff] %v1922_v6  ;;  %v1923_v9 = vadd.f32 %v2957_v0, %v1356_v3 }
 0x14f   : > { %1978 = vst [vmem:[%s2964_s18 + $0xa8] sm:$0xff] %v1865_v8  ;;  %2036 = vst [vmem:[%s2964_s18 + $0x278] sm:$0xff] %v1923_v9 }
 0x152   : > { %v1129_v10 = vpop.f32.mrb[44].mxu0  ;;  %v1361_v11 = vpop.f32.mrb[44].mxu1 }
 0x153   : > { %v2385_v12 = vpop.f32.mrb[45].mxu0  ;;  %v2501_v13 = vpop.f32.mrb[45].mxu1  ;;  %v1866_v16 = vadd.f32 %v2957_v0, %v1129_v10  ;;  %v1924_v18 = vadd.f32 %v2957_v0, %v1361_v11 }
 0x154   : > { %v1132_v14 = vpop.f32.mrb[46].mxu0  ;;  %v1364_v15 = vpop.f32.mrb[46].mxu1 }
 0x155   : > { %v2386_v17 = vpop.f32.mrb[47].mxu0  ;;  %v2502_v19 = vpop.f32.mrb[47].mxu1  ;;  %1979 = vst [vmem:[%s2964_s18 + $0xb0] sm:$0xff] %v1866_v16  ;;  %v1867_v20 = vadd.f32 %v2957_v0, %v1132_v14  ;;  %2037 = vst [vmem:[%s2964_s18 + $0x280] sm:$0xff] %v1924_v18  ;;  %v1925_v21 = vadd.f32 %v2957_v0, %v1364_v15 }
 0x157   : > { %1980 = vst [vmem:[%s2964_s18 + $0xb8] sm:$0xff] %v1867_v20  ;;  %2038 = vst [vmem:[%s2964_s18 + $0x288] sm:$0xff] %v1925_v21 }
 0x15a   : > { %v1137_v22 = vpop.f32.mrb[48].mxu0  ;;  %v1369_v23 = vpop.f32.mrb[48].mxu1 }
 0x15b   : > { %v2389_v24 = vpop.f32.mrb[49].mxu0  ;;  %v2505_v25 = vpop.f32.mrb[49].mxu1  ;;  %v1868_v27 = vadd.f32 %v2957_v0, %v1137_v22  ;;  %v1926_v29 = vadd.f32 %v2957_v0, %v1369_v23 }
 0x15c   : > { %v1140_v1 = vpop.f32.mrb[50].mxu0  ;;  %v1372_v26 = vpop.f32.mrb[50].mxu1 }
 0x15d   : > { %v2390_v28 = vpop.f32.mrb[51].mxu0  ;;  %v2506_v30 = vpop.f32.mrb[51].mxu1  ;;  %1981 = vst [vmem:[%s2964_s18 + $0xc0] sm:$0xff] %v1868_v27  ;;  %v1869_v31 = vadd.f32 %v2957_v0, %v1140_v1  ;;  %2039 = vst [vmem:[%s2964_s18 + $0x290] sm:$0xff] %v1926_v29  ;;  %v1927_v32 = vadd.f32 %v2957_v0, %v1372_v26 }
 0x15f   : > { %1982 = vst [vmem:[%s2964_s18 + $0xc8] sm:$0xff] %v1869_v31  ;;  %2040 = vst [vmem:[%s2964_s18 + $0x298] sm:$0xff] %v1927_v32 }
 0x162   : > { %v1145_v33 = vpop.f32.mrb[52].mxu0  ;;  %v1377_v34 = vpop.f32.mrb[52].mxu1 }
 0x163   : > { %v2393_v35 = vpop.f32.mrb[53].mxu0  ;;  %v2509_v36 = vpop.f32.mrb[53].mxu1  ;;  %v1870_v39 = vadd.f32 %v2957_v0, %v1145_v33  ;;  %v1928_v41 = vadd.f32 %v2957_v0, %v1377_v34 }
 0x164   : > { %v1148_v37 = vpop.f32.mrb[54].mxu0  ;;  %v1380_v38 = vpop.f32.mrb[54].mxu1 }
 0x165   : > { %v2394_v40 = vpop.f32.mrb[55].mxu0  ;;  %v2510_v42 = vpop.f32.mrb[55].mxu1  ;;  %1983 = vst [vmem:[%s2964_s18 + $0xd0] sm:$0xff] %v1870_v39  ;;  %v1871_v43 = vadd.f32 %v2957_v0, %v1148_v37  ;;  %2041 = vst [vmem:[%s2964_s18 + $0x2a0] sm:$0xff] %v1928_v41  ;;  %v1929_v44 = vadd.f32 %v2957_v0, %v1380_v38 }
 0x167   : > { %1984 = vst [vmem:[%s2964_s18 + $0xd8] sm:$0xff] %v1871_v43  ;;  %2042 = vst [vmem:[%s2964_s18 + $0x2a8] sm:$0xff] %v1929_v44 }
 0x16a   : > { %v1153_v45 = vpop.f32.mrb[56].mxu0  ;;  %v1385_v46 = vpop.f32.mrb[56].mxu1 }
 0x16b   : > { %v2397_v47 = vpop.f32.mrb[57].mxu0  ;;  %v2513_v48 = vpop.f32.mrb[57].mxu1  ;;  %v1872_v51 = vadd.f32 %v2957_v0, %v1153_v45  ;;  %v1930_v53 = vadd.f32 %v2957_v0, %v1385_v46 }
 0x16c   : > { %v1156_v49 = vpop.f32.mrb[58].mxu0  ;;  %v1388_v50 = vpop.f32.mrb[58].mxu1 }
 0x16d   : > { %v2398_v52 = vpop.f32.mrb[59].mxu0  ;;  %v2514_v54 = vpop.f32.mrb[59].mxu1  ;;  %1985 = vst [vmem:[%s2964_s18 + $0xe0] sm:$0xff] %v1872_v51  ;;  %v1873_v55 = vadd.f32 %v2957_v0, %v1156_v49  ;;  %2043 = vst [vmem:[%s2964_s18 + $0x2b0] sm:$0xff] %v1930_v53  ;;  %v1931_v56 = vadd.f32 %v2957_v0, %v1388_v50 }
 0x16f   : > { %1986 = vst [vmem:[%s2964_s18 + $0xe8] sm:$0xff] %v1873_v55  ;;  %2044 = vst [vmem:[%s2964_s18 + $0x2b8] sm:$0xff] %v1931_v56 }
 0x172   : > { %v1161_v57 = vpop.f32.mrb[60].mxu0  ;;  %v1393_v58 = vpop.f32.mrb[60].mxu1 }
 0x173   : > { %v2401_v59 = vpop.f32.mrb[61].mxu0  ;;  %v2517_v60 = vpop.f32.mrb[61].mxu1  ;;  %v1874_v63 = vadd.f32 %v2957_v0, %v1161_v57  ;;  %v1932_v3 = vadd.f32 %v2957_v0, %v1393_v58 }
 0x174   : > { %v1164_v61 = vpop.f32.mrb[62].mxu0  ;;  %v1396_v62 = vpop.f32.mrb[62].mxu1 }
 0x175   : > { %v2402_v2 = vpop.f32.mrb[63].mxu0  ;;  %v2518_v4 = vpop.f32.mrb[63].mxu1  ;;  %1987 = vst [vmem:[%s2964_s18 + $0xf0] sm:$0xff] %v1874_v63  ;;  %v1875_v5 = vadd.f32 %v2957_v0, %v1164_v61  ;;  %2045 = vst [vmem:[%s2964_s18 + $0x2c0] sm:$0xff] %v1932_v3  ;;  %v1933_v6 = vadd.f32 %v2957_v0, %v1396_v62 }
 0x177   : > { %1988 = vst [vmem:[%s2964_s18 + $0xf8] sm:$0xff] %v1875_v5  ;;  %2046 = vst [vmem:[%s2964_s18 + $0x2c8] sm:$0xff] %v1933_v6 }
 0x17a   : > { %v1169_v7 = vpop.f32.mrb[64].mxu0  ;;  %v1401_v8 = vpop.f32.mrb[64].mxu1 }
 0x17b   : > { %v2405_v9 = vpop.f32.mrb[65].mxu0  ;;  %v2521_v10 = vpop.f32.mrb[65].mxu1  ;;  %v1876_v13 = vadd.f32 %v2957_v0, %v1169_v7  ;;  %v1934_v15 = vadd.f32 %v2957_v0, %v1401_v8 }
 0x17c   : > { %v1172_v11 = vpop.f32.mrb[66].mxu0  ;;  %v1404_v12 = vpop.f32.mrb[66].mxu1 }
 0x17d   : > { %v2406_v14 = vpop.f32.mrb[67].mxu0  ;;  %v2522_v16 = vpop.f32.mrb[67].mxu1  ;;  %1989 = vst [vmem:[%s2964_s18 + $0x100] sm:$0xff] %v1876_v13  ;;  %v1877_v17 = vadd.f32 %v2957_v0, %v1172_v11  ;;  %2047 = vst [vmem:[%s2964_s18 + $0x2d0] sm:$0xff] %v1934_v15  ;;  %v1935_v18 = vadd.f32 %v2957_v0, %v1404_v12 }
 0x17f   : > { %1990 = vst [vmem:[%s2964_s18 + $0x108] sm:$0xff] %v1877_v17  ;;  %2048 = vst [vmem:[%s2964_s18 + $0x2d8] sm:$0xff] %v1935_v18 }
 0x182   : > { %v1177_v19 = vpop.f32.mrb[68].mxu0  ;;  %v1409_v20 = vpop.f32.mrb[68].mxu1 }
 0x183   : > { %v2409_v21 = vpop.f32.mrb[69].mxu0  ;;  %v2525_v22 = vpop.f32.mrb[69].mxu1  ;;  %v1878_v25 = vadd.f32 %v2957_v0, %v1177_v19  ;;  %v1936_v26 = vadd.f32 %v2957_v0, %v1409_v20 }
 0x184   : > { %v1180_v23 = vpop.f32.mrb[70].mxu0  ;;  %v1412_v24 = vpop.f32.mrb[70].mxu1 }
 0x185   : > { %v2410_v1 = vpop.f32.mrb[71].mxu0  ;;  %v2526_v27 = vpop.f32.mrb[71].mxu1  ;;  %1991 = vst [vmem:[%s2964_s18 + $0x110] sm:$0xff] %v1878_v25  ;;  %v1879_v28 = vadd.f32 %v2957_v0, %v1180_v23  ;;  %2049 = vst [vmem:[%s2964_s18 + $0x2e0] sm:$0xff] %v1936_v26  ;;  %v1937_v29 = vadd.f32 %v2957_v0, %v1412_v24 }
 0x187   : > { %1992 = vst [vmem:[%s2964_s18 + $0x118] sm:$0xff] %v1879_v28  ;;  %2050 = vst [vmem:[%s2964_s18 + $0x2e8] sm:$0xff] %v1937_v29 }
 0x18a   : > { %v1185_v30 = vpop.f32.mrb[72].mxu0  ;;  %v1417_v31 = vpop.f32.mrb[72].mxu1 }
 0x18b   : > { %v2413_v32 = vpop.f32.mrb[73].mxu0  ;;  %v2529_v33 = vpop.f32.mrb[73].mxu1  ;;  %v1880_v36 = vadd.f32 %v2957_v0, %v1185_v30  ;;  %v1938_v38 = vadd.f32 %v2957_v0, %v1417_v31 }
 0x18c   : > { %v1188_v34 = vpop.f32.mrb[74].mxu0  ;;  %v1420_v35 = vpop.f32.mrb[74].mxu1 }
 0x18d   : > { %v2414_v37 = vpop.f32.mrb[75].mxu0  ;;  %v2530_v39 = vpop.f32.mrb[75].mxu1  ;;  %1993 = vst [vmem:[%s2964_s18 + $0x120] sm:$0xff] %v1880_v36  ;;  %v1881_v40 = vadd.f32 %v2957_v0, %v1188_v34  ;;  %2051 = vst [vmem:[%s2964_s18 + $0x2f0] sm:$0xff] %v1938_v38  ;;  %v1939_v41 = vadd.f32 %v2957_v0, %v1420_v35 }
 0x18f   : > { %1994 = vst [vmem:[%s2964_s18 + $0x128] sm:$0xff] %v1881_v40  ;;  %2052 = vst [vmem:[%s2964_s18 + $0x2f8] sm:$0xff] %v1939_v41 }
 0x192   : > { %v1193_v42 = vpop.f32.mrb[76].mxu0  ;;  %v1425_v43 = vpop.f32.mrb[76].mxu1 }
 0x193   : > { %v2417_v44 = vpop.f32.mrb[77].mxu0  ;;  %v2533_v45 = vpop.f32.mrb[77].mxu1  ;;  %v1882_v48 = vadd.f32 %v2957_v0, %v1193_v42  ;;  %v1940_v50 = vadd.f32 %v2957_v0, %v1425_v43 }
 0x194   : > { %v1196_v46 = vpop.f32.mrb[78].mxu0  ;;  %v1428_v47 = vpop.f32.mrb[78].mxu1 }
 0x195   : > { %v2418_v49 = vpop.f32.mrb[79].mxu0  ;;  %v2534_v51 = vpop.f32.mrb[79].mxu1  ;;  %1995 = vst [vmem:[%s2964_s18 + $0x130] sm:$0xff] %v1882_v48  ;;  %v1883_v52 = vadd.f32 %v2957_v0, %v1196_v46  ;;  %2053 = vst [vmem:[%s2964_s18 + $0x300] sm:$0xff] %v1940_v50  ;;  %v1941_v53 = vadd.f32 %v2957_v0, %v1428_v47 }
 0x197   : > { %1996 = vst [vmem:[%s2964_s18 + $0x138] sm:$0xff] %v1883_v52  ;;  %2054 = vst [vmem:[%s2964_s18 + $0x308] sm:$0xff] %v1941_v53 }
 0x19a   : > { %v1201_v54 = vpop.f32.mrb[80].mxu0  ;;  %v1433_v55 = vpop.f32.mrb[80].mxu1 }
 0x19b   : > { %v2421_v56 = vpop.f32.mrb[81].mxu0  ;;  %v2537_v57 = vpop.f32.mrb[81].mxu1  ;;  %v1884_v60 = vadd.f32 %v2957_v0, %v1201_v54  ;;  %v1942_v62 = vadd.f32 %v2957_v0, %v1433_v55 }
 0x19c   : > { %v1204_v58 = vpop.f32.mrb[82].mxu0  ;;  %v1436_v59 = vpop.f32.mrb[82].mxu1  ;;  %v2674_v57 = vld [vmem:[%s3196_s2] ss:$0 sm:$0xff] }
 0x19d   : > { %v2422_v61 = vpop.f32.mrb[83].mxu0  ;;  %v2538_v63 = vpop.f32.mrb[83].mxu1  ;;  %1997 = vst [vmem:[%s2964_s18 + $0x140] sm:$0xff] %v1884_v60  ;;  %v1885_v2 = vadd.f32 %v2957_v0, %v1204_v58  ;;  %2055 = vst [vmem:[%s2964_s18 + $0x310] sm:$0xff] %v1942_v62  ;;  %v1943_v3 = vadd.f32 %v2957_v0, %v1436_v59 }
 0x19f   : > { %1998 = vst [vmem:[%s2964_s18 + $0x148] sm:$0xff] %v1885_v2  ;;  %2056 = vst [vmem:[%s2964_s18 + $0x318] sm:$0xff] %v1943_v3 }
 0x1a2   : > { %v1209_v4 = vpop.f32.mrb[84].mxu0  ;;  %v1441_v5 = vpop.f32.mrb[84].mxu1 }
 0x1a3   : > { %v2425_v6 = vpop.f32.mrb[85].mxu0  ;;  %v2541_v7 = vpop.f32.mrb[85].mxu1  ;;  %v1886_v10 = vadd.f32 %v2957_v0, %v1209_v4  ;;  %v1944_v12 = vadd.f32 %v2957_v0, %v1441_v5 }
 0x1a4   : > { %v1212_v8 = vpop.f32.mrb[86].mxu0  ;;  %v1444_v9 = vpop.f32.mrb[86].mxu1 }
 0x1a5   : > { %v2426_v11 = vpop.f32.mrb[87].mxu0  ;;  %v2542_v13 = vpop.f32.mrb[87].mxu1  ;;  %1999 = vst [vmem:[%s2964_s18 + $0x150] sm:$0xff] %v1886_v10  ;;  %v1887_v14 = vadd.f32 %v2957_v0, %v1212_v8  ;;  %2057 = vst [vmem:[%s2964_s18 + $0x320] sm:$0xff] %v1944_v12  ;;  %v1945_v15 = vadd.f32 %v2957_v0, %v1444_v9 }
 0x1a7   : > { %2000 = vst [vmem:[%s2964_s18 + $0x158] sm:$0xff] %v1887_v14  ;;  %2058 = vst [vmem:[%s2964_s18 + $0x328] sm:$0xff] %v1945_v15 }
 0x1aa   : > { %v1217_v16 = vpop.f32.mrb[88].mxu0  ;;  %v1449_v17 = vpop.f32.mrb[88].mxu1 }
 0x1ab   : > { %v2429_v18 = vpop.f32.mrb[89].mxu0  ;;  %v2545_v19 = vpop.f32.mrb[89].mxu1  ;;  %v1888_v22 = vadd.f32 %v2957_v0, %v1217_v16  ;;  %v1946_v24 = vadd.f32 %v2957_v0, %v1449_v17 }
 0x1ac   : > { %v1220_v20 = vpop.f32.mrb[90].mxu0  ;;  %v1452_v21 = vpop.f32.mrb[90].mxu1 }
 0x1ad   : > { %v2430_v23 = vpop.f32.mrb[91].mxu0  ;;  %v2546_v25 = vpop.f32.mrb[91].mxu1  ;;  %2001 = vst [vmem:[%s2964_s18 + $0x160] sm:$0xff] %v1888_v22  ;;  %v1889_v1 = vadd.f32 %v2957_v0, %v1220_v20  ;;  %2059 = vst [vmem:[%s2964_s18 + $0x330] sm:$0xff] %v1946_v24  ;;  %v1947_v26 = vadd.f32 %v2957_v0, %v1452_v21 }
 0x1af   : > { %2002 = vst [vmem:[%s2964_s18 + $0x168] sm:$0xff] %v1889_v1  ;;  %2060 = vst [vmem:[%s2964_s18 + $0x338] sm:$0xff] %v1947_v26 }
 0x1b2   : > { %v1225_v27 = vpop.f32.mrb[92].mxu0  ;;  %v1457_v28 = vpop.f32.mrb[92].mxu1 }
 0x1b3   : > { %v2433_v29 = vpop.f32.mrb[93].mxu0  ;;  %v2549_v30 = vpop.f32.mrb[93].mxu1  ;;  %v1890_v33 = vadd.f32 %v2957_v0, %v1225_v27  ;;  %v1948_v35 = vadd.f32 %v2957_v0, %v1457_v28 }
 0x1b4   : > { %v1228_v31 = vpop.f32.mrb[94].mxu0  ;;  %v1460_v32 = vpop.f32.mrb[94].mxu1 }
 0x1b5   : > { %v2434_v34 = vpop.f32.mrb[95].mxu0  ;;  %v2550_v36 = vpop.f32.mrb[95].mxu1  ;;  %2003 = vst [vmem:[%s2964_s18 + $0x170] sm:$0xff] %v1890_v33  ;;  %v1891_v37 = vadd.f32 %v2957_v0, %v1228_v31  ;;  %2061 = vst [vmem:[%s2964_s18 + $0x340] sm:$0xff] %v1948_v35  ;;  %v1949_v38 = vadd.f32 %v2957_v0, %v1460_v32 }
 0x1b7   : > { %2004 = vst [vmem:[%s2964_s18 + $0x178] sm:$0xff] %v1891_v37  ;;  %2062 = vst [vmem:[%s2964_s18 + $0x348] sm:$0xff] %v1949_v38 }
 0x1ba   : > { %v1233_v39 = vpop.f32.mrb[96].mxu0  ;;  %v1465_v40 = vpop.f32.mrb[96].mxu1 }
 0x1bb   : > { %v2437_v41 = vpop.f32.mrb[97].mxu0  ;;  %v2553_v42 = vpop.f32.mrb[97].mxu1  ;;  %v1892_v45 = vadd.f32 %v2957_v0, %v1233_v39  ;;  %v1950_v47 = vadd.f32 %v2957_v0, %v1465_v40 }
 0x1bc   : > { %v1236_v43 = vpop.f32.mrb[98].mxu0  ;;  %v1468_v44 = vpop.f32.mrb[98].mxu1 }
 0x1bd   : > { %v2438_v46 = vpop.f32.mrb[99].mxu0  ;;  %v2554_v48 = vpop.f32.mrb[99].mxu1  ;;  %2005 = vst [vmem:[%s2964_s18 + $0x180] sm:$0xff] %v1892_v45  ;;  %v1893_v49 = vadd.f32 %v2957_v0, %v1236_v43  ;;  %2063 = vst [vmem:[%s2964_s18 + $0x350] sm:$0xff] %v1950_v47  ;;  %v1951_v50 = vadd.f32 %v2957_v0, %v1468_v44 }
 0x1bf   : > { %2006 = vst [vmem:[%s2964_s18 + $0x188] sm:$0xff] %v1893_v49  ;;  %2064 = vst [vmem:[%s2964_s18 + $0x358] sm:$0xff] %v1951_v50 }
 0x1c2   : > { %v1241_v51 = vpop.f32.mrb[100].mxu0  ;;  %v1473_v52 = vpop.f32.mrb[100].mxu1 }
 0x1c3   : > { %v2441_v53 = vpop.f32.mrb[101].mxu0  ;;  %v2557_v54 = vpop.f32.mrb[101].mxu1  ;;  %v1894_v58 = vadd.f32 %v2674_v57, %v1241_v51  ;;  %v1952_v60 = vadd.f32 %v2674_v57, %v1473_v52 }
 0x1c4   : > { %v1244_v55 = vpop.f32.mrb[102].mxu0  ;;  %v1476_v56 = vpop.f32.mrb[102].mxu1 }
 0x1c5   : > { %v2442_v59 = vpop.f32.mrb[103].mxu0  ;;  %v2558_v61 = vpop.f32.mrb[103].mxu1  ;;  %2007 = vst [vmem:[%s2964_s18 + $0x190] sm:$0xff] %v1894_v58  ;;  %v1895_v0 = vadd.f32 %v2674_v57, %v1244_v55  ;;  %2065 = vst [vmem:[%s2964_s18 + $0x360] sm:$0xff] %v1952_v60  ;;  %v1953_v62 = vadd.f32 %v2674_v57, %v1476_v56 }
 0x1c7   : > { %2008 = vst [vmem:[%s2964_s18 + $0x198] sm:$0xff] %v1895_v0  ;;  %2066 = vst [vmem:[%s2964_s18 + $0x368] sm:$0xff] %v1953_v62 }
 0x1ca   : > { %v1249_v63 = vpop.f32.mrb[104].mxu0  ;;  %v1481_v2 = vpop.f32.mrb[104].mxu1 }
 0x1cb   : > { %v2445_v3 = vpop.f32.mrb[105].mxu0  ;;  %v2561_v4 = vpop.f32.mrb[105].mxu1  ;;  %v1896_v7 = vadd.f32 %v2674_v57, %v1249_v63  ;;  %v1954_v9 = vadd.f32 %v2674_v57, %v1481_v2 }
 0x1cc   : > { %v1252_v5 = vpop.f32.mrb[106].mxu0  ;;  %v1484_v6 = vpop.f32.mrb[106].mxu1 }
 0x1cd   : > { %v2446_v8 = vpop.f32.mrb[107].mxu0  ;;  %v2562_v10 = vpop.f32.mrb[107].mxu1  ;;  %2009 = vst [vmem:[%s2964_s18 + $0x1a0] sm:$0xff] %v1896_v7  ;;  %v1897_v11 = vadd.f32 %v2674_v57, %v1252_v5  ;;  %2067 = vst [vmem:[%s2964_s18 + $0x370] sm:$0xff] %v1954_v9  ;;  %v1955_v12 = vadd.f32 %v2674_v57, %v1484_v6 }
 0x1cf   : > { %2010 = vst [vmem:[%s2964_s18 + $0x1a8] sm:$0xff] %v1897_v11  ;;  %2068 = vst [vmem:[%s2964_s18 + $0x378] sm:$0xff] %v1955_v12 }
 0x1d2   : > { %v1257_v13 = vpop.f32.mrb[108].mxu0  ;;  %v1489_v14 = vpop.f32.mrb[108].mxu1 }
 0x1d3   : > { %v2449_v15 = vpop.f32.mrb[109].mxu0  ;;  %v2565_v16 = vpop.f32.mrb[109].mxu1  ;;  %v1898_v19 = vadd.f32 %v2674_v57, %v1257_v13  ;;  %v1956_v21 = vadd.f32 %v2674_v57, %v1489_v14 }
 0x1d4   : > { %v1260_v17 = vpop.f32.mrb[110].mxu0  ;;  %v1492_v18 = vpop.f32.mrb[110].mxu1 }
 0x1d5   : > { %v2450_v20 = vpop.f32.mrb[111].mxu0  ;;  %v2566_v22 = vpop.f32.mrb[111].mxu1  ;;  %2011 = vst [vmem:[%s2964_s18 + $0x1b0] sm:$0xff] %v1898_v19  ;;  %v1899_v23 = vadd.f32 %v2674_v57, %v1260_v17  ;;  %2069 = vst [vmem:[%s2964_s18 + $0x380] sm:$0xff] %v1956_v21 }
 0x1d7   : > { %2012 = vst [vmem:[%s2964_s18 + $0x1b8] sm:$0xff] %v1899_v23 }
 0x1da   : > { %v1265_v24 = vpop.f32.mrb[112].mxu0 }
 0x1db   : > { %v2453_v25 = vpop.f32.mrb[113].mxu0  ;;  %v1900_v26 = vadd.f32 %v2674_v57, %v1265_v24 }
 0x1dc   : > { %v1268_v1 = vpop.f32.mrb[114].mxu0 }
 0x1dd   : > { %v2454_v27 = vpop.f32.mrb[115].mxu0  ;;  %2013 = vst [vmem:[%s2964_s18 + $0x1c0] sm:$0xff] %v1900_v26  ;;  %v1901_v28 = vadd.f32 %v2674_v57, %v1268_v1 }
 0x1df   : > { %2014 = vst [vmem:[%s2964_s18 + $0x1c8] sm:$0xff] %v1901_v28 }
 0x1e0 PF: > { %s13_s14 = sadd.s32 1, %s2697_s14   ;;  %s3198_s12 = smov %s2693_s13 }
 0x1e1   : > { %p10_p5 = scmp.ge.s32.totalorder %s13_s14, 4   ;;  %s3199_s13 = smov %s3201_s15 }
 0x1e3   :  { %12 = sbr.rel (!%p10_p5) target bundleno = 2 (0x2), region = 76 }

</bundles_post_ra>
